<compile_context>
chip_gen: v7x
topology: tpu7x:2x2x1
jax: 0.10.0
libtpu: 0.0.40
codegen_flags: <defaults>
</compile_context>

<pallas_src>
import functools

import jax
import jax.numpy as jnp
from jax.experimental import pallas as pl
from jax.experimental.pallas import tpu as pltpu

BN_EPS = 1e-5
LANE = 128


def _round_up(x, m):
    return (x + m - 1) // m * m


# ---------------------------------------------------------------------------
# Phase 1: conv as K*K shifted matmuls (bf16 MXU, f32 accumulator) + per-image
#          BatchNorm partial statistics.  Grid over N images, fully parallel.
# ---------------------------------------------------------------------------
def _conv_stats_kernel(x_ref, w_ref, y_ref, stats_ref, *, K, H_out, W_out):
    # x_ref:     (1, H_pad, W_pad, C_in)       bf16  zero-padded NHWC image
    # w_ref:     (K*K, C_in, C_out_pad)        bf16
    # y_ref:     (1, H_out*W_out, C_out_pad)   f32   raw conv output
    # stats_ref: (1, 2, C_out_pad)             f32   rows = [sum, sum_sq]
    C_in = x_ref.shape[3]
    C_out_pad = y_ref.shape[2]
    HW = H_out * W_out

    acc = jnp.zeros((HW, C_out_pad), jnp.float32)
    for dh in range(K):
        for dw in range(K):
            # Static-offset slice of the padded image; (H_out, W_out, C_in) ->
            # (H_out*W_out, C_in) is a free relayout when W_out % 8 == 0.
            patch = x_ref[0, dh:dh + H_out, dw:dw + W_out, :]
            patch = patch.reshape(HW, C_in)
            acc = acc + jnp.dot(patch, w_ref[dh * K + dw],
                                preferred_element_type=jnp.float32)

    y_ref[0] = acc
    s = jnp.sum(acc, axis=0, keepdims=True)           # (1, C_out_pad)
    ss = jnp.sum(acc * acc, axis=0, keepdims=True)    # (1, C_out_pad)
    stats_ref[0] = jnp.concatenate([s, ss], axis=0)   # (2, C_out_pad)


# ---------------------------------------------------------------------------
# Phase 2: y * scale + bias, ReLU.  scale/bias fold gamma, beta, mean, rsqrt(var).
# ---------------------------------------------------------------------------
def _bn_relu_kernel(y_ref, scale_ref, bias_ref, o_ref):
    o_ref[...] = jnp.maximum(y_ref[...] * scale_ref[...] + bias_ref[...], 0.0)


def conv_block_forward(x, weight, gamma, beta, *, kernel_size=3, padding=1,
                       tile_m=512, compute_dtype=jnp.bfloat16):
    """x: (N, C_in, H, W) f32; weight: (C_out, C_in, K, K); gamma/beta: (C_out,)."""
    N, C_in, H, W = x.shape
    C_out = weight.shape[0]
    K = kernel_size
    H_out = H + 2 * padding - K + 1
    W_out = W + 2 * padding - K + 1
    H_pad = H + 2 * padding
    W_pad = W + 2 * padding
    C_out_pad = _round_up(C_out, LANE)
    HW = H_out * W_out
    M = N * HW

    # NCHW -> NHWC + ZeroPad2d(padding); bf16 for the MXU (f32 accumulation below).
    x_nhwc = jnp.transpose(x, (0, 2, 3, 1))
    x_p = jnp.pad(x_nhwc, ((0, 0), (padding, padding), (padding, padding), (0, 0)))
    x_p = x_p.astype(compute_dtype)

    # (C_out, C_in, KH, KW) -> (K*K, C_in, C_out_pad), zero-padded output lanes.
    w_r = jnp.transpose(weight, (2, 3, 1, 0)).reshape(K * K, C_in, C_out)
    w_r = jnp.pad(w_r, ((0, 0), (0, 0), (0, C_out_pad - C_out))).astype(compute_dtype)

    # -------------------- phase 1: conv + BN partial stats --------------------
    kernel1 = functools.partial(_conv_stats_kernel, K=K, H_out=H_out, W_out=W_out)
    flops1 = 2 * M * K * K * C_in * C_out_pad
    bytes1 = (x_p.size * x_p.dtype.itemsize + w_r.size * w_r.dtype.itemsize
              + M * C_out_pad * 4 + N * 2 * C_out_pad * 4)
    y_raw, stats = pl.pallas_call(
        kernel1,
        grid=(N,),
        in_specs=[
            pl.BlockSpec((1, H_pad, W_pad, C_in), lambda n: (n, 0, 0, 0)),
            pl.BlockSpec((K * K, C_in, C_out_pad), lambda n: (0, 0, 0)),
        ],
        out_specs=(
            pl.BlockSpec((1, HW, C_out_pad), lambda n: (n, 0, 0)),
            pl.BlockSpec((1, 2, C_out_pad), lambda n: (n, 0, 0)),
        ),
        out_shape=(
            jax.ShapeDtypeStruct((N, HW, C_out_pad), jnp.float32),
            jax.ShapeDtypeStruct((N, 2, C_out_pad), jnp.float32),
        ),
        compiler_params=pltpu.CompilerParams(
            dimension_semantics=("parallel",),
            vmem_limit_bytes=32 * 1024 * 1024),
        cost_estimate=pl.CostEstimate(flops=flops1, transcendentals=0,
                                      bytes_accessed=bytes1),
    )(x_p, w_r)

    # Tiny cross-image reduction of the partials (negligible glue, stays f32).
    s = jnp.sum(stats[:, 0, :], axis=0)
    ss = jnp.sum(stats[:, 1, :], axis=0)
    mean = s / M
    var = jnp.maximum(ss / M - mean * mean, 0.0)       # biased variance (training BN)
    inv_std = jax.lax.rsqrt(var + BN_EPS)
    gamma_p = jnp.pad(gamma.astype(jnp.float32), (0, C_out_pad - C_out))
    beta_p = jnp.pad(beta.astype(jnp.float32), (0, C_out_pad - C_out))
    scale = (gamma_p * inv_std).reshape(1, C_out_pad)
    bias = (beta_p - mean * gamma_p * inv_std).reshape(1, C_out_pad)

    # -------------------- phase 2: normalize + affine + ReLU --------------------
    y_flat = y_raw.reshape(M, C_out_pad)               # free collapse of leading dims
    tm = min(tile_m, M)
    grid_m = pl.cdiv(M, tm)
    flops2 = 3 * M * C_out_pad
    bytes2 = 2 * M * C_out_pad * 4
    out_flat = pl.pallas_call(
        _bn_relu_kernel,
        grid=(grid_m,),
        in_specs=[
            pl.BlockSpec((tm, C_out_pad), lambda i: (i, 0)),
            pl.BlockSpec((1, C_out_pad), lambda i: (0, 0)),
            pl.BlockSpec((1, C_out_pad), lambda i: (0, 0)),
        ],
        out_specs=pl.BlockSpec((tm, C_out_pad), lambda i: (i, 0)),
        out_shape=jax.ShapeDtypeStruct((M, C_out_pad), jnp.float32),
        compiler_params=pltpu.CompilerParams(
            dimension_semantics=("parallel",),
            vmem_limit_bytes=32 * 1024 * 1024),
        cost_estimate=pl.CostEstimate(flops=flops2, transcendentals=0,
                                      bytes_accessed=bytes2),
    )(y_flat, scale, bias)

    # Drop padded channels, back to NCHW to match the PyTorch module interface.
    out = out_flat[:, :C_out].reshape(N, H_out, W_out, C_out)
    return jnp.transpose(out, (0, 3, 1, 2))


def _reference(x, weight, gamma, beta, *, padding=1):
    xp = jnp.pad(x, ((0, 0), (0, 0), (padding, padding), (padding, padding)))
    y = jax.lax.conv_general_dilated(
        xp, weight, window_strides=(1, 1), padding="VALID",
        dimension_numbers=("NCHW", "OIHW", "NCHW"),
        precision=jax.lax.Precision.HIGHEST)
    mean = jnp.mean(y, axis=(0, 2, 3), keepdims=True)
    var = jnp.var(y, axis=(0, 2, 3), keepdims=True)    # biased
    y_hat = (y - mean) * jax.lax.rsqrt(var + BN_EPS)
    return jnp.maximum(
        y_hat * gamma.reshape(1, -1, 1, 1) + beta.reshape(1, -1, 1, 1), 0.0)


if __name__ == "__main__":
    key = jax.random.PRNGKey(0)
    k_x, k_w = jax.random.split(key)

    N, C_in, C_out, H, W = 2, 4, 8, 16, 16
    K = 3

    x = jax.random.normal(k_x, (N, C_in, H, W), dtype=jnp.float32)
    # Conv2d(bias=False) weight
    weight = jax.random.normal(k_w, (C_out, C_in, K, K), dtype=jnp.float32) * 0.1
    # BatchNorm2d default init: gamma=1, beta=0
    gamma = jnp.ones((C_out,), dtype=jnp.float32)
    beta = jnp.zeros((C_out,), dtype=jnp.float32)

    fwd = jax.jit(functools.partial(conv_block_forward,
                                    kernel_size=K, padding=1, tile_m=256))
    out = jax.block_until_ready(fwd(x, weight, gamma, beta))
    assert out.shape == (N, C_out, H, W)

    # Sanity check against a pure-JAX f32 reference (loose tol: bf16 MXU operands).
    ref = _reference(x, weight, gamma, beta, padding=1)
    max_err = float(jnp.max(jnp.abs(out - ref)))
    assert max_err < 0.1, f"max abs err {max_err}"

    # TODO(synk): Dropout2d path not implemented (module default dropout=None skips it);
    # BatchNorm running-stat updates are not part of the forward output and are omitted.
    print("KERNEL_OK")
</pallas_src>

<mosaic_0001>
module attributes {stable_mosaic.version = 11 : i64} {
  func.func @_conv_stats_kernel(%arg0: i32, %arg1: memref<1x18x18x4xbf16, #tpu.memory_space<vmem>>, %arg2: memref<9x4x128xbf16, #tpu.memory_space<vmem>>, %arg3: memref<1x256x128xf32, #tpu.memory_space<vmem>>, %arg4: memref<1x2x128xf32, #tpu.memory_space<vmem>>) attributes {dimension_semantics = [#tpu.dimension_semantics<parallel>], iteration_bounds = array<i64: 2>, scalar_prefetch = 0 : i64, scratch_operands = 0 : i64, tpu.core_type = #tpu.core_type<tc>, window_params = [{transform_indices = @transform_0, window_bounds = array<i64: 1, 18, 18, 4>}, {pipeline_mode = #tpu.pipeline_mode<synchronous>, transform_indices = @transform_1, window_bounds = array<i64: 9, 4, 128>}, {transform_indices = @transform_2, window_bounds = array<i64: 1, 256, 128>}, {transform_indices = @transform_3, window_bounds = array<i64: 1, 2, 128>}]} {
    %cst = arith.constant 0.000000e+00 : f32
    %0 = vector.broadcast %cst : f32 to vector<256x128xf32>
    %c0 = arith.constant 0 : index
    %c0_0 = arith.constant 0 : index
    %c0_1 = arith.constant 0 : index
    %c0_2 = arith.constant 0 : index
    %1 = vector.load %arg1[%c0, %c0_0, %c0_1, %c0_2] : memref<1x18x18x4xbf16, #tpu.memory_space<vmem>>, vector<1x16x16x4xbf16>
    %2 = vector.shape_cast %1 : vector<1x16x16x4xbf16> to vector<16x16x4xbf16>
    %3 = vector.shape_cast %2 : vector<16x16x4xbf16> to vector<256x4xbf16>
    %c0_3 = arith.constant 0 : index
    %c0_4 = arith.constant 0 : index
    %c0_5 = arith.constant 0 : index
    %4 = vector.load %arg2[%c0_3, %c0_4, %c0_5] : memref<9x4x128xbf16, #tpu.memory_space<vmem>>, vector<1x4x128xbf16>
    %5 = vector.shape_cast %4 : vector<1x4x128xbf16> to vector<4x128xbf16>
    %cst_6 = arith.constant dense<0.000000e+00> : vector<256x128xf32>
    %6 = tpu.matmul %3, %5, %cst_6 {dimension_numbers = #tpu.dot_dimension_numbers<[1], [0], [0], [1], [0, 0, 1, 1], [], []>} : vector<256x4xbf16>, vector<4x128xbf16>, vector<256x128xf32> -> vector<256x128xf32>
    %7 = arith.addf %0, %6 : vector<256x128xf32>
    %c0_7 = arith.constant 0 : index
    %c0_8 = arith.constant 0 : index
    %c1 = arith.constant 1 : index
    %c0_9 = arith.constant 0 : index
    %8 = vector.load %arg1[%c0_7, %c0_8, %c1, %c0_9] : memref<1x18x18x4xbf16, #tpu.memory_space<vmem>>, vector<1x16x16x4xbf16>
    %9 = vector.shape_cast %8 : vector<1x16x16x4xbf16> to vector<16x16x4xbf16>
    %10 = vector.shape_cast %9 : vector<16x16x4xbf16> to vector<256x4xbf16>
    %c1_10 = arith.constant 1 : index
    %c0_11 = arith.constant 0 : index
    %c0_12 = arith.constant 0 : index
    %11 = vector.load %arg2[%c1_10, %c0_11, %c0_12] : memref<9x4x128xbf16, #tpu.memory_space<vmem>>, vector<1x4x128xbf16>
    %12 = vector.shape_cast %11 : vector<1x4x128xbf16> to vector<4x128xbf16>
    %cst_13 = arith.constant dense<0.000000e+00> : vector<256x128xf32>
    %13 = tpu.matmul %10, %12, %cst_13 {dimension_numbers = #tpu.dot_dimension_numbers<[1], [0], [0], [1], [0, 0, 1, 1], [], []>} : vector<256x4xbf16>, vector<4x128xbf16>, vector<256x128xf32> -> vector<256x128xf32>
    %14 = arith.addf %7, %13 : vector<256x128xf32>
    %c0_14 = arith.constant 0 : index
    %c0_15 = arith.constant 0 : index
    %c2 = arith.constant 2 : index
    %c0_16 = arith.constant 0 : index
    %15 = vector.load %arg1[%c0_14, %c0_15, %c2, %c0_16] : memref<1x18x18x4xbf16, #tpu.memory_space<vmem>>, vector<1x16x16x4xbf16>
    %16 = vector.shape_cast %15 : vector<1x16x16x4xbf16> to vector<16x16x4xbf16>
    %17 = vector.shape_cast %16 : vector<16x16x4xbf16> to vector<256x4xbf16>
    %c2_17 = arith.constant 2 : index
    %c0_18 = arith.constant 0 : index
    %c0_19 = arith.constant 0 : index
    %18 = vector.load %arg2[%c2_17, %c0_18, %c0_19] : memref<9x4x128xbf16, #tpu.memory_space<vmem>>, vector<1x4x128xbf16>
    %19 = vector.shape_cast %18 : vector<1x4x128xbf16> to vector<4x128xbf16>
    %cst_20 = arith.constant dense<0.000000e+00> : vector<256x128xf32>
    %20 = tpu.matmul %17, %19, %cst_20 {dimension_numbers = #tpu.dot_dimension_numbers<[1], [0], [0], [1], [0, 0, 1, 1], [], []>} : vector<256x4xbf16>, vector<4x128xbf16>, vector<256x128xf32> -> vector<256x128xf32>
    %21 = arith.addf %14, %20 : vector<256x128xf32>
    %c0_21 = arith.constant 0 : index
    %c1_22 = arith.constant 1 : index
    %c0_23 = arith.constant 0 : index
    %c0_24 = arith.constant 0 : index
    %22 = vector.load %arg1[%c0_21, %c1_22, %c0_23, %c0_24] : memref<1x18x18x4xbf16, #tpu.memory_space<vmem>>, vector<1x16x16x4xbf16>
    %23 = vector.shape_cast %22 : vector<1x16x16x4xbf16> to vector<16x16x4xbf16>
    %24 = vector.shape_cast %23 : vector<16x16x4xbf16> to vector<256x4xbf16>
    %c3 = arith.constant 3 : index
    %c0_25 = arith.constant 0 : index
    %c0_26 = arith.constant 0 : index
    %25 = vector.load %arg2[%c3, %c0_25, %c0_26] : memref<9x4x128xbf16, #tpu.memory_space<vmem>>, vector<1x4x128xbf16>
    %26 = vector.shape_cast %25 : vector<1x4x128xbf16> to vector<4x128xbf16>
    %cst_27 = arith.constant dense<0.000000e+00> : vector<256x128xf32>
    %27 = tpu.matmul %24, %26, %cst_27 {dimension_numbers = #tpu.dot_dimension_numbers<[1], [0], [0], [1], [0, 0, 1, 1], [], []>} : vector<256x4xbf16>, vector<4x128xbf16>, vector<256x128xf32> -> vector<256x128xf32>
    %28 = arith.addf %21, %27 : vector<256x128xf32>
    %c0_28 = arith.constant 0 : index
    %c1_29 = arith.constant 1 : index
    %c1_30 = arith.constant 1 : index
    %c0_31 = arith.constant 0 : index
    %29 = vector.load %arg1[%c0_28, %c1_29, %c1_30, %c0_31] : memref<1x18x18x4xbf16, #tpu.memory_space<vmem>>, vector<1x16x16x4xbf16>
    %30 = vector.shape_cast %29 : vector<1x16x16x4xbf16> to vector<16x16x4xbf16>
    %31 = vector.shape_cast %30 : vector<16x16x4xbf16> to vector<256x4xbf16>
    %c4 = arith.constant 4 : index
    %c0_32 = arith.constant 0 : index
    %c0_33 = arith.constant 0 : index
    %32 = vector.load %arg2[%c4, %c0_32, %c0_33] : memref<9x4x128xbf16, #tpu.memory_space<vmem>>, vector<1x4x128xbf16>
    %33 = vector.shape_cast %32 : vector<1x4x128xbf16> to vector<4x128xbf16>
    %cst_34 = arith.constant dense<0.000000e+00> : vector<256x128xf32>
    %34 = tpu.matmul %31, %33, %cst_34 {dimension_numbers = #tpu.dot_dimension_numbers<[1], [0], [0], [1], [0, 0, 1, 1], [], []>} : vector<256x4xbf16>, vector<4x128xbf16>, vector<256x128xf32> -> vector<256x128xf32>
    %35 = arith.addf %28, %34 : vector<256x128xf32>
    %c0_35 = arith.constant 0 : index
    %c1_36 = arith.constant 1 : index
    %c2_37 = arith.constant 2 : index
    %c0_38 = arith.constant 0 : index
    %36 = vector.load %arg1[%c0_35, %c1_36, %c2_37, %c0_38] : memref<1x18x18x4xbf16, #tpu.memory_space<vmem>>, vector<1x16x16x4xbf16>
    %37 = vector.shape_cast %36 : vector<1x16x16x4xbf16> to vector<16x16x4xbf16>
    %38 = vector.shape_cast %37 : vector<16x16x4xbf16> to vector<256x4xbf16>
    %c5 = arith.constant 5 : index
    %c0_39 = arith.constant 0 : index
    %c0_40 = arith.constant 0 : index
    %39 = vector.load %arg2[%c5, %c0_39, %c0_40] : memref<9x4x128xbf16, #tpu.memory_space<vmem>>, vector<1x4x128xbf16>
    %40 = vector.shape_cast %39 : vector<1x4x128xbf16> to vector<4x128xbf16>
    %cst_41 = arith.constant dense<0.000000e+00> : vector<256x128xf32>
    %41 = tpu.matmul %38, %40, %cst_41 {dimension_numbers = #tpu.dot_dimension_numbers<[1], [0], [0], [1], [0, 0, 1, 1], [], []>} : vector<256x4xbf16>, vector<4x128xbf16>, vector<256x128xf32> -> vector<256x128xf32>
    %42 = arith.addf %35, %41 : vector<256x128xf32>
    %c0_42 = arith.constant 0 : index
    %c2_43 = arith.constant 2 : index
    %c0_44 = arith.constant 0 : index
    %c0_45 = arith.constant 0 : index
    %43 = vector.load %arg1[%c0_42, %c2_43, %c0_44, %c0_45] : memref<1x18x18x4xbf16, #tpu.memory_space<vmem>>, vector<1x16x16x4xbf16>
    %44 = vector.shape_cast %43 : vector<1x16x16x4xbf16> to vector<16x16x4xbf16>
    %45 = vector.shape_cast %44 : vector<16x16x4xbf16> to vector<256x4xbf16>
    %c6 = arith.constant 6 : index
    %c0_46 = arith.constant 0 : index
    %c0_47 = arith.constant 0 : index
    %46 = vector.load %arg2[%c6, %c0_46, %c0_47] : memref<9x4x128xbf16, #tpu.memory_space<vmem>>, vector<1x4x128xbf16>
    %47 = vector.shape_cast %46 : vector<1x4x128xbf16> to vector<4x128xbf16>
    %cst_48 = arith.constant dense<0.000000e+00> : vector<256x128xf32>
    %48 = tpu.matmul %45, %47, %cst_48 {dimension_numbers = #tpu.dot_dimension_numbers<[1], [0], [0], [1], [0, 0, 1, 1], [], []>} : vector<256x4xbf16>, vector<4x128xbf16>, vector<256x128xf32> -> vector<256x128xf32>
    %49 = arith.addf %42, %48 : vector<256x128xf32>
    %c0_49 = arith.constant 0 : index
    %c2_50 = arith.constant 2 : index
    %c1_51 = arith.constant 1 : index
    %c0_52 = arith.constant 0 : index
    %50 = vector.load %arg1[%c0_49, %c2_50, %c1_51, %c0_52] : memref<1x18x18x4xbf16, #tpu.memory_space<vmem>>, vector<1x16x16x4xbf16>
    %51 = vector.shape_cast %50 : vector<1x16x16x4xbf16> to vector<16x16x4xbf16>
    %52 = vector.shape_cast %51 : vector<16x16x4xbf16> to vector<256x4xbf16>
    %c7 = arith.constant 7 : index
    %c0_53 = arith.constant 0 : index
    %c0_54 = arith.constant 0 : index
    %53 = vector.load %arg2[%c7, %c0_53, %c0_54] : memref<9x4x128xbf16, #tpu.memory_space<vmem>>, vector<1x4x128xbf16>
    %54 = vector.shape_cast %53 : vector<1x4x128xbf16> to vector<4x128xbf16>
    %cst_55 = arith.constant dense<0.000000e+00> : vector<256x128xf32>
    %55 = tpu.matmul %52, %54, %cst_55 {dimension_numbers = #tpu.dot_dimension_numbers<[1], [0], [0], [1], [0, 0, 1, 1], [], []>} : vector<256x4xbf16>, vector<4x128xbf16>, vector<256x128xf32> -> vector<256x128xf32>
    %56 = arith.addf %49, %55 : vector<256x128xf32>
    %c0_56 = arith.constant 0 : index
    %c2_57 = arith.constant 2 : index
    %c2_58 = arith.constant 2 : index
    %c0_59 = arith.constant 0 : index
    %57 = vector.load %arg1[%c0_56, %c2_57, %c2_58, %c0_59] : memref<1x18x18x4xbf16, #tpu.memory_space<vmem>>, vector<1x16x16x4xbf16>
    %58 = vector.shape_cast %57 : vector<1x16x16x4xbf16> to vector<16x16x4xbf16>
    %59 = vector.shape_cast %58 : vector<16x16x4xbf16> to vector<256x4xbf16>
    %c8 = arith.constant 8 : index
    %c0_60 = arith.constant 0 : index
    %c0_61 = arith.constant 0 : index
    %60 = vector.load %arg2[%c8, %c0_60, %c0_61] : memref<9x4x128xbf16, #tpu.memory_space<vmem>>, vector<1x4x128xbf16>
    %61 = vector.shape_cast %60 : vector<1x4x128xbf16> to vector<4x128xbf16>
    %cst_62 = arith.constant dense<0.000000e+00> : vector<256x128xf32>
    %62 = tpu.matmul %59, %61, %cst_62 {dimension_numbers = #tpu.dot_dimension_numbers<[1], [0], [0], [1], [0, 0, 1, 1], [], []>} : vector<256x4xbf16>, vector<4x128xbf16>, vector<256x128xf32> -> vector<256x128xf32>
    %63 = arith.addf %56, %62 : vector<256x128xf32>
    %c0_63 = arith.constant 0 : index
    %c0_64 = arith.constant 0 : index
    %c0_65 = arith.constant 0 : index
    %64 = vector.load %arg3[%c0_63, %c0_64, %c0_65] : memref<1x256x128xf32, #tpu.memory_space<vmem>>, vector<1x256x128xf32>
    %65 = vector.shape_cast %64 : vector<1x256x128xf32> to vector<256x128xf32>
    %66 = vector.shape_cast %63 : vector<256x128xf32> to vector<1x256x128xf32>
    tpu.vector_store %arg3[%c0_63, %c0_64, %c0_65], %66 {strides = array<i32>} : memref<1x256x128xf32, #tpu.memory_space<vmem>>, vector<1x256x128xf32>,
    %cst_66 = arith.constant dense<0.000000e+00> : vector<128xf32>
    %67 = vector.multi_reduction <add>, %63, %cst_66 [0] : vector<256x128xf32> to vector<128xf32>
    %68 = vector.shape_cast %67 : vector<128xf32> to vector<1x128xf32>
    %69 = arith.mulf %63, %63 : vector<256x128xf32>
    %cst_67 = arith.constant dense<0.000000e+00> : vector<128xf32>
    %70 = vector.multi_reduction <add>, %69, %cst_67 [0] : vector<256x128xf32> to vector<128xf32>
    %71 = vector.shape_cast %70 : vector<128xf32> to vector<1x128xf32>
    %72 = tpu.concatenate %68, %71 in 0 : vector<1x128xf32>, vector<1x128xf32> -> vector<2x128xf32>
    %c0_68 = arith.constant 0 : index
    %c0_69 = arith.constant 0 : index
    %c0_70 = arith.constant 0 : index
    %73 = vector.load %arg4[%c0_68, %c0_69, %c0_70] : memref<1x2x128xf32, #tpu.memory_space<vmem>>, vector<1x2x128xf32>
    %74 = vector.shape_cast %73 : vector<1x2x128xf32> to vector<2x128xf32>
    %75 = vector.shape_cast %72 : vector<2x128xf32> to vector<1x2x128xf32>
    tpu.vector_store %arg4[%c0_68, %c0_69, %c0_70], %75 {strides = array<i32>} : memref<1x2x128xf32, #tpu.memory_space<vmem>>, vector<1x2x128xf32>,
    return
  }
  func.func @transform_0(%arg0: i32) -> (i32, i32, i32, i32) {
    %c0_i32 = arith.constant 0 : i32
    %c0_i32_0 = arith.constant 0 : i32
    %c0_i32_1 = arith.constant 0 : i32
    %c0_i32_2 = arith.constant 0 : i32
    return %arg0, %c0_i32, %c0_i32_0, %c0_i32_1 : i32, i32, i32, i32
  }
  func.func @transform_1(%arg0: i32) -> (i32, i32, i32) {
    %c0_i32 = arith.constant 0 : i32
    %c0_i32_0 = arith.constant 0 : i32
    %c0_i32_1 = arith.constant 0 : i32
    %c0_i32_2 = arith.constant 0 : i32
    return %c0_i32, %c0_i32_0, %c0_i32_1 : i32, i32, i32
  }
  func.func @transform_2(%arg0: i32) -> (i32, i32, i32) {
    %c0_i32 = arith.constant 0 : i32
    %c0_i32_0 = arith.constant 0 : i32
    %c0_i32_1 = arith.constant 0 : i32
    return %arg0, %c0_i32, %c0_i32_0 : i32, i32, i32
  }
  func.func @transform_3(%arg0: i32) -> (i32, i32, i32) {
    %c0_i32 = arith.constant 0 : i32
    %c0_i32_0 = arith.constant 0 : i32
    %c0_i32_1 = arith.constant 0 : i32
    return %arg0, %c0_i32, %c0_i32_0 : i32, i32, i32
  }
}

module attributes {stable_mosaic.version = 11 : i64} {
  func.func @_bn_relu_kernel(%arg0: i32, %arg1: memref<256x128xf32, #tpu.memory_space<vmem>>, %arg2: memref<1x128xf32, #tpu.memory_space<vmem>>, %arg3: memref<1x128xf32, #tpu.memory_space<vmem>>, %arg4: memref<256x128xf32, #tpu.memory_space<vmem>>) attributes {dimension_semantics = [#tpu.dimension_semantics<parallel>], iteration_bounds = array<i64: 2>, scalar_prefetch = 0 : i64, scratch_operands = 0 : i64, tpu.core_type = #tpu.core_type<tc>, window_params = [{transform_indices = @transform_0, window_bounds = array<i64: 256, 128>}, {pipeline_mode = #tpu.pipeline_mode<synchronous>, transform_indices = @transform_1, window_bounds = array<i64: 1, 128>}, {pipeline_mode = #tpu.pipeline_mode<synchronous>, transform_indices = @transform_2, window_bounds = array<i64: 1, 128>}, {transform_indices = @transform_3, window_bounds = array<i64: 256, 128>}]} {
    %c0 = arith.constant 0 : index
    %c0_0 = arith.constant 0 : index
    %0 = vector.load %arg1[%c0, %c0_0] : memref<256x128xf32, #tpu.memory_space<vmem>>, vector<256x128xf32>
    %c0_1 = arith.constant 0 : index
    %c0_2 = arith.constant 0 : index
    %1 = vector.load %arg2[%c0_1, %c0_2] : memref<1x128xf32, #tpu.memory_space<vmem>>, vector<1x128xf32>
    %2 = vector.broadcast %1 : vector<1x128xf32> to vector<256x128xf32>
    %3 = arith.mulf %0, %2 : vector<256x128xf32>
    %c0_3 = arith.constant 0 : index
    %c0_4 = arith.constant 0 : index
    %4 = vector.load %arg3[%c0_3, %c0_4] : memref<1x128xf32, #tpu.memory_space<vmem>>, vector<1x128xf32>
    %5 = vector.broadcast %4 : vector<1x128xf32> to vector<256x128xf32>
    %6 = arith.addf %3, %5 : vector<256x128xf32>
    %cst = arith.constant 0.000000e+00 : f32
    %7 = vector.broadcast %cst : f32 to vector<256x128xf32>
    %8 = arith.maximumf %6, %7 : vector<256x128xf32>
    %c0_5 = arith.constant 0 : index
    %c0_6 = arith.constant 0 : index
    %9 = vector.load %arg4[%c0_5, %c0_6] : memref<256x128xf32, #tpu.memory_space<vmem>>, vector<256x128xf32>
    tpu.vector_store %arg4[%c0_5, %c0_6], %8 {strides = array<i32>} : memref<256x128xf32, #tpu.memory_space<vmem>>, vector<256x128xf32>,
    return
  }
  func.func @transform_0(%arg0: i32) -> (i32, i32) {
    %c0_i32 = arith.constant 0 : i32
    %c0_i32_0 = arith.constant 0 : i32
    return %arg0, %c0_i32 : i32, i32
  }
  func.func @transform_1(%arg0: i32) -> (i32, i32) {
    %c0_i32 = arith.constant 0 : i32
    %c0_i32_0 = arith.constant 0 : i32
    %c0_i32_1 = arith.constant 0 : i32
    return %c0_i32, %c0_i32_0 : i32, i32
  }
  func.func @transform_2(%arg0: i32) -> (i32, i32) {
    %c0_i32 = arith.constant 0 : i32
    %c0_i32_0 = arith.constant 0 : i32
    %c0_i32_1 = arith.constant 0 : i32
    return %c0_i32, %c0_i32_0 : i32, i32
  }
  func.func @transform_3(%arg0: i32) -> (i32, i32) {
    %c0_i32 = arith.constant 0 : i32
    %c0_i32_0 = arith.constant 0 : i32
    return %arg0, %c0_i32 : i32, i32
  }
}

</mosaic_0001>

<bundles_post_ra>
// kernel: conv_block_forward.3
= control target key start
LH: loop header
LB: loop body
LE: loop exit
PB: predicated region body
PF: predicated region fallthrough
CT: control target
= control target key end

     0   :  { %s453_s12 = smov 0   ;;  %s612_s0 = inlined_call_operand.vmem [shape: f32[512,128], index: 0, kind: input, shape index: {}]   ;;  %s613_s1 = inlined_call_operand.vmem [shape: f32[1,128], index: 1, kind: input, shape index: {}]   ;;  %s614_s2 = inlined_call_operand.vmem [shape: f32[1,128], index: 2, kind: input, shape index: {}]   ;;  %s615_s3 = inlined_call_operand.vmem [shape: f32[512,128], index: 3, kind: output, shape index: {}]  }
   0x1 LB: > { %s404_s13 = sadd.s32 4294967295, %s431_s12   ;;  %p408_p0 = scmp.ge.s32.totalorder %s431_s12, 1  ;;  %s431_s12 = sphi %s453_s12, %s13_s12  }
   0x2   : > { %p138_p1 = scmp.lt.s32.totalorder %s431_s12, 3 }
   0x4   : > { %p139_p2 = pnand %p408_p0, %p138_p1 }
   0x5   : > { %s409_s14 = sshll.u32 (!%p139_p2), %s404_s13, 5  ;;  %v464_v0 = vld [vmem:[%s613_s1] ss:$0 sm:$0xff] (!%p139_p2) }
   0x6   : > { %142 = sbr.rel (%p139_p2) target bundleno = 46 (0x2e), region = 32  ;;  %p163_p3 = scmp.lt.s32.totalorder (!%p139_p2), %s409_s14, 63  ;;  %v474_v1 = vld [vmem:[%s614_s2] ss:$0 sm:$0xff] (!%p139_p2) }
   0xd   : > { %s617_s14 = smov (!%p163_p3, %s409_s14), 63 }
   0xe   : > { %s410_s15 = sshll.u32 %s617_s14, 3 }
   0xf   : > { %s469_s20 = scalar_lea.vmem %s612_s0, %s410_s15  ;;  %s497_s25 = scalar_lea.vmem %s615_s3, %s410_s15 }
  0x10   : > { %v174_v2 = vld [vmem:[%s469_s20] sm:$0xff]  ;;  %v175_v3 = vld [vmem:[%s469_s20 + $0x8] sm:$0xff]  ;;  %v176_v4 = vld [vmem:[%s469_s20 + $0x10] sm:$0xff] }
  0x11   : > { %v213_v5 = vmul.f32 %v464_v0, %v174_v2  ;;  %v214_v6 = vmul.f32 %v464_v0, %v175_v3  ;;  %v215_v7 = vmul.f32 %v464_v0, %v176_v4  ;;  %v177_v8 = vld [vmem:[%s469_s20 + $0x18] sm:$0xff]  ;;  %v178_v9 = vld [vmem:[%s469_s20 + $0x20] sm:$0xff]  ;;  %v179_v10 = vld [vmem:[%s469_s20 + $0x28] sm:$0xff] }
  0x12   : > { %v216_v11 = vmul.f32 %v464_v0, %v177_v8  ;;  %v217_v12 = vmul.f32 %v464_v0, %v178_v9  ;;  %v218_v13 = vmul.f32 %v464_v0, %v179_v10  ;;  %v180_v14 = vld [vmem:[%s469_s20 + $0x30] sm:$0xff]  ;;  %v181_v15 = vld [vmem:[%s469_s20 + $0x38] sm:$0xff]  ;;  %v182_v24 = vld [vmem:[%s469_s20 + $0x40] sm:$0xff] }
  0x13   : > { %v252_v16 = vadd.f32 %v474_v1, %v213_v5  ;;  %v253_v17 = vadd.f32 %v474_v1, %v214_v6  ;;  %v254_v18 = vadd.f32 %v474_v1, %v215_v7  ;;  %v219_v19 = vmul.f32 %v464_v0, %v180_v14  ;;  %v183_v25 = vld [vmem:[%s469_s20 + $0x48] sm:$0xff]  ;;  %v184_v26 = vld [vmem:[%s469_s20 + $0x50] sm:$0xff]  ;;  %v185_v31 = vld [vmem:[%s469_s20 + $0x58] sm:$0xff] }
  0x14   : > { %v255_v20 = vadd.f32 %v474_v1, %v216_v11  ;;  %v256_v21 = vadd.f32 %v474_v1, %v217_v12  ;;  %v257_v22 = vadd.f32 %v474_v1, %v218_v13  ;;  %v220_v23 = vmul.f32 %v464_v0, %v181_v15  ;;  %v186_v32 = vld [vmem:[%s469_s20 + $0x60] sm:$0xff]  ;;  %v187_v33 = vld [vmem:[%s469_s20 + $0x68] sm:$0xff]  ;;  %v188_v38 = vld [vmem:[%s469_s20 + $0x70] sm:$0xff] }
  0x15   : > { %v284_v27 = vmax.f32 %v252_v16, 0.0  ;;  %v285_v28 = vmax.f32 %v253_v17, 0.0  ;;  %v286_v29 = vmax.f32 %v254_v18, 0.0  ;;  %v258_v30 = vadd.f32 %v474_v1, %v219_v19  ;;  %v189_v43 = vld [vmem:[%s469_s20 + $0x78] sm:$0xff]  ;;  %v190_v56 = vld [vmem:[%s469_s20 + $0x80] sm:$0xff]  ;;  %v191_v57 = vld [vmem:[%s469_s20 + $0x88] sm:$0xff] }
  0x16   : > { %v287_v34 = vmax.f32 %v255_v20, 0.0  ;;  %v288_v35 = vmax.f32 %v256_v21, 0.0  ;;  %v289_v36 = vmax.f32 %v257_v22, 0.0  ;;  %v259_v37 = vadd.f32 %v474_v1, %v220_v23  ;;  %v192_v58 = vld [vmem:[%s469_s20 + $0x90] sm:$0xff]  ;;  %v193_v63 = vld [vmem:[%s469_s20 + $0x98] sm:$0xff]  ;;  %v194_v2 = vld [vmem:[%s469_s20 + $0xa0] sm:$0xff] }
  0x17   : > { %316 = vst [vmem:[%s497_s25] sm:$0xff] %v284_v27  ;;  %317 = vst [vmem:[%s497_s25 + $0x8] sm:$0xff] %v285_v28  ;;  %v290_v39 = vmax.f32 %v258_v30, 0.0  ;;  %v221_v40 = vmul.f32 %v464_v0, %v182_v24  ;;  %v222_v41 = vmul.f32 %v464_v0, %v183_v25  ;;  %v223_v42 = vmul.f32 %v464_v0, %v184_v26  ;;  %v195_v3 = vld [vmem:[%s469_s20 + $0xa8] sm:$0xff]  ;;  %v196_v8 = vld [vmem:[%s469_s20 + $0xb0] sm:$0xff] }
  0x18   : > { %318 = vst [vmem:[%s497_s25 + $0x10] sm:$0xff] %v286_v29  ;;  %319 = vst [vmem:[%s497_s25 + $0x18] sm:$0xff] %v287_v34  ;;  %v291_v44 = vmax.f32 %v259_v37, 0.0  ;;  %v224_v45 = vmul.f32 %v464_v0, %v185_v31  ;;  %v225_v46 = vmul.f32 %v464_v0, %v186_v32  ;;  %v226_v47 = vmul.f32 %v464_v0, %v187_v33  ;;  %v197_v13 = vld [vmem:[%s469_s20 + $0xb8] sm:$0xff]  ;;  %v198_v26 = vld [vmem:[%s469_s20 + $0xc0] sm:$0xff] }
  0x19   : > { %320 = vst [vmem:[%s497_s25 + $0x20] sm:$0xff] %v288_v35  ;;  %321 = vst [vmem:[%s497_s25 + $0x28] sm:$0xff] %v289_v36  ;;  %v260_v48 = vadd.f32 %v474_v1, %v221_v40  ;;  %v261_v49 = vadd.f32 %v474_v1, %v222_v41  ;;  %v262_v50 = vadd.f32 %v474_v1, %v223_v42  ;;  %v199_v27 = vld [vmem:[%s469_s20 + $0xc8] sm:$0xff]  ;;  %v200_v28 = vld [vmem:[%s469_s20 + $0xd0] sm:$0xff] }
  0x1a   : > { %322 = vst [vmem:[%s497_s25 + $0x30] sm:$0xff] %v290_v39  ;;  %v227_v51 = vmul.f32 %v464_v0, %v188_v38  ;;  %323 = vst [vmem:[%s497_s25 + $0x38] sm:$0xff] %v291_v44  ;;  %v263_v52 = vadd.f32 %v474_v1, %v224_v45  ;;  %v264_v53 = vadd.f32 %v474_v1, %v225_v46  ;;  %v201_v33 = vld [vmem:[%s469_s20 + $0xd8] sm:$0xff]  ;;  %v202_v34 = vld [vmem:[%s469_s20 + $0xe0] sm:$0xff] }
  0x1b   : > { %v265_v54 = vadd.f32 %v474_v1, %v226_v47  ;;  %v228_v55 = vmul.f32 %v464_v0, %v189_v43  ;;  %v292_v59 = vmax.f32 %v260_v48, 0.0  ;;  %v293_v60 = vmax.f32 %v261_v49, 0.0  ;;  %v203_v35 = vld [vmem:[%s469_s20 + $0xe8] sm:$0xff]  ;;  %v204_v40 = vld [vmem:[%s469_s20 + $0xf0] sm:$0xff]  ;;  %v205_v45 = vld [vmem:[%s469_s20 + $0xf8] sm:$0xff] }
  0x1c   : > { %v294_v61 = vmax.f32 %v262_v50, 0.0  ;;  %v266_v62 = vadd.f32 %v474_v1, %v227_v51  ;;  %v295_v4 = vmax.f32 %v263_v52, 0.0  ;;  %v296_v5 = vmax.f32 %v264_v53, 0.0 }
  0x1d   : > { %v297_v6 = vmax.f32 %v265_v54, 0.0  ;;  %v267_v7 = vadd.f32 %v474_v1, %v228_v55  ;;  %324 = vst [vmem:[%s497_s25 + $0x40] sm:$0xff] %v292_v59  ;;  %325 = vst [vmem:[%s497_s25 + $0x48] sm:$0xff] %v293_v60  ;;  %v229_v10 = vmul.f32 %v464_v0, %v190_v56  ;;  %v230_v11 = vmul.f32 %v464_v0, %v191_v57 }
  0x1e   : > { %326 = vst [vmem:[%s497_s25 + $0x50] sm:$0xff] %v294_v61  ;;  %v298_v9 = vmax.f32 %v266_v62, 0.0  ;;  %v231_v12 = vmul.f32 %v464_v0, %v192_v58  ;;  %327 = vst [vmem:[%s497_s25 + $0x58] sm:$0xff] %v295_v4  ;;  %v232_v15 = vmul.f32 %v464_v0, %v193_v63  ;;  %v233_v16 = vmul.f32 %v464_v0, %v194_v2 }
  0x1f   : > { %328 = vst [vmem:[%s497_s25 + $0x60] sm:$0xff] %v296_v5  ;;  %329 = vst [vmem:[%s497_s25 + $0x68] sm:$0xff] %v297_v6  ;;  %v299_v14 = vmax.f32 %v267_v7, 0.0  ;;  %v234_v17 = vmul.f32 %v464_v0, %v195_v3  ;;  %v268_v18 = vadd.f32 %v474_v1, %v229_v10  ;;  %v269_v19 = vadd.f32 %v474_v1, %v230_v11 }
  0x20   : > { %330 = vst [vmem:[%s497_s25 + $0x70] sm:$0xff] %v298_v9  ;;  %v270_v20 = vadd.f32 %v474_v1, %v231_v12  ;;  %v235_v21 = vmul.f32 %v464_v0, %v196_v8  ;;  %v271_v22 = vadd.f32 %v474_v1, %v232_v15  ;;  %v272_v23 = vadd.f32 %v474_v1, %v233_v16 }
  0x21   : > { %331 = vst [vmem:[%s497_s25 + $0x78] sm:$0xff] %v299_v14  ;;  %v273_v24 = vadd.f32 %v474_v1, %v234_v17  ;;  %v236_v25 = vmul.f32 %v464_v0, %v197_v13  ;;  %v300_v29 = vmax.f32 %v268_v18, 0.0  ;;  %v301_v30 = vmax.f32 %v269_v19, 0.0 }
  0x22   : > { %v302_v31 = vmax.f32 %v270_v20, 0.0  ;;  %v274_v32 = vadd.f32 %v474_v1, %v235_v21  ;;  %v303_v36 = vmax.f32 %v271_v22, 0.0  ;;  %v304_v37 = vmax.f32 %v272_v23, 0.0 }
  0x23   : > { %v305_v38 = vmax.f32 %v273_v24, 0.0  ;;  %v275_v39 = vadd.f32 %v474_v1, %v236_v25  ;;  %332 = vst [vmem:[%s497_s25 + $0x80] sm:$0xff] %v300_v29  ;;  %333 = vst [vmem:[%s497_s25 + $0x88] sm:$0xff] %v301_v30  ;;  %v237_v42 = vmul.f32 %v464_v0, %v198_v26  ;;  %v238_v43 = vmul.f32 %v464_v0, %v199_v27 }
  0x24   : > { %334 = vst [vmem:[%s497_s25 + $0x90] sm:$0xff] %v302_v31  ;;  %v306_v41 = vmax.f32 %v274_v32, 0.0  ;;  %v239_v44 = vmul.f32 %v464_v0, %v200_v28  ;;  %335 = vst [vmem:[%s497_s25 + $0x98] sm:$0xff] %v303_v36  ;;  %v240_v47 = vmul.f32 %v464_v0, %v201_v33  ;;  %v241_v48 = vmul.f32 %v464_v0, %v202_v34 }
  0x25   : > { %336 = vst [vmem:[%s497_s25 + $0xa0] sm:$0xff] %v304_v37  ;;  %337 = vst [vmem:[%s497_s25 + $0xa8] sm:$0xff] %v305_v38  ;;  %v307_v46 = vmax.f32 %v275_v39, 0.0  ;;  %v242_v49 = vmul.f32 %v464_v0, %v203_v35  ;;  %v276_v50 = vadd.f32 %v474_v1, %v237_v42  ;;  %v277_v51 = vadd.f32 %v474_v1, %v238_v43 }
  0x26   : > { %338 = vst [vmem:[%s497_s25 + $0xb0] sm:$0xff] %v306_v41  ;;  %v278_v52 = vadd.f32 %v474_v1, %v239_v44  ;;  %v243_v53 = vmul.f32 %v464_v0, %v204_v40  ;;  %v279_v54 = vadd.f32 %v474_v1, %v240_v47  ;;  %v280_v55 = vadd.f32 %v474_v1, %v241_v48 }
  0x27   : > { %339 = vst [vmem:[%s497_s25 + $0xb8] sm:$0xff] %v307_v46  ;;  %v281_v56 = vadd.f32 %v474_v1, %v242_v49  ;;  %v244_v57 = vmul.f32 %v464_v0, %v205_v45  ;;  %v308_v58 = vmax.f32 %v276_v50, 0.0  ;;  %v309_v59 = vmax.f32 %v277_v51, 0.0 }
  0x28   : > { %v310_v60 = vmax.f32 %v278_v52, 0.0  ;;  %v282_v61 = vadd.f32 %v474_v1, %v243_v53  ;;  %v311_v62 = vmax.f32 %v279_v54, 0.0  ;;  %v312_v63 = vmax.f32 %v280_v55, 0.0 }
  0x29   : > { %v313_v2 = vmax.f32 %v281_v56, 0.0  ;;  %v283_v3 = vadd.f32 %v474_v1, %v244_v57  ;;  %340 = vst [vmem:[%s497_s25 + $0xc0] sm:$0xff] %v308_v58  ;;  %341 = vst [vmem:[%s497_s25 + $0xc8] sm:$0xff] %v309_v59 }
  0x2a   : > { %342 = vst [vmem:[%s497_s25 + $0xd0] sm:$0xff] %v310_v60  ;;  %v314_v4 = vmax.f32 %v282_v61, 0.0  ;;  %343 = vst [vmem:[%s497_s25 + $0xd8] sm:$0xff] %v311_v62 }
  0x2b   : > { %344 = vst [vmem:[%s497_s25 + $0xe0] sm:$0xff] %v312_v63  ;;  %345 = vst [vmem:[%s497_s25 + $0xe8] sm:$0xff] %v313_v2  ;;  %v315_v0 = vmax.f32 %v283_v3, 0.0 }
  0x2c   : > { %346 = vst [vmem:[%s497_s25 + $0xf0] sm:$0xff] %v314_v4 }
  0x2d   : > { %347 = vst [vmem:[%s497_s25 + $0xf8] sm:$0xff] %v315_v0 }
  0x2e PF: > { %s13_s12 = sadd.s32 1, %s431_s12  }
  0x2f   : > { %p10_p4 = scmp.ge.s32.totalorder %s13_s12, 4  }
  0x31   :  { %12 = sbr.rel (!%p10_p4) target bundleno = 1 (0x1), region = 62 }

// kernel: conv_block_forward.2
= control target key start
LH: loop header
LB: loop body
LE: loop exit
PB: predicated region body
PF: predicated region fallthrough
CT: control target
= control target key end

     0   :  { %s6386_s12 = smov 0   ;;  %s8157_s0 = inlined_call_operand.vmem [shape: bf16[2,18,18,4], index: 0, kind: input, shape index: {}]   ;;  %s8158_s1 = inlined_call_operand.vmem [shape: bf16[9,4,128], index: 1, kind: input, shape index: {}]   ;;  %s8159_s2 = inlined_call_operand.vmem [shape: f32[2,256,128], index: 2, kind: output, shape index: {0}]   ;;  %s8160_s3 = inlined_call_operand.vmem [shape: f32[2,2,128], index: 3, kind: output, shape index: {1}]  }
   0x1 LB: > { %s4969_s13 = sadd.s32 4294967295, %s6364_s12   ;;  %p4973_p0 = scmp.ge.s32.totalorder %s6364_s12, 1  ;;  %s6364_s12 = sphi %s6386_s12, %s14_s12  }
   0x2   : > { %p140_p1 = scmp.lt.s32.totalorder %s6364_s12, 3 }
   0x4   : > { %p141_p2 = pnand %p4973_p0, %p140_p1 }
   0x6   : > { %144 = sbr.rel (%p141_p2) target bundleno = 604 (0x25c), region = 28 }
   0xd   : > { %v4978_v0 = vld [vmem:[%s8158_s1 + $0x2] sm:$0x3]  ;;  %vm718_vm0 = vcmask 1041408   ;;  %v5205_v1 = vld [vmem:[%s8158_s1 + $0x8] sm:$0x3]  ;;  %p168_p3 = scmp.lt.s32.totalorder %s4969_s13, 1 }
   0xe   : > { %6234 = vmatprep.subr.msk.bf16.mxu1 %vm718_vm0, %v4978_v0  ;;  %6238 = vmatprep.subr.msk.bf16.mxu0 %vm718_vm0, %v5205_v1  ;;  %v720_v2 = vsel %vm718_vm0, %v4978_v0, 0  ;;  %v6404_v3 = vsel %vm718_vm0, %v5205_v1, 0  ;;  %v215_v4 = vld [vmem:[%s8158_s1] sm:$0x3]  ;;  %v5270_v5 = vld [vmem:[%s8158_s1 + $0xa] sm:$0x3] }
   0xf   : > { %8174 = vst [vmem:[#allocation2_spill] sm:$0xff] %v6404_v3  ;;  %5671 = vmatpush3.bf16.msra.mxu1 %v720_v2  ;;  %5807 = vmatpush3.bf16.msra.mxu0 %v6404_v3  ;;  %s8229_s13 = smov (!%p168_p3, %s4969_s13), 1  ;;  %vm232_vm1 = vsmask.f32 3328  ;;  %vm233_vm2 = vsmask.f32 7440 }
  0x10   : > { %6235 = vmatprep.subr.msk.bf16.mxu1 %vm718_vm0, %v215_v4  ;;  %6240 = vmatprep.subr.msk.bf16.mxu0 %vm718_vm0, %v5270_v5  ;;  %s6244_s22 = smul.u32 216, %s8229_s13  ;;  %vm669_vm3 = vcmask 31744   ;;  %v6434_v17 = vsel %vm718_vm0, %v215_v4, 0  ;;  %v6440_v26 = vld [vmem:[%s8158_s1 + $0xc] sm:$0x3]  ;;  %vm6447_vm4 = vmor %vm232_vm1, %vm233_vm2  ;;  %v6453_v37 = vsel %vm718_vm0, %v5270_v5, 0 }
  0x11   : > { %v6457_v41 = vsel %vm718_vm0, %v6440_v26, 0  ;;  %vm1223_vm5 = vcmask 1042432   ;;  %vm1224_vm6 = vcmask 1046532   ;;  %s5516_s15 = sshll.u32 %s8229_s13, 8  ;;  %s4977_s19 = sshll.u32 %s8229_s13, 1  ;;  %vm4880_vm8 = vcmask 1040384  }
  0x12   : > { %s6421_s25 = scalar_lea.vmem %s8157_s0, %s6244_s22  ;;  %vm6673_vm7 = vmor %vm1223_vm5, %vm1224_vm6  ;;  %s8111_s18 = scalar_lea.vmem %s8159_s2, %s5516_s15 }
  0x13   : > { %v183_v6 = vld [vmem:[%s6421_s25] sm:$0xf]  ;;  %v184_v7 = vld [vmem:[%s6421_s25 + $0x4] sm:$0xf]  ;;  %v216_v8 = vld [vmem:[%s6421_s25 + $0x8] sm:$0x1]  ;;  %s181_s22 = scalar_lea.vmem %s8160_s3, %s4977_s19 }
  0x14   : > { %v236_v9 = vshrl.u32 %v183_v6, 16  ;;  %v239_v10 = vshll.u32 %v183_v6, 16  ;;  %v245_v11 = vshll.u32 %v184_v7, 16  ;;  %v249_v12 = vshrl.u32 %v184_v7, 16  ;;  %v5157_v13 = vld [vmem:[%s6421_s25 + $0xc] sm:$0xf] }
  0x15   : > { %v255_v14 = vshll.u32 %v216_v8, 16  ;;  %v6428_v15 = vld [vmem:[%s6421_s25 + $0x10] sm:$0xf]  ;;  %v6431_v16 = vld [vmem:[%s6421_s25 + $0x14] sm:$0x1]  ;;  %v2040_v23 = vshrl.u32 %v5157_v13, 16 }
  0x16   : > { %v238_v18 = vrot.slane %v236_v9, 4  ;;  %v241_v19 = vrot.slane %v239_v10, 5  ;;  %v247_v20 = vrot.slane %v245_v11, 5  ;;  %v251_v21 = vrot.slane %v249_v12, 4  ;;  %v185_v31 = vld [vmem:[%s6421_s25 + $0xc] sm:$0xf] }
  0x17   : > { %v257_v22 = vrot.slane %v255_v14, 5  ;;  %v2043_v24 = vshll.u32 %v5157_v13, 16  ;;  %v2049_v25 = vshll.u32 %v6428_v15, 16  ;;  %v2053_v29 = vshrl.u32 %v6428_v15, 16  ;;  %v186_v36 = vld [vmem:[%s6421_s25 + $0x10] sm:$0xf] }
  0x18   : > { %v242_v27 = vor.u32 %v241_v19, %v238_v18  ;;  %v252_v28 = vor.u32 %v251_v21, %v247_v20  ;;  %v2059_v30 = vshll.u32 %v6431_v16, 16  ;;  %v2042_v33 = vrot.slane %v2040_v23, 4  ;;  %v217_v44 = vld [vmem:[%s6421_s25 + $0x14] sm:$0x1]  ;;  %v5160_v55 = vld [vmem:[%s6421_s25 + $0x18] sm:$0xf] }
  0x19   : > { %v2045_v34 = vrot.slane %v2043_v24, 5  ;;  %v2051_v35 = vrot.slane %v2049_v25, 5  ;;  %v2055_v40 = vrot.slane %v2053_v29, 4  ;;  %v260_v45 = vshrl.u32 %v185_v31, 16  ;;  %v6466_v60 = vld [vmem:[%s6421_s25 + $0x1c] sm:$0xf] }
  0x1a   : > { %v243_v38 = vrot.slane %v242_v27, 4  ;;  %v253_v39 = vrot.slane %v252_v28, 4  ;;  %v2061_v43 = vrot.slane %v2059_v30, 5  ;;  %v263_v46 = vshll.u32 %v185_v31, 16  ;;  %v6474_v1 = vld [vmem:[%s6421_s25 + $0x20] sm:$0x1] }
  0x1b   : > { %v2046_v42 = vor.u32 %v2045_v34, %v2042_v33  ;;  %v2056_v49 = vor.u32 %v2055_v40, %v2051_v35  ;;  %v269_v50 = vshll.u32 %v186_v36, 16  ;;  %v262_v53 = vrot.slane %v260_v45, 4  ;;  %v187_v18 = vld [vmem:[%s6421_s25 + $0x18] sm:$0xf]  ;;  %v188_v23 = vld [vmem:[%s6421_s25 + $0x1c] sm:$0xf] }
  0x1c   : > { %v248_v47 = vsel %vm6447_vm4, %v243_v38, %v247_v20  ;;  %v258_v48 = vsel %vm6447_vm4, %v253_v39, %v257_v22  ;;  %v265_v54 = vrot.slane %v263_v46, 5  ;;  %v273_v58 = vshrl.u32 %v186_v36, 16  ;;  %v218_v31 = vld [vmem:[%s6421_s25 + $0x20] sm:$0x1]  ;;  %v5163_v40 = vld [vmem:[%s6421_s25 + $0x24] sm:$0xf] }
  0x1d   : > { %v4979_v51 = vcombine.low %v248_v47, %v258_v48  ;;  %v2047_v52 = vrot.slane %v2046_v42, 4  ;;  %v2057_v56 = vrot.slane %v2056_v49, 4  ;;  %v271_v57 = vrot.slane %v269_v50, 5  ;;  %v6497_v46 = vld [vmem:[%s6421_s25 + $0x28] sm:$0xf] }
  0x1e   : > { %v279_v59 = vshll.u32 %v217_v44, 16  ;;  %v2783_v62 = vrot.slane %v6428_v15, 5  ;;  %v2786_v63 = vrot.slane %v6431_v16, 5  ;;  %v266_v0 = vor.u32 %v265_v54, %v262_v53  ;;  %v6506_v54 = vld [vmem:[%s6421_s25 + $0x2c] sm:$0x1] }
  0x1f   : > { %5672 = vmatprep.mubr.msk.bf16.mxu1 %vm669_vm3, %v4979_v51  ;;  %v2052_v61 = vsel %vm6447_vm4, %v2047_v52, %v2051_v35  ;;  %v2062_v2 = vsel %vm6447_vm4, %v2057_v56, %v2061_v43  ;;  %v275_v4 = vrot.slane %v273_v58, 4  ;;  %v2064_v6 = vshrl.u32 %v5160_v55, 16  ;;  %v5059_v51 = vld [vmem:[%s8158_s1 + $0x4] sm:$0x3]  ;;  %v6706_v16 = vld [vmem:[%s6421_s25 + $0x7c] sm:$0xf] }
  0x20   : > { %v281_v5 = vrot.slane %v279_v59, 5  ;;  %v5206_v7 = vcombine.low %v2052_v61, %v2062_v2  ;;  %v267_v8 = vrot.slane %v266_v0, 4  ;;  %v2067_v9 = vshll.u32 %v5160_v55, 16  ;;  %v189_v0 = vld [vmem:[%s6421_s25 + $0x24] sm:$0xf] }
  0x21   : > { %v2073_v10 = vshll.u32 %v6466_v60, 16  ;;  %v276_v11 = vor.u32 %v275_v4, %v271_v57  ;;  %v2066_v12 = vrot.slane %v2064_v6, 4  ;;  %v2077_v13 = vshrl.u32 %v6466_v60, 16 }
  0x22   : > { %v2083_v14 = vshll.u32 %v6474_v1, 16  ;;  %5808 = vmatprep.mubr.msk.bf16.mxu0 %vm669_vm3, %v5206_v7  ;;  %v272_v19 = vsel %vm6447_vm4, %v267_v8, %v271_v57  ;;  %v2069_v20 = vrot.slane %v2067_v9, 5  ;;  %v2790_v22 = vrot.slane %v6466_v60, 5  ;;  %v190_v7 = vld [vmem:[%s6421_s25 + $0x28] sm:$0xf] }
  0x23   : > { %v2075_v21 = vrot.slane %v2073_v10, 5  ;;  %v277_v24 = vrot.slane %v276_v11, 4  ;;  %v2079_v25 = vrot.slane %v2077_v13, 4  ;;  %v2793_v28 = vrot.slane %v6474_v1, 5  ;;  %v219_v13 = vld [vmem:[%s6421_s25 + $0x2c] sm:$0x1] }
  0x24   : > { %v2085_v27 = vrot.slane %v2083_v14, 5  ;;  %v2070_v29 = vor.u32 %v2069_v20, %v2066_v12  ;;  %v6490_v30 = vrot.slane %v2790_v22, 4  ;;  %v284_v33 = vshrl.u32 %v187_v18, 16 }
  0x25   : > { %v287_v34 = vshll.u32 %v187_v18, 16  ;;  %v282_v35 = vsel %vm6447_vm4, %v277_v24, %v281_v5  ;;  %v2080_v36 = vor.u32 %v2079_v25, %v2075_v21  ;;  %v293_v38 = vshll.u32 %v188_v23, 16  ;;  %v5166_v24 = vld [vmem:[%s6421_s25 + $0x30] sm:$0xf] }
  0x26   : > { %v297_v39 = vshrl.u32 %v188_v23, 16  ;;  %v4980_v42 = vcombine.low %v272_v19, %v282_v35  ;;  %v2071_v43 = vrot.slane %v2070_v29, 4  ;;  %v286_v44 = vrot.slane %v284_v33, 4  ;;  %v6526_v33 = vld [vmem:[%s6421_s25 + $0x34] sm:$0xf] }
  0x27   : > { %v289_v45 = vrot.slane %v287_v34, 5  ;;  %v2081_v47 = vrot.slane %v2080_v36, 4  ;;  %v295_v48 = vrot.slane %v293_v38, 5  ;;  %v303_v50 = vshll.u32 %v218_v31, 16 }
  0x28   : > { %v299_v49 = vrot.slane %v297_v39, 4  ;;  %5673 = vmatmul.mubr.msk.bf16.vlgmr.msra.gmra.mrb[0].mxu1 %vm669_vm3, %v4980_v42  ;;  %v2076_v52 = vsel %vm6447_vm4, %v2071_v43, %v2075_v21  ;;  %v2088_v55 = vshrl.u32 %v5163_v40, 16  ;;  %v2091_v56 = vshll.u32 %v5163_v40, 16  ;;  %v6534_v40 = vld [vmem:[%s6421_s25 + $0x38] sm:$0x1] }
  0x29   : > { %v290_v53 = vor.u32 %v289_v45, %v286_v44  ;;  %5705 = vmatpush3.bf16.msra.mxu1 %v6434_v17  ;;  %v2086_v57 = vsel %vm6447_vm4, %v2081_v47, %v2085_v27  ;;  %v305_v59 = vrot.slane %v303_v50, 5  ;;  %v2097_v61 = vshll.u32 %v6497_v46, 16 }
  0x2a   : > { %v300_v58 = vor.u32 %v299_v49, %v295_v48  ;;  %v5207_v2 = vcombine.low %v2076_v52, %v2086_v57  ;;  %v2090_v5 = vrot.slane %v2088_v55, 4  ;;  %v2093_v6 = vrot.slane %v2091_v56, 5  ;;  %6236 = vmatprep.subr.msk.bf16.mxu1 %vm718_vm0, %v5059_v51  ;;  %v191_v52 = vld [vmem:[%s6421_s25 + $0x30] sm:$0xf] }
  0x2b   : > { %v291_v4 = vrot.slane %v290_v53, 4  ;;  %v2099_v9 = vrot.slane %v2097_v61, 5  ;;  %v2101_v17 = vshrl.u32 %v6497_v46, 16  ;;  %v2107_v10 = vshll.u32 %v6506_v54, 16 }
  0x2c   : > { %v301_v8 = vrot.slane %v300_v58, 4  ;;  %5809 = vmatmul.mubr.msk.bf16.vlgmr.msra.gmra.mrb[0].mxu0 %vm669_vm3, %v5207_v2  ;;  %v2094_v12 = vor.u32 %v2093_v6, %v2090_v5  ;;  %v308_v14 = vshrl.u32 %v189_v0, 16  ;;  %v311_v18 = vshll.u32 %v189_v0, 16  ;;  %v192_v58 = vld [vmem:[%s6421_s25 + $0x34] sm:$0xf] }
  0x2d   : > { %v296_v11 = vsel %vm6447_vm4, %v291_v4, %v295_v48  ;;  %5841 = vmatpush3.bf16.msra.mxu0 %v6453_v37  ;;  %v2103_v20 = vrot.slane %v2101_v17, 4  ;;  %v2109_v21 = vrot.slane %v2107_v10, 5  ;;  %v317_v23 = vshll.u32 %v190_v7, 16  ;;  %v220_v4 = vld [vmem:[%s6421_s25 + $0x38] sm:$0x1] }
  0x2e   : > { %v306_v19 = vsel %vm6447_vm4, %v301_v8, %v305_v59  ;;  %v2095_v27 = vrot.slane %v2094_v12, 4  ;;  %v310_v29 = vrot.slane %v308_v14, 4  ;;  %v313_v31 = vrot.slane %v311_v18, 5  ;;  %6241 = vmatprep.subr.msk.bf16.mxu0 %vm718_vm0, %v6440_v26  ;;  %v5169_v12 = vld [vmem:[%s6421_s25 + $0x3c] sm:$0xf] }
  0x2f   : > { %v4981_v25 = vcombine.low %v296_v11, %v306_v19  ;;  %v2104_v34 = vor.u32 %v2103_v20, %v2099_v9  ;;  %v319_v35 = vrot.slane %v317_v23, 5  ;;  %v321_v37 = vshrl.u32 %v190_v7, 16  ;;  %v6551_v20 = vld [vmem:[%s6421_s25 + $0x40] sm:$0xf] }
  0x30   : > { %v327_v36 = vshll.u32 %v219_v13, 16  ;;  %v2100_v38 = vsel %vm6447_vm4, %v2095_v27, %v2099_v9  ;;  %v314_v39 = vor.u32 %v313_v31, %v310_v29  ;;  %v2112_v42 = vshrl.u32 %v5166_v24, 16 }
  0x31   : > { %5676 = vmatprep.mubr.msk.bf16.mxu1 %vm669_vm3, %v4981_v25  ;;  %v2115_v43 = vshll.u32 %v5166_v24, 16  ;;  %v2105_v44 = vrot.slane %v2104_v34, 4  ;;  %v323_v45 = vrot.slane %v321_v37, 4  ;;  %v2121_v26 = vshll.u32 %v6526_v33, 16  ;;  %v6556_v34 = vld [vmem:[%s6421_s25 + $0x44] sm:$0x1] }
  0x32   : > { %v329_v47 = vrot.slane %v327_v36, 5  ;;  %v315_v48 = vrot.slane %v314_v39, 4  ;;  %v2114_v49 = vrot.slane %v2112_v42, 4  ;;  %v2125_v51 = vshrl.u32 %v6526_v33, 16  ;;  %v193_v42 = vld [vmem:[%s6421_s25 + $0x3c] sm:$0xf] }
  0x33   : > { %v2117_v50 = vrot.slane %v2115_v43, 5  ;;  %v2110_v53 = vsel %vm6447_vm4, %v2105_v44, %v2109_v21  ;;  %v324_v55 = vor.u32 %v323_v45, %v319_v35  ;;  %v2123_v56 = vrot.slane %v2121_v26, 5  ;;  %v194_v26 = vld [vmem:[%s6421_s25 + $0x40] sm:$0xf] }
  0x34   : > { %v2131_v57 = vshll.u32 %v6534_v40, 16  ;;  %v5208_v59 = vcombine.low %v2100_v38, %v2110_v53  ;;  %v320_v61 = vsel %vm6447_vm4, %v315_v48, %v319_v35  ;;  %v2127_v2 = vrot.slane %v2125_v51, 4 }
  0x35   : > { %v2118_v0 = vor.u32 %v2117_v50, %v2114_v49  ;;  %v325_v5 = vrot.slane %v324_v55, 4  ;;  %v332_v7 = vshrl.u32 %v191_v52, 16  ;;  %v335_v8 = vshll.u32 %v191_v52, 16 }
  0x36   : > { %v2133_v6 = vrot.slane %v2131_v57, 5  ;;  %5812 = vmatprep.mubr.msk.bf16.mxu0 %vm669_vm3, %v5208_v59  ;;  %v2128_v17 = vor.u32 %v2127_v2, %v2123_v56  ;;  %v341_v10 = vshll.u32 %v192_v58, 16  ;;  %v345_v11 = vshrl.u32 %v192_v58, 16  ;;  %v5172_v2 = vld [vmem:[%s6421_s25 + $0x48] sm:$0xf] }
  0x37   : > { %v2119_v9 = vrot.slane %v2118_v0, 4  ;;  %v330_v13 = vsel %vm6447_vm4, %v325_v5, %v329_v47  ;;  %v334_v14 = vrot.slane %v332_v7, 4  ;;  %v337_v18 = vrot.slane %v335_v8, 5  ;;  %v6574_v8 = vld [vmem:[%s6421_s25 + $0x4c] sm:$0xf] }
  0x38   : > { %v351_v19 = vshll.u32 %v220_v4, 16  ;;  %v4982_v21 = vcombine.low %v320_v61, %v330_v13  ;;  %v2129_v24 = vrot.slane %v2128_v17, 4  ;;  %v343_v25 = vrot.slane %v341_v10, 5  ;;  %v221_v61 = vld [vmem:[%s6421_s25 + $0x44] sm:$0x1] }
  0x39   : > { %v2124_v23 = vsel %vm6447_vm4, %v2119_v9, %v2123_v56  ;;  %v338_v27 = vor.u32 %v337_v18, %v334_v14  ;;  %v347_v29 = vrot.slane %v345_v11, 4  ;;  %v2136_v35 = vshrl.u32 %v5169_v12, 16 }
  0x3a   : > { %v353_v31 = vrot.slane %v351_v19, 5  ;;  %5677 = vmatmul.mubr.msk.bf16.gmra.mrb[4].mxu1 %vm669_vm3, %v4982_v21  ;;  %v2134_v37 = vsel %vm6447_vm4, %v2129_v24, %v2133_v6  ;;  %v2139_v36 = vshll.u32 %v5169_v12, 16  ;;  %v2145_v38 = vshll.u32 %v6551_v20, 16 }
  0x3b   : > { %v2149_v39 = vshrl.u32 %v6551_v20, 16  ;;  %v5209_v43 = vcombine.low %v2124_v23, %v2134_v37  ;;  %v339_v44 = vrot.slane %v338_v27, 4  ;;  %v348_v45 = vor.u32 %v347_v29, %v343_v25  ;;  %v6582_v23 = vld [vmem:[%s6421_s25 + $0x50] sm:$0x1]  ;;  %v6586_v27 = vld [vmem:[%s6421_s25 + $0x48] sm:$0xf] }
  0x3c   : > { %v2138_v47 = vrot.slane %v2136_v35, 4  ;;  %v2141_v48 = vrot.slane %v2139_v36, 5  ;;  %v2147_v49 = vrot.slane %v2145_v38, 5  ;;  %v2155_v51 = vshll.u32 %v6556_v34, 16  ;;  %v6589_v36 = vld [vmem:[%s6421_s25 + $0x4c] sm:$0xf] }
  0x3d   : > { %v2151_v50 = vrot.slane %v2149_v39, 4  ;;  %5813 = vmatmul.mubr.msk.bf16.gmra.mrb[4].mxu0 %vm669_vm3, %v5209_v43  ;;  %v344_v52 = vsel %vm6447_vm4, %v339_v44, %v343_v25  ;;  %v349_v53 = vrot.slane %v348_v45, 4  ;;  %v356_v55 = vshrl.u32 %v193_v42, 16 }
  0x3e   : > { %v359_v56 = vshll.u32 %v193_v42, 16  ;;  %v2142_v57 = vor.u32 %v2141_v48, %v2138_v47  ;;  %v2157_v59 = vrot.slane %v2155_v51, 5  ;;  %v365_v0 = vshll.u32 %v194_v26, 16 }
  0x3f   : > { %v2152_v58 = vor.u32 %v2151_v50, %v2147_v49  ;;  %v354_v4 = vsel %vm6447_vm4, %v349_v53, %v353_v31  ;;  %v358_v5 = vrot.slane %v356_v55, 4  ;;  %v369_v7 = vshrl.u32 %v194_v26, 16  ;;  %v222_v26 = vld [vmem:[%s6421_s25 + $0x50] sm:$0x1]  ;;  %v5175_v53 = vld [vmem:[%s6421_s25 + $0x54] sm:$0xf] }
  0x40   : > { %v361_v6 = vrot.slane %v359_v56, 5  ;;  %v4983_v9 = vcombine.low %v344_v52, %v354_v4  ;;  %v2143_v17 = vrot.slane %v2142_v57, 4  ;;  %v367_v11 = vrot.slane %v365_v0, 5  ;;  %v6605_v4 = vld [vmem:[%s6421_s25 + $0x58] sm:$0xf] }
  0x41   : > { %v2153_v10 = vrot.slane %v2152_v58, 4  ;;  %v371_v13 = vrot.slane %v369_v7, 4  ;;  %v375_v14 = vshll.u32 %v221_v61, 16  ;;  %v2160_v18 = vshrl.u32 %v5172_v2, 16 }
  0x42   : > { %v362_v12 = vor.u32 %v361_v6, %v358_v5  ;;  %5680 = vmatprep.mubr.msk.bf16.mxu1 %vm669_vm3, %v4983_v9  ;;  %v2148_v19 = vsel %vm6447_vm4, %v2143_v17, %v2147_v49  ;;  %v2163_v24 = vshll.u32 %v5172_v2, 16  ;;  %v2169_v25 = vshll.u32 %v6574_v8, 16 }
  0x43   : > { %v2158_v21 = vsel %vm6447_vm4, %v2153_v10, %v2157_v59  ;;  %v372_v35 = vor.u32 %v371_v13, %v367_v11  ;;  %v377_v37 = vrot.slane %v375_v14, 5  ;;  %v2162_v38 = vrot.slane %v2160_v18, 4 }
  0x44   : > { %v5210_v29 = vcombine.low %v2148_v19, %v2158_v21  ;;  %v363_v31 = vrot.slane %v362_v12, 4  ;;  %v2165_v39 = vrot.slane %v2163_v24, 5  ;;  %v2171_v42 = vrot.slane %v2169_v25, 5  ;;  %v6611_v12 = vld [vmem:[%s6421_s25 + $0x5c] sm:$0x1] }
  0x45   : > { %v2173_v43 = vshrl.u32 %v6574_v8, 16  ;;  %v373_v45 = vrot.slane %v372_v35, 4  ;;  %v2179_v47 = vshll.u32 %v6582_v23, 16  ;;  %v380_v48 = vshrl.u32 %v6586_v27, 16  ;;  %v6615_v24 = vld [vmem:[%s6421_s25 + $0x54] sm:$0xf] }
  0x46   : > { %5816 = vmatprep.mubr.msk.bf16.mxu0 %vm669_vm3, %v5210_v29  ;;  %v368_v44 = vsel %vm6447_vm4, %v363_v31, %v367_v11  ;;  %v2166_v49 = vor.u32 %v2165_v39, %v2162_v38  ;;  %v383_v51 = vshll.u32 %v6586_v27, 16  ;;  %v389_v52 = vshll.u32 %v6589_v36, 16 }
  0x47   : > { %v2175_v50 = vrot.slane %v2173_v43, 4  ;;  %v378_v55 = vsel %vm6447_vm4, %v373_v45, %v377_v37  ;;  %v2181_v56 = vrot.slane %v2179_v47, 5  ;;  %v382_v57 = vrot.slane %v380_v48, 4  ;;  %v6621_v37 = vld [vmem:[%s6421_s25 + $0x58] sm:$0xf] }
  0x48   : > { %v393_v58 = vshrl.u32 %v6589_v36, 16  ;;  %v4984_v59 = vcombine.low %v368_v44, %v378_v55  ;;  %v2167_v61 = vrot.slane %v2166_v49, 4  ;;  %v385_v2 = vrot.slane %v383_v51, 5 }
  0x49   : > { %v2176_v0 = vor.u32 %v2175_v50, %v2171_v42  ;;  %v391_v5 = vrot.slane %v389_v52, 5  ;;  %v399_v7 = vshll.u32 %v222_v26, 16  ;;  %v2184_v9 = vshrl.u32 %v5175_v53, 16  ;;  %v223_v26 = vld [vmem:[%s6421_s25 + $0x5c] sm:$0x1] }
  0x4a   : > { %v395_v6 = vrot.slane %v393_v58, 4  ;;  %5681 = vmatmul.mubr.msk.bf16.gmra.mrb[8].mxu1 %vm669_vm3, %v4984_v59  ;;  %v2172_v17 = vsel %vm6447_vm4, %v2167_v61, %v2171_v42  ;;  %v386_v11 = vor.u32 %v385_v2, %v382_v57  ;;  %v2187_v13 = vshll.u32 %v5175_v53, 16  ;;  %v5178_v53 = vld [vmem:[%s6421_s25 + $0x60] sm:$0xf]  ;;  %v6635_v59 = vld [vmem:[%s6421_s25 + $0x64] sm:$0xf] }
  0x4b   : > { %v2177_v10 = vrot.slane %v2176_v0, 4  ;;  %v401_v18 = vrot.slane %v399_v7, 5  ;;  %v2186_v19 = vrot.slane %v2184_v9, 4  ;;  %v2193_v21 = vshll.u32 %v6605_v4, 16  ;;  %v6642_v9 = vld [vmem:[%s6421_s25 + $0x68] sm:$0x1] }
  0x4c   : > { %v396_v14 = vor.u32 %v395_v6, %v391_v5  ;;  %v387_v29 = vrot.slane %v386_v11, 4  ;;  %v2189_v31 = vrot.slane %v2187_v13, 5  ;;  %v2197_v35 = vshrl.u32 %v6605_v4, 16 }
  0x4d   : > { %v2182_v25 = vsel %vm6447_vm4, %v2177_v10, %v2181_v56  ;;  %v2195_v42 = vrot.slane %v2193_v21, 5  ;;  %v2203_v43 = vshll.u32 %v6611_v12, 16  ;;  %v404_v48 = vshrl.u32 %v6615_v24, 16 }
  0x4e   : > { %v5211_v38 = vcombine.low %v2172_v17, %v2182_v25  ;;  %v397_v39 = vrot.slane %v396_v14, 4  ;;  %v392_v44 = vsel %vm6447_vm4, %v387_v29, %v391_v5  ;;  %v2190_v45 = vor.u32 %v2189_v31, %v2186_v19  ;;  %v6646_v19 = vld [vmem:[%s6421_s25 + $0x60] sm:$0xf] }
  0x4f   : > { %v2199_v47 = vrot.slane %v2197_v35, 4  ;;  %v2205_v50 = vrot.slane %v2203_v43, 5  ;;  %v407_v51 = vshll.u32 %v6615_v24, 16  ;;  %v413_v52 = vshll.u32 %v6621_v37, 16  ;;  %v6652_v35 = vld [vmem:[%s6421_s25 + $0x64] sm:$0xf] }
  0x50   : > { %5817 = vmatmul.mubr.msk.bf16.gmra.mrb[8].mxu0 %vm669_vm3, %v5211_v38  ;;  %v402_v49 = vsel %vm6447_vm4, %v397_v39, %v401_v18  ;;  %v2191_v56 = vrot.slane %v2190_v45, 4  ;;  %v406_v58 = vrot.slane %v404_v48, 4  ;;  %v417_v2 = vshrl.u32 %v6621_v37, 16 }
  0x51   : > { %v4985_v55 = vcombine.low %v392_v44, %v402_v49  ;;  %v2200_v57 = vor.u32 %v2199_v47, %v2195_v42  ;;  %v409_v61 = vrot.slane %v407_v51, 5  ;;  %v415_v0 = vrot.slane %v413_v52, 5 }
  0x52   : > { %v423_v5 = vshll.u32 %v223_v26, 16  ;;  %v2196_v6 = vsel %vm6447_vm4, %v2191_v56, %v2195_v42  ;;  %v2208_v17 = vshrl.u32 %v5178_v53, 16  ;;  %v2211_v10 = vshll.u32 %v5178_v53, 16 }
  0x53   : > { %5684 = vmatprep.mubr.msk.bf16.mxu1 %vm669_vm3, %v4985_v55  ;;  %v2201_v7 = vrot.slane %v2200_v57, 4  ;;  %v410_v11 = vor.u32 %v409_v61, %v406_v58  ;;  %v419_v13 = vrot.slane %v417_v2, 4  ;;  %v2217_v18 = vshll.u32 %v6635_v59, 16  ;;  %v5238_v58 = vld [vmem:[%s6421_s25 + $0xc] sm:$0xe] }
  0x54   : > { %v425_v14 = vrot.slane %v423_v5, 5  ;;  %v2210_v25 = vrot.slane %v2208_v17, 4  ;;  %v2213_v29 = vrot.slane %v2211_v10, 5  ;;  %v2221_v31 = vshrl.u32 %v6635_v59, 16 }
  0x55   : > { %v2206_v21 = vsel %vm6447_vm4, %v2201_v7, %v2205_v50  ;;  %v411_v39 = vrot.slane %v410_v11, 4  ;;  %v420_v42 = vor.u32 %v419_v13, %v415_v0  ;;  %v2219_v43 = vrot.slane %v2217_v18, 5  ;;  %v224_v50 = vld [vmem:[%s6421_s25 + $0x68] sm:$0x1] }
  0x56   : > { %v5212_v38 = vcombine.low %v2196_v6, %v2206_v21  ;;  %v2214_v44 = vor.u32 %v2213_v29, %v2210_v25  ;;  %v2223_v45 = vrot.slane %v2221_v31, 4  ;;  %v2227_v47 = vshll.u32 %v6642_v9, 16  ;;  %v6680_v29 = vld [vmem:[%s6421_s25 + $0x70] sm:$0xf] }
  0x57   : > { %v428_v26 = vshrl.u32 %v6646_v19, 16  ;;  %v416_v48 = vsel %vm6447_vm4, %v411_v39, %v415_v0  ;;  %v421_v49 = vrot.slane %v420_v42, 4  ;;  %v431_v51 = vshll.u32 %v6646_v19, 16  ;;  %v6667_v0 = vld [vmem:[%s6421_s25 + $0x6c] sm:$0xf] }
  0x58   : > { %5820 = vmatprep.mubr.msk.bf16.mxu0 %vm669_vm3, %v5212_v38  ;;  %v437_v52 = vshll.u32 %v6652_v35, 16  ;;  %v2215_v53 = vrot.slane %v2214_v44, 4  ;;  %v2224_v55 = vor.u32 %v2223_v45, %v2219_v43  ;;  %v2229_v56 = vrot.slane %v2227_v47, 5 }
  0x59   : > { %v430_v57 = vrot.slane %v428_v26, 4  ;;  %v426_v61 = vsel %vm6447_vm4, %v421_v49, %v425_v14  ;;  %v433_v2 = vrot.slane %v431_v51, 5  ;;  %v441_v6 = vshrl.u32 %v6652_v35, 16  ;;  %v225_v26 = vld [vmem:[%s6421_s25 + $0x74] sm:$0x1] }
  0x5a   : > { %v439_v5 = vrot.slane %v437_v52, 5  ;;  %v4986_v7 = vcombine.low %v416_v48, %v426_v61  ;;  %v2220_v17 = vsel %vm6447_vm4, %v2215_v53, %v2219_v43  ;;  %v2225_v10 = vrot.slane %v2224_v55, 4  ;;  %v5239_v48 = vld [vmem:[%s6421_s25 + $0x18] sm:$0xe] }
  0x5b   : > { %v447_v11 = vshll.u32 %v224_v50, 16  ;;  %v434_v14 = vor.u32 %v433_v2, %v430_v57  ;;  %v443_v18 = vrot.slane %v441_v6, 4  ;;  %v5254_v21 = vrot.slane %v5238_v58, 9  ;;  %v6699_v53 = vld [vmem:[%s6421_s25 + $0x78] sm:$0xf] }
  0x5c   : > { %v2785_v25 = vrot.slane %v2783_v62, 4  ;;  %5685 = vmatmul.mubr.msk.bf16.gmra.mrb[12].mxu1 %vm669_vm3, %v4986_v7  ;;  %v2230_v31 = vsel %vm6447_vm4, %v2225_v10, %v2229_v56  ;;  %v452_v39 = vshrl.u32 %v6667_v0, 16  ;;  %v455_v42 = vshll.u32 %v6667_v0, 16  ;;  %v226_v57 = vld [vmem:[%s6421_s25 + $0x80] sm:$0x1] }
  0x5d   : > { %v449_v38 = vrot.slane %v447_v11, 5  ;;  %v5213_v43 = vcombine.low %v2220_v17, %v2230_v31  ;;  %v435_v44 = vrot.slane %v434_v14, 4  ;;  %v444_v45 = vor.u32 %v443_v18, %v439_v5  ;;  %v5240_v10 = vld [vmem:[%s6421_s25 + $0x24] sm:$0xe] }
  0x5e   : > { %v2784_v47 = vsel %vm6673_vm7, %v5254_v21, %v2783_v62  ;;  %v2787_v49 = vsel %vm6673_vm7, %v2785_v25, %v2786_v63  ;;  %v454_v50 = vrot.slane %v452_v39, 4  ;;  %v457_v51 = vrot.slane %v455_v42, 5  ;;  %v6725_v39 = vld [vmem:[%s6421_s25 + $0x84] sm:$0xf] }
  0x5f   : > { %v461_v52 = vshll.u32 %v6680_v29, 16  ;;  %5821 = vmatmul.mubr.msk.bf16.gmra.mrb[12].mxu0 %vm669_vm3, %v5213_v43  ;;  %v440_v15 = vsel %vm6447_vm4, %v435_v44, %v439_v5  ;;  %v445_v62 = vrot.slane %v444_v45, 4  ;;  %v5271_v55 = vcombine.low %v2784_v47, %v2787_v49  ;;  %v6733_v43 = vld [vmem:[%s6421_s25 + $0x88] sm:$0xf] }
  0x60   : > { %v465_v56 = vshrl.u32 %v6680_v29, 16  ;;  %v458_v63 = vor.u32 %v457_v51, %v454_v50  ;;  %v471_v61 = vshll.u32 %v225_v26, 16  ;;  %v5255_v2 = vrot.slane %v5239_v48, 9 }
  0x61   : > { %v463_v58 = vrot.slane %v461_v52, 5  ;;  %v450_v6 = vsel %vm6447_vm4, %v445_v62, %v449_v38  ;;  %5842 = vmatprep.mubr.msk.bf16.mxu0 %vm669_vm3, %v5271_v55  ;;  %v2794_v5 = vsel %vm6673_vm7, %v6490_v30, %v2793_v28  ;;  %v476_v17 = vshrl.u32 %v6699_v53, 16  ;;  %v227_v52 = vld [vmem:[%s6421_s25 + $0x8c] sm:$0x1] }
  0x62   : > { %v467_v7 = vrot.slane %v465_v56, 4  ;;  %v4987_v11 = vcombine.low %v440_v15, %v450_v6  ;;  %v459_v14 = vrot.slane %v458_v63, 4  ;;  %v473_v18 = vrot.slane %v471_v61, 5 }
  0x63   : > { %v2791_v21 = vsel %vm6673_vm7, %v5255_v2, %v2790_v22  ;;  %v478_v38 = vrot.slane %v476_v17, 4  ;;  %v479_v1 = vshll.u32 %v6699_v53, 16  ;;  %v485_v30 = vshll.u32 %v6706_v16, 16  ;;  %v6738_v22 = vld [vmem:[%s8158_s1 + $0xe] sm:$0x3] }
  0x64   : > { %v468_v25 = vor.u32 %v467_v7, %v463_v58  ;;  %v5272_v31 = vcombine.low %v2791_v21, %v2794_v5  ;;  %5688 = vmatprep.mubr.msk.bf16.mxu1 %vm669_vm3, %v4987_v11  ;;  %v464_v28 = vsel %vm6447_vm4, %v459_v14, %v463_v58  ;;  %v489_v60 = vshrl.u32 %v6706_v16, 16  ;;  %v6757_v5 = vld [vmem:[%s6421_s25 + $0x90] sm:$0xf] }
  0x65   : > { %v495_v42 = vshll.u32 %v226_v57, 16  ;;  %v481_v45 = vrot.slane %v479_v1, 5  ;;  %v5256_v47 = vrot.slane %v5240_v10, 9  ;;  %v2797_v26 = vrot.slane %v6497_v46, 5  ;;  %v5241_v57 = vld [vmem:[%s6421_s25 + $0x30] sm:$0xe] }
  0x66   : > { %v469_v44 = vrot.slane %v468_v25, 4  ;;  %v487_v48 = vrot.slane %v485_v30, 5  ;;  %v491_v49 = vrot.slane %v489_v60, 4  ;;  %v2800_v51 = vrot.slane %v6506_v54, 5  ;;  %v6769_v30 = vld [vmem:[%s6421_s25 + $0x94] sm:$0xf] }
  0x67   : > { %v497_v50 = vrot.slane %v495_v42, 5  ;;  %5843 = vmatmul.mubr.msk.bf16.vlgmr.msra.gmra.mrb[0].mxu0 %vm669_vm3, %v5272_v31  ;;  %v482_v62 = vor.u32 %v481_v45, %v478_v38  ;;  %v2798_v55 = vsel %vm6673_vm7, %v5256_v47, %v2797_v26  ;;  %v2799_v56 = vrot.slane %v2797_v26, 4  ;;  %v228_v60 = vld [vmem:[%s6421_s25 + $0x98] sm:$0x1]  ;;  %v5242_v26 = vld [vmem:[%s6421_s25 + $0x3c] sm:$0xe] }
  0x68   : > { %v474_v15 = vsel %vm6447_vm4, %v469_v44, %v473_v18  ;;  %5875 = vmatpush3.bf16.msra.mxu0 %v6457_v41  ;;  %v492_v46 = vor.u32 %v491_v49, %v487_v48  ;;  %v500_v58 = vshrl.u32 %v6725_v39, 16  ;;  %v503_v54 = vshll.u32 %v6725_v39, 16 }
  0x69   : > { %v4988_v63 = vcombine.low %v464_v28, %v474_v15  ;;  %v483_v61 = vrot.slane %v482_v62, 4  ;;  %v2801_v2 = vsel %vm6673_vm7, %v2799_v56, %v2800_v51  ;;  %v509_v6 = vshll.u32 %v6733_v43, 16  ;;  %6242 = vmatprep.subr.msk.bf16.mxu0 %vm718_vm0, %v6738_v22 }
  0x6a   : > { %v513_v7 = vshrl.u32 %v6733_v43, 16  ;;  %v493_v41 = vrot.slane %v492_v46, 4  ;;  %v5273_v17 = vcombine.low %v2798_v55, %v2801_v2  ;;  %v502_v10 = vrot.slane %v500_v58, 4  ;;  %v6789_v46 = vld [vmem:[%s6421_s25 + $0xa0] sm:$0xf] }
  0x6b   : > { %5689 = vmatmul.mubr.msk.bf16.gmra.mrb[16].mxu1 %vm669_vm3, %v4988_v63  ;;  %v505_v11 = vrot.slane %v503_v54, 5  ;;  %v488_v14 = vsel %vm6447_vm4, %v483_v61, %v487_v48  ;;  %v511_v18 = vrot.slane %v509_v6, 5  ;;  %v519_v25 = vshll.u32 %v227_v52, 16  ;;  %v6778_v52 = vld [vmem:[%s6421_s25 + $0x9c] sm:$0xf] }
  0x6c   : > { %v515_v21 = vrot.slane %v513_v7, 4  ;;  %v498_v31 = vsel %vm6447_vm4, %v493_v41, %v497_v50  ;;  %5846 = vmatprep.mubr.msk.bf16.mxu0 %vm669_vm3, %v5273_v17  ;;  %v5257_v1 = vrot.slane %v5241_v57, 9  ;;  %v2804_v28 = vrot.slane %v6526_v33, 5 }
  0x6d   : > { %v506_v38 = vor.u32 %v505_v11, %v502_v10  ;;  %v4989_v42 = vcombine.low %v488_v14, %v498_v31  ;;  %v521_v45 = vrot.slane %v519_v25, 5  ;;  %v2807_v47 = vrot.slane %v6534_v40, 5  ;;  %v229_v10 = vld [vmem:[%s6421_s25 + $0xa4] sm:$0x1]  ;;  %v5243_v11 = vld [vmem:[%s6421_s25 + $0x48] sm:$0xe] }
  0x6e   : > { %v516_v44 = vor.u32 %v515_v21, %v511_v18  ;;  %v2805_v49 = vsel %vm6673_vm7, %v5257_v1, %v2804_v28  ;;  %v2806_v50 = vrot.slane %v2804_v28, 4  ;;  %v524_v51 = vshrl.u32 %v6757_v5, 16 }
  0x6f   : > { %v507_v48 = vrot.slane %v506_v38, 4  ;;  %5692 = vmatprep.mubr.msk.bf16.mxu1 %vm669_vm3, %v4989_v42  ;;  %v527_v15 = vshll.u32 %v6757_v5, 16  ;;  %v533_v62 = vshll.u32 %v6769_v30, 16  ;;  %v537_v40 = vshrl.u32 %v6769_v30, 16 }
  0x70   : > { %v517_v33 = vrot.slane %v516_v44, 4  ;;  %v2808_v56 = vsel %vm6673_vm7, %v2806_v50, %v2807_v47  ;;  %v526_v57 = vrot.slane %v524_v51, 4  ;;  %v543_v63 = vshll.u32 %v228_v60, 16 }
  0x71   : > { %v512_v55 = vsel %vm6447_vm4, %v507_v48, %v511_v18  ;;  %v5274_v54 = vcombine.low %v2805_v49, %v2808_v56  ;;  %v529_v61 = vrot.slane %v527_v15, 5  ;;  %v535_v2 = vrot.slane %v533_v62, 5  ;;  %v6815_v56 = vld [vmem:[%s6421_s25 + $0xac] sm:$0xf] }
  0x72   : > { %v522_v58 = vsel %vm6447_vm4, %v517_v33, %v521_v45  ;;  %v539_v7 = vrot.slane %v537_v40, 4  ;;  %v545_v41 = vrot.slane %v543_v63, 5  ;;  %v5258_v17 = vrot.slane %v5242_v26, 9  ;;  %v6810_v33 = vld [vmem:[%s6421_s25 + $0xa8] sm:$0xf] }
  0x73   : > { %v4990_v6 = vcombine.low %v512_v55, %v522_v58  ;;  %5847 = vmatmul.mubr.msk.bf16.gmra.mrb[4].mxu0 %vm669_vm3, %v5274_v54  ;;  %v530_v14 = vor.u32 %v529_v61, %v526_v57  ;;  %v2811_v18 = vrot.slane %v6551_v20, 5  ;;  %v2814_v21 = vrot.slane %v6556_v34, 5  ;;  %v230_v61 = vld [vmem:[%s6421_s25 + $0xb0] sm:$0x1] }
  0x74   : > { %v548_v25 = vshrl.u32 %v6778_v52, 16  ;;  %v540_v31 = vor.u32 %v539_v7, %v535_v2  ;;  %v551_v38 = vshll.u32 %v6778_v52, 16  ;;  %v557_v1 = vshll.u32 %v6789_v46, 16 }
  0x75   : > { %5693 = vmatmul.mubr.msk.bf16.gmra.mrb[20].mxu1 %vm669_vm3, %v4990_v6  ;;  %v561_v28 = vshrl.u32 %v6789_v46, 16  ;;  %v531_v60 = vrot.slane %v530_v14, 4  ;;  %v2812_v42 = vsel %vm6673_vm7, %v5258_v17, %v2811_v18  ;;  %v2813_v20 = vrot.slane %v2811_v18, 4  ;;  %v6830_v14 = vld [vmem:[%s6421_s25 + $0xb4] sm:$0xf] }
  0x76   : > { %v550_v44 = vrot.slane %v548_v25, 4  ;;  %v541_v34 = vrot.slane %v540_v31, 4  ;;  %v553_v45 = vrot.slane %v551_v38, 5  ;;  %v559_v47 = vrot.slane %v557_v1, 5 }
  0x77   : > { %v563_v26 = vrot.slane %v561_v28, 4  ;;  %v536_v48 = vsel %vm6447_vm4, %v531_v60, %v535_v2  ;;  %v2815_v49 = vsel %vm6673_vm7, %v2813_v20, %v2814_v21  ;;  %v567_v50 = vshll.u32 %v229_v10, 16  ;;  %v5244_v2 = vld [vmem:[%s6421_s25 + $0x54] sm:$0xe] }
  0x78   : > { %v5259_v51 = vrot.slane %v5243_v11, 9  ;;  %v546_v15 = vsel %vm6447_vm4, %v541_v34, %v545_v41  ;;  %v5275_v62 = vcombine.low %v2812_v42, %v2815_v49  ;;  %v554_v40 = vor.u32 %v553_v45, %v550_v44  ;;  %v6839_v42 = vld [vmem:[%s6421_s25 + $0xb8] sm:$0xf]  ;;  %v231_v49 = vld [vmem:[%s6421_s25 + $0xbc] sm:$0x1] }
  0x79   : > { %v564_v55 = vor.u32 %v563_v26, %v559_v47  ;;  %v4991_v57 = vcombine.low %v536_v48, %v546_v15  ;;  %v569_v63 = vrot.slane %v567_v50, 5  ;;  %v2818_v58 = vrot.slane %v6574_v8, 5 }
  0x7a   : > { %v2821_v54 = vrot.slane %v6582_v23, 5  ;;  %5850 = vmatprep.mubr.msk.bf16.mxu0 %vm669_vm3, %v5275_v62  ;;  %v555_v6 = vrot.slane %v554_v40, 4  ;;  %v572_v41 = vshrl.u32 %v6810_v33, 16  ;;  %v575_v17 = vshll.u32 %v6810_v33, 16 }
  0x7b   : > { %v565_v7 = vrot.slane %v564_v55, 4  ;;  %5696 = vmatprep.mubr.msk.bf16.mxu1 %vm669_vm3, %v4991_v57  ;;  %v2819_v10 = vsel %vm6673_vm7, %v5259_v51, %v2818_v58  ;;  %v2820_v11 = vrot.slane %v2818_v58, 4  ;;  %v581_v8 = vshll.u32 %v6815_v56, 16  ;;  %v5245_v55 = vld [vmem:[%s6421_s25 + $0x60] sm:$0xe] }
  0x7c   : > { %v585_v23 = vshrl.u32 %v6815_v56, 16  ;;  %v560_v18 = vsel %vm6447_vm4, %v555_v6, %v559_v47  ;;  %v574_v25 = vrot.slane %v572_v41, 4  ;;  %v577_v31 = vrot.slane %v575_v17, 5  ;;  %v5246_v6 = vld [vmem:[%s6421_s25 + $0x6c] sm:$0xe] }
  0x7d   : > { %v570_v21 = vsel %vm6447_vm4, %v565_v7, %v569_v63  ;;  %v2822_v1 = vsel %vm6673_vm7, %v2820_v11, %v2821_v54  ;;  %v583_v28 = vrot.slane %v581_v8, 5  ;;  %v591_v34 = vshll.u32 %v230_v61, 16  ;;  %v5182_v11 = vld [vmem:[%s6421_s25 + $0x70] sm:$0xf]  ;;  %v5183_v8 = vld [vmem:[%s6421_s25 + $0x74] sm:$0x1] }
  0x7e   : > { %v4992_v38 = vcombine.low %v560_v18, %v570_v21  ;;  %v587_v60 = vrot.slane %v585_v23, 4  ;;  %v5276_v20 = vcombine.low %v2819_v10, %v2822_v1  ;;  %v578_v44 = vor.u32 %v577_v31, %v574_v25 }
  0x7f   : > { %v5260_v45 = vrot.slane %v5244_v2, 9  ;;  %v2825_v26 = vrot.slane %v6605_v4, 5  ;;  %v2828_v48 = vrot.slane %v6611_v12, 5  ;;  %v596_v50 = vshrl.u32 %v6830_v14, 16 }
  0x80   : > { %5697 = vmatmul.mubr.msk.bf16.gmra.mrb[24].mxu1 %vm669_vm3, %v4992_v38  ;;  %v588_v47 = vor.u32 %v587_v60, %v583_v28  ;;  %5851 = vmatmul.mubr.msk.bf16.gmra.mrb[8].mxu0 %vm669_vm3, %v5276_v20  ;;  %v579_v51 = vrot.slane %v578_v44, 4  ;;  %v593_v15 = vrot.slane %v591_v34, 5  ;;  %v599_v62 = vshll.u32 %v6830_v14, 16 }
  0x81   : > { %v605_v40 = vshll.u32 %v6839_v42, 16  ;;  %v2826_v4 = vsel %vm6673_vm7, %v5260_v45, %v2825_v26  ;;  %v2827_v12 = vrot.slane %v2825_v26, 4  ;;  %v598_v63 = vrot.slane %v596_v50, 4 }
  0x82   : > { %v589_v57 = vrot.slane %v588_v47, 4  ;;  %v584_v58 = vsel %vm6447_vm4, %v579_v51, %v583_v28  ;;  %v601_v54 = vrot.slane %v599_v62, 5  ;;  %v609_v2 = vshrl.u32 %v6839_v42, 16  ;;  %v5247_v47 = vld [vmem:[%s6421_s25 + $0x78] sm:$0xe] }
  0x83   : > { %v607_v61 = vrot.slane %v605_v40, 5  ;;  %v2829_v41 = vsel %vm6673_vm7, %v2827_v12, %v2828_v48  ;;  %v615_v17 = vshll.u32 %v231_v49, 16  ;;  %v5261_v10 = vrot.slane %v5245_v55, 9  ;;  %v6301_v51 = vld [vmem:[%s6421_s25] sm:$0xf] }
  0x84   : > { %v594_v7 = vsel %vm6447_vm4, %v589_v57, %v593_v15  ;;  %v5277_v18 = vcombine.low %v2826_v4, %v2829_v41  ;;  %v602_v21 = vor.u32 %v601_v54, %v598_v63  ;;  %v611_v25 = vrot.slane %v609_v2, 4  ;;  %v6877_v15 = vld [vmem:[%s6421_s25 + $0x4] sm:$0xf]  ;;  %v6881_v40 = vld [vmem:[%s6421_s25 + $0x7c] sm:$0xf] }
  0x85   : > { %v4993_v23 = vcombine.low %v584_v58, %v594_v7  ;;  %v617_v31 = vrot.slane %v615_v17, 5  ;;  %v2832_v38 = vrot.slane %v6635_v59, 5  ;;  %v2835_v1 = vrot.slane %v6642_v9, 5  ;;  %v6884_v55 = vld [vmem:[%s6421_s25 + $0x80] sm:$0x1] }
  0x86   : > { %v5262_v28 = vrot.slane %v5246_v6, 9  ;;  %5854 = vmatprep.mubr.msk.bf16.mxu0 %vm669_vm3, %v5277_v18  ;;  %v603_v60 = vrot.slane %v602_v21, 4  ;;  %v612_v20 = vor.u32 %v611_v25, %v607_v61  ;;  %v2839_v44 = vrot.slane %v5182_v11, 5  ;;  %v5188_v57 = vld [vmem:[%s6421_s25 + $0x88] sm:$0xf] }
  0x87   : > { %5700 = vmatprep.mubr.msk.bf16.mxu1 %vm669_vm3, %v4993_v23  ;;  %v2842_v34 = vrot.slane %v5183_v8, 5  ;;  %v2833_v45 = vsel %vm6673_vm7, %v5261_v10, %v2832_v38  ;;  %v2834_v59 = vrot.slane %v2832_v38, 4  ;;  %v5011_v62 = vcombine.low %v6301_v51, %v6877_v15  ;;  %v5189_v54 = vld [vmem:[%s6421_s25 + $0x8c] sm:$0x1]  ;;  %v5191_v17 = vld [vmem:[%s6421_s25 + $0x94] sm:$0xf] }
  0x88   : > { %v608_v9 = vsel %vm6447_vm4, %v603_v60, %v607_v61  ;;  %v613_v26 = vrot.slane %v612_v20, 4  ;;  %v2840_v48 = vsel %vm6673_vm7, %v5262_v28, %v2839_v44  ;;  %v2841_v49 = vrot.slane %v2839_v44, 4  ;;  %v5248_v61 = vld [vmem:[%s6421_s25 + $0x84] sm:$0xe]  ;;  %v5249_v23 = vld [vmem:[%s6421_s25 + $0x90] sm:$0xe] }
  0x89   : > { %v2836_v50 = vsel %vm6673_vm7, %v2834_v59, %v2835_v1  ;;  %v5263_v58 = vrot.slane %v5247_v47, 9  ;;  %v2846_v7 = vrot.slane %v6881_v40, 5  ;;  %v2849_v41 = vrot.slane %v6884_v55, 5  ;;  %v5192_v25 = vld [vmem:[%s6421_s25 + $0x98] sm:$0x1] }
  0x8a   : > { %v618_v4 = vsel %vm6447_vm4, %v613_v26, %v617_v31  ;;  %v5278_v12 = vcombine.low %v2833_v45, %v2836_v50  ;;  %v2843_v63 = vsel %vm6673_vm7, %v2841_v49, %v2842_v34  ;;  %v5264_v10 = vrot.slane %v5248_v61, 9  ;;  %v5194_v31 = vld [vmem:[%s6421_s25 + $0xa0] sm:$0xf]  ;;  %v5195_v60 = vld [vmem:[%s6421_s25 + $0xa4] sm:$0x1] }
  0x8b   : > { %v4994_v2 = vcombine.low %v608_v9, %v618_v4  ;;  %v5279_v6 = vcombine.low %v2840_v48, %v2843_v63  ;;  %v2853_v11 = vrot.slane %v5188_v57, 5  ;;  %v2856_v8 = vrot.slane %v5189_v54, 5  ;;  %v5250_v20 = vld [vmem:[%s6421_s25 + $0x9c] sm:$0xe]  ;;  %v6303_v44 = vld [vmem:[%s6421_s25 + $0xc] sm:$0xf] }
  0x8c   : > { %5855 = vmatmul.mubr.msk.bf16.gmra.mrb[12].mxu0 %vm669_vm3, %v5278_v12  ;;  %v2847_v18 = vsel %vm6673_vm7, %v5263_v58, %v2846_v7  ;;  %v2848_v21 = vrot.slane %v2846_v7, 4  ;;  %v2860_v28 = vrot.slane %v5191_v17, 5  ;;  %v6911_v34 = vld [vmem:[%s6421_s25 + $0x10] sm:$0xf]  ;;  %v6305_v47 = vld [vmem:[%s6421_s25 + $0x18] sm:$0xf] }
  0x8d   : > { %5701 = vmatmul.mubr.msk.bf16.gmra.mrb[28].mxu1 %vm669_vm3, %v4994_v2  ;;  %5858 = vmatprep.mubr.msk.bf16.mxu0 %vm669_vm3, %v5279_v6  ;;  %v2854_v38 = vsel %vm6673_vm7, %v5264_v10, %v2853_v11  ;;  %v2855_v1 = vrot.slane %v2853_v11, 4  ;;  %v5012_v45 = vcombine.low %v6303_v44, %v6911_v34  ;;  %v6918_v9 = vld [vmem:[%s6421_s25 + $0x1c] sm:$0xf]  ;;  %v5265_v48 = vrot.slane %v5249_v23, 9  ;;  %v5197_v57 = vld [vmem:[%s6421_s25 + $0xac] sm:$0xf] }
  0x8e   : > { %5706 = vmatprep.mubr.msk.bf16.mxu1 %vm669_vm3, %v5011_v62  ;;  %v2850_v59 = vsel %vm6673_vm7, %v2848_v21, %v2849_v41  ;;  %v5013_v26 = vcombine.low %v6305_v47, %v6918_v9  ;;  %v2862_v51 = vrot.slane %v2860_v28, 4  ;;  %v2863_v62 = vrot.slane %v5192_v25, 5  ;;  %v6307_v54 = vld [vmem:[%s8158_s1 + $0x4] sm:$0x3]  ;;  %v5200_v2 = vld [vmem:[%s6421_s25 + $0xb8] sm:$0xf] }
  0x8f   : > { %v5280_v49 = vcombine.low %v2847_v18, %v2850_v59  ;;  %v2857_v50 = vsel %vm6673_vm7, %v2855_v1, %v2856_v8  ;;  %v5266_v12 = vrot.slane %v5250_v20, 9  ;;  %v2867_v63 = vrot.slane %v5194_v31, 5  ;;  %v6933_v7 = vld [vmem:[%s8158_s1 + $0x6] sm:$0x3]  ;;  %v5198_v10 = vld [vmem:[%s6421_s25 + $0xb0] sm:$0x1] }
  0x90   : > { %v5281_v4 = vcombine.low %v2854_v38, %v2857_v50  ;;  %v2870_v58 = vrot.slane %v5195_v60, 5  ;;  %v1437_v61 = vsel %vm718_vm0, %v6307_v54, 0  ;;  %v2861_v41 = vsel %vm6673_vm7, %v5265_v48, %v2860_v28  ;;  %v5251_v11 = vld [vmem:[%s6421_s25 + $0xa8] sm:$0xe]  ;;  %v5201_v25 = vld [vmem:[%s6421_s25 + $0xbc] sm:$0x1] }
  0x91   : > { %v2869_v6 = vrot.slane %v2867_v63, 4  ;;  %v2864_v17 = vsel %vm6673_vm7, %v2862_v51, %v2863_v62  ;;  %v2874_v8 = vrot.slane %v5197_v57, 5  ;;  %v2868_v23 = vsel %vm6673_vm7, %v5266_v12, %v2867_v63  ;;  %v5252_v31 = vld [vmem:[%s6421_s25 + $0xb4] sm:$0xe]  ;;  %v6308_v38 = vld [vmem:[%s6421_s25 + $0x24] sm:$0xf] }
  0x92   : > { %v2881_v21 = vrot.slane %v5200_v2, 5  ;;  %v6954_v1 = vld [vmem:[%s6421_s25 + $0x28] sm:$0xf]  ;;  %v5282_v60 = vcombine.low %v2861_v41, %v2864_v17  ;;  %v5267_v44 = vrot.slane %v5251_v11, 9  ;;  %v2877_v59 = vrot.slane %v5198_v10, 5 }
  0x93   : > { %v2871_v18 = vsel %vm6673_vm7, %v2869_v6, %v2870_v58  ;;  %v5014_v28 = vcombine.low %v6308_v38, %v6954_v1  ;;  %v6310_v47 = vld [vmem:[%s6421_s25 + $0x30] sm:$0xf]  ;;  %v2884_v51 = vrot.slane %v5201_v25, 5  ;;  %v5203_v62 = vld [vmem:[%s6421_s25 + $0xc4] sm:$0xf]  ;;  %v2269_v25 = vshrl.u32 %v6881_v40, 16 }
  0x94   : > { %5859 = vmatmul.mubr.msk.bf16.gmra.mrb[16].mxu0 %vm669_vm3, %v5280_v49  ;;  %v5283_v20 = vcombine.low %v2868_v23, %v2871_v18  ;;  %v5268_v49 = vrot.slane %v5252_v31, 9  ;;  %v2883_v50 = vrot.slane %v2881_v21, 4  ;;  %v2875_v57 = vsel %vm6673_vm7, %v5267_v44, %v2874_v8  ;;  %v5253_v12 = vld [vmem:[%s6421_s25 + $0xc0] sm:$0xe]  ;;  %v6312_v41 = vld [vmem:[%s6421_s25 + $0x3c] sm:$0xf] }
  0x95   : > { %5707 = vmatmul.mubr.msk.bf16.vlgmr.msra.gmra.mrb[0].mxu1 %vm669_vm3, %v5012_v45  ;;  %5862 = vmatprep.mubr.msk.bf16.mxu0 %vm669_vm3, %v5281_v4  ;;  %v2876_v45 = vrot.slane %v2874_v8, 4  ;;  %v2888_v63 = vrot.slane %v5203_v62, 5  ;;  %v5269_v6 = vrot.slane %v5253_v12, 9  ;;  %v6979_v17 = vld [vmem:[%s6421_s25 + $0x40] sm:$0xf]  ;;  %v5017_v18 = vcombine.low %v6586_v27, %v6589_v36  ;;  %v6264_v62 = vld [vmem:[%s6421_s25 + $0x24] sm:$0xff]  }
  0x96   : > { %5739 = vmatpush3.bf16.msra.mxu1 %v1437_v61  ;;  %5710 = vmatprep.mubr.msk.bf16.mxu1 %vm669_vm3, %v5013_v26  ;;  %v6959_v26 = vld [vmem:[%s6421_s25 + $0x34] sm:$0xf]  ;;  %v2882_v58 = vsel %vm6673_vm7, %v5268_v49, %v2881_v21  ;;  %v2885_v54 = vsel %vm6673_vm7, %v2883_v50, %v2884_v51  ;;  %v5204_v61 = vld [vmem:[%s6421_s25 + $0xc8] sm:$0x1]  ;;  %v5016_v10 = vcombine.low %v6312_v41, %v6979_v17  ;;  %v2265_v21 = vshll.u32 %v6881_v40, 16 }
  0x97   : > { %6237 = vmatprep.subr.msk.bf16.mxu1 %vm718_vm0, %v6933_v7  ;;  %v5015_v48 = vcombine.low %v6310_v47, %v6959_v26  ;;  %v2878_v4 = vsel %vm6673_vm7, %v2876_v45, %v2877_v59  ;;  %v5285_v11 = vcombine.low %v2882_v58, %v2885_v54  ;;  %v2890_v8 = vrot.slane %v2888_v63, 4  ;;  %v1175_v45 = vld [vmem:[%s6421_s25] sm:$0xe]  ;;  %v1176_v59 = vld [vmem:[%s6421_s25 + $0xc] sm:$0xe] }
  0x98   : > { %v5284_v2 = vcombine.low %v2875_v57, %v2878_v4  ;;  %v2891_v23 = vrot.slane %v5204_v61, 5  ;;  %v2889_v31 = vsel %vm6673_vm7, %v5269_v6, %v2888_v63  ;;  %v6994_v27 = vrot.slane %v2265_v21, 5  ;;  %v1179_v41 = vld [vmem:[%s6421_s25 + $0x30] sm:$0xe] }
  0x99   : > { %v2271_v36 = vrot.slane %v2269_v25, 4  ;;  %v5019_v44 = vcombine.low %v6646_v19, %v6652_v35  ;;  %v2275_v47 = vshll.u32 %v6884_v55, 16  ;;  %v5043_v19 = vrot.slane %v1175_v45, 9 }
  0x9a   : > { %v2892_v38 = vsel %vm6673_vm7, %v2890_v8, %v2891_v23  ;;  %8179 = vst [vmem:[#allocation3_spill] sm:$0xff] %v6994_v27  ;;  %v5044_v35 = vrot.slane %v1176_v59, 9  ;;  %v1242_v4 = vrot.slane %v6918_v9, 5  ;;  %v1249_v12 = vrot.slane %v6954_v1, 5  ;;  %v1180_v8 = vld [vmem:[%s6421_s25 + $0x3c] sm:$0xe] }
  0x9b   : > { %v5286_v40 = vcombine.low %v2889_v31, %v2892_v38  ;;  %v2272_v49 = vor.u32 %v2271_v36, %v6994_v27  ;;  %v7014_v51 = vrot.slane %v2275_v47, 5  ;;  %v5020_v58 = vcombine.low %v6667_v0, %v6680_v29  ;;  %v1181_v31 = vld [vmem:[%s6421_s25 + $0x48] sm:$0xe]  ;;  %v6318_v59 = vld [vmem:[%s6421_s25 + $0x38] sm:$0x1] }
  0x9c   : > { %5863 = vmatmul.mubr.msk.bf16.gmra.mrb[20].mxu0 %vm669_vm3, %v5282_v60  ;;  %v5018_v60 = vcombine.low %v6615_v24, %v6621_v37  ;;  %v6315_v24 = vld [vmem:[%s6421_s25 + $0x14] sm:$0x1]  ;;  %v4077_v54 = vsel %vm718_vm0, %v6738_v22, 0  ;;  %v5021_v61 = vcombine.low %v6699_v53, %v6706_v16  ;;  %v5022_v6 = vcombine.low %v6725_v39, %v6733_v43  ;;  %v6316_v16 = vld [vmem:[%s6421_s25 + $0x20] sm:$0x1] }
  0x9d   : > { %5711 = vmatmul.mubr.msk.bf16.gmra.mrb[4].mxu1 %vm669_vm3, %v5014_v28  ;;  %5866 = vmatprep.mubr.msk.bf16.mxu0 %vm669_vm3, %v5283_v20  ;;  %v1235_v28 = vrot.slane %v6911_v34, 5  ;;  %v6262_v20 = vld [vmem:[%s6421_s25 + $0x18] sm:$0xff]   ;;  %v6314_v34 = vld [vmem:[%s6421_s25 + $0x8] sm:$0x1]  ;;  %v1238_v37 = vrot.slane %v6315_v24, 5  ;;  %8180 = vst [vmem:[#allocation4_spill] sm:$0xff] %v7014_v51  ;;  %v5023_v9 = vcombine.low %v6757_v5, %v6769_v30 }
  0x9e   : > { %5714 = vmatprep.mubr.msk.bf16.mxu1 %vm669_vm3, %v5015_v48  ;;  %v1228_v48 = vrot.slane %v6877_v15, 5  ;;  %v1231_v50 = vrot.slane %v6314_v34, 5  ;;  %v1177_v15 = vld [vmem:[%s6421_s25 + $0x18] sm:$0xe]  ;;  %v7019_v63 = vrot.slane %v2272_v49, 4  ;;  %v1245_v22 = vrot.slane %v6316_v16, 5 }
  0x9f   : > { %v1237_v55 = vrot.slane %v1235_v28, 4  ;;  %v5045_v1 = vrot.slane %v1177_v15, 9  ;;  %v7041_v29 = vsel %vm6673_vm7, %v5044_v35, %v1235_v28  ;;  %v1251_v25 = vrot.slane %v1249_v12, 4  ;;  %v5368_v24 = vld [vmem:[%s6421_s25 + $0x18] sm:$0xf] }
  0xa0   : > { %v1230_v57 = vrot.slane %v1228_v48, 4  ;;  %8181 = vst [vmem:[#allocation5_spill] sm:$0xff] %v7019_v63  ;;  %v7037_v0 = vsel %vm6673_vm7, %v5043_v19, %v1228_v48  ;;  %v1259_v47 = vrot.slane %v6318_v59, 5  ;;  %v7078_v49 = vsel %vm718_vm0, %v6933_v7, 0  ;;  %v5369_v7 = vld [vmem:[%s6421_s25 + $0x1c] sm:$0xf] }
  0xa1   : > { %v7045_v53 = vsel %vm6673_vm7, %v1237_v55, %v1238_v37  ;;  %v7082_v34 = vsel %vm6673_vm7, %v5045_v1, %v1242_v4  ;;  %v6268_v37 = vld [vmem:[%s6421_s25 + $0x3c] sm:$0xff]   ;;  %v5048_v35 = vrot.slane %v1180_v8, 9  ;;  %v6319_v55 = vld [vmem:[%s6421_s25 + $0x44] sm:$0x1]  ;;  %v3598_v8 = vshll.u32 %v5368_v24, 16 }
  0xa2   : > { %v7056_v23 = vsel %vm6673_vm7, %v1230_v57, %v1231_v50  ;;  %v1182_v50 = vld [vmem:[%s6421_s25 + $0x54] sm:$0xe]  ;;  %v1266_v15 = vrot.slane %v6319_v55, 5  ;;  %v5372_v39 = vld [vmem:[%s6421_s25 + $0x28] sm:$0xf] }
  0xa3   : > { %v6326_v5 = vld [vmem:[%s6421_s25 + $0x70] sm:$0xf] }
  0xa4   : > { %5867 = vmatmul.mubr.msk.bf16.gmra.mrb[24].mxu0 %vm669_vm3, %v5284_v2  ;;  %v1178_v2 = vld [vmem:[%s6421_s25 + $0x24] sm:$0xe]  ;;  %v1291_v30 = vrot.slane %v6326_v5, 5 }
  0xa5   : > { %5715 = vmatmul.mubr.msk.bf16.gmra.mrb[8].mxu1 %vm669_vm3, %v5016_v10  ;;  %5870 = vmatprep.mubr.msk.bf16.mxu0 %vm669_vm3, %v5285_v11  ;;  %v1256_v10 = vrot.slane %v6959_v26, 5  ;;  %v6266_v11 = vld [vmem:[%s6421_s25 + $0x30] sm:$0xff]   ;;  %v5046_v21 = vrot.slane %v1178_v2, 9 }
  0xa6   : > { %5718 = vmatprep.mubr.msk.bf16.mxu1 %vm669_vm3, %v5017_v18  ;;  %v7052_v26 = vld [vmem:[%s8158_s1 + $0x10] sm:$0x3]  ;;  %v1244_v18 = vrot.slane %v1242_v4, 4  ;;  %v1293_v48 = vrot.slane %v1291_v30, 4 }
  0xa7   : > { %v1258_v45 = vrot.slane %v1256_v10, 4  ;;  %v7089_v19 = vsel %vm6673_vm7, %v5046_v21, %v1249_v12  ;;  %v3608_v21 = vshrl.u32 %v5369_v7, 16 }
  0xa8   : > { %v7098_v4 = vsel %vm6673_vm7, %v1244_v18, %v1245_v22  ;;  %v3595_v22 = vshrl.u32 %v5368_v24, 16  ;;  %v3604_v18 = vshll.u32 %v5369_v7, 16  ;;  %v5371_v24 = vld [vmem:[%s6421_s25 + $0x24] sm:$0xf] }
  0xa9   : > { %v7111_v1 = vsel %vm6673_vm7, %v1258_v45, %v1259_v47 }
  0xaa   : > { %v3597_v43 = vrot.slane %v3595_v22, 4  ;;  %v7153_v7 = vrot.slane %v3604_v18, 5  ;;  %v3622_v22 = vshll.u32 %v5371_v24, 16  ;;  %v3632_v18 = vshrl.u32 %v5372_v39, 16 }
  0xac   : > { %5871 = vmatmul.mubr.msk.bf16.gmra.mrb[28].mxu0 %vm669_vm3, %v5286_v40  ;;  %v6317_v40 = vld [vmem:[%s6421_s25 + $0x2c] sm:$0x1]  ;;  %v3624_v27 = vrot.slane %v3622_v22, 5 }
  0xad   : > { %5719 = vmatmul.mubr.msk.bf16.gmra.mrb[12].mxu1 %vm669_vm3, %v5018_v60  ;;  %5876 = vmatprep.mubr.msk.bf16.mxu0 %vm669_vm3, %v6262_v20  ;;  %v1252_v28 = vrot.slane %v6317_v40, 5  ;;  %v1263_v60 = vrot.slane %v6979_v17, 5  ;;  %v6322_v40 = vld [vmem:[%s6421_s25 + $0x50] sm:$0x1]  ;;  %v6327_v17 = vld [vmem:[%s6421_s25 + $0x74] sm:$0x1] }
  0xae   : > { %5722 = vmatprep.mubr.msk.bf16.mxu1 %vm669_vm3, %v5019_v44  ;;  %v5047_v44 = vrot.slane %v1179_v41, 9  ;;  %v5050_v41 = vrot.slane %v1182_v50, 9  ;;  %v1183_v50 = vld [vmem:[%s6421_s25 + $0x60] sm:$0xe]  ;;  %v5373_v20 = vld [vmem:[%s6421_s25 + $0x2c] sm:$0x1] }
  0xaf   : > { %v1265_v12 = vrot.slane %v1263_v60, 4  ;;  %v7124_v45 = vsel %vm6673_vm7, %v5048_v35, %v1263_v60  ;;  %v6323_v35 = vld [vmem:[%s6421_s25 + $0x5c] sm:$0x1] }
  0xb0   : > { %v7107_v2 = vsel %vm6673_vm7, %v5047_v44, %v1256_v10  ;;  %v1280_v55 = vrot.slane %v6323_v35, 5  ;;  %v1184_v35 = vld [vmem:[%s6421_s25 + $0x6c] sm:$0xe] }
  0xb1   : > { %v7128_v59 = vsel %vm6673_vm7, %v1265_v12, %v1266_v15  ;;  %v6324_v15 = vld [vmem:[%s6421_s25 + $0x64] sm:$0xf]  ;;  %v3610_v12 = vrot.slane %v3608_v21, 4  ;;  %v5052_v5 = vrot.slane %v1184_v35, 9 }
  0xb2   : > { %v6274_v21 = vld [vmem:[%s6421_s25 + $0x60] sm:$0xff]  }
  0xb4   : > { %5877 = vmatmul.mubr.msk.bf16.vlgmr.msra.gmra.mrb[0].mxu0 %vm669_vm3, %v6264_v62  ;;  %v6320_v62 = vld [vmem:[%s6421_s25 + $0x4c] sm:$0xf] }
  0xb5   : > { %5723 = vmatmul.mubr.msk.bf16.gmra.mrb[16].mxu1 %vm669_vm3, %v5020_v58  ;;  %5909 = vmatpush3.bf16.msra.mxu0 %v4077_v54  ;;  %v1270_v57 = vrot.slane %v6320_v62, 5  ;;  %v7102_v58 = vsel %vm6673_vm7, %v1251_v25, %v1252_v28  ;;  %v5049_v54 = vrot.slane %v1181_v31, 9  ;;  %v1273_v28 = vrot.slane %v6322_v40, 5 }
  0xb6   : > { %5726 = vmatprep.mubr.msk.bf16.mxu1 %vm669_vm3, %v5021_v61  ;;  %5880 = vmatprep.mubr.msk.bf16.mxu0 %vm669_vm3, %v6266_v11  ;;  %v6270_v61 = vld [vmem:[%s6421_s25 + $0x48] sm:$0xff]   ;;  %v6321_v11 = vld [vmem:[%s6421_s25 + $0x58] sm:$0xf]  ;;  %v1284_v62 = vrot.slane %v6324_v15, 5  ;;  %v5375_v15 = vld [vmem:[%s6421_s25 + $0x34] sm:$0xf] }
  0xb7   : > { %6243 = vmatprep.subr.msk.bf16.mxu0 %vm718_vm0, %v7052_v26  ;;  %v1277_v16 = vrot.slane %v6321_v11, 5  ;;  %v1272_v31 = vrot.slane %v1270_v57, 4  ;;  %v7132_v47 = vsel %vm6673_vm7, %v5049_v54, %v1270_v57  ;;  %v5370_v57 = vld [vmem:[%s6421_s25 + $0x20] sm:$0x1]  ;;  %v5374_v54 = vld [vmem:[%s6421_s25 + $0x30] sm:$0xf] }
  0xb8   : > { %v5051_v11 = vrot.slane %v1183_v50, 9  ;;  %v3646_v50 = vshll.u32 %v5374_v54, 16  ;;  %v3614_v25 = vshll.u32 %v5370_v57, 16  ;;  %v3652_v36 = vshll.u32 %v5375_v15, 16 }
  0xb9   : > { %v7143_v60 = vsel %vm6673_vm7, %v5050_v41, %v1277_v16  ;;  %v7159_v41 = vsel %vm6673_vm7, %v1272_v31, %v1273_v28  ;;  %v1286_v31 = vrot.slane %v1284_v62, 4  ;;  %v3643_v28 = vshrl.u32 %v5374_v54, 16 }
  0xba   : > { %v7201_v35 = vrot.slane %v3652_v36, 5 }
  0xbc   : > { %5881 = vmatmul.mubr.msk.bf16.gmra.mrb[4].mxu0 %vm669_vm3, %v6268_v37  ;;  %v1279_v37 = vrot.slane %v1277_v16, 4  ;;  %v6325_v16 = vld [vmem:[%s6421_s25 + $0x68] sm:$0x1] }
  0xbd   : > { %5727 = vmatmul.mubr.msk.bf16.gmra.mrb[20].mxu1 %vm669_vm3, %v5022_v6  ;;  %5884 = vmatprep.mubr.msk.bf16.mxu0 %vm669_vm3, %v6270_v61  ;;  %v3600_v6 = vrot.slane %v3598_v8, 5  ;;  %v6272_v61 = vld [vmem:[%s6421_s25 + $0x54] sm:$0xff]   ;;  %v1287_v40 = vrot.slane %v6325_v16, 5  ;;  %v3628_v8 = vshll.u32 %v5372_v39, 16  ;;  %v3611_v16 = vor.u32 %v3610_v12, %v7153_v7 }
  0xbe   : > { %5730 = vmatprep.mubr.msk.bf16.mxu1 %vm669_vm3, %v5023_v9  ;;  %v3619_v9 = vshrl.u32 %v5371_v24, 16  ;;  %v7168_v44 = vsel %vm6673_vm7, %v1279_v37, %v1280_v55  ;;  %v1294_v24 = vrot.slane %v6327_v17, 5  ;;  %v3656_v39 = vshrl.u32 %v5375_v15, 16 }
  0xbf   : > { %v3601_v10 = vor.u32 %v3600_v6, %v3597_v43  ;;  %v7174_v37 = vrot.slane %v3628_v8, 5  ;;  %v3634_v55 = vrot.slane %v3632_v18, 4  ;;  %v8182_v43 = vcombine.low %v6778_v52, %v6789_v46  ;;  %v6328_v8 = vld [vmem:[%s6421_s25 + $0x7c] sm:$0xf]  ;;  %v7210_v18 = vld [vmem:[%s6421_s25 + $0x38] sm:$0x1] }
  0xc0   : > { %v3621_v38 = vrot.slane %v3619_v9, 4  ;;  %v7183_v17 = vsel %vm6673_vm7, %v5051_v11, %v1284_v62  ;;  %v7187_v57 = vsel %vm6673_vm7, %v1286_v31, %v1287_v40  ;;  %v3645_v6 = vrot.slane %v3643_v28, 4  ;;  %8184 = vst [vmem:[#allocation6_spill] sm:$0xff] %v7210_v18 }
  0xc1   : > { %v3648_v12 = vrot.slane %v3646_v50, 5  ;;  %v8183_v52 = vcombine.low %v6810_v33, %v6815_v56  ;;  %v3602_v46 = vrot.slane %v3601_v10, 4  ;;  %v3612_v54 = vrot.slane %v3611_v16, 4  ;;  %v6276_v33 = vld [vmem:[%s6421_s25 + $0x6c] sm:$0xff]   ;;  %v1186_v16 = vld [vmem:[%s6421_s25 + $0x84] sm:$0xe] }
  0xc2   : > { %v3638_v62 = vshll.u32 %v5373_v20, 16  ;;  %v7195_v11 = vsel %vm6673_vm7, %v5052_v5, %v1291_v30  ;;  %v7199_v40 = vsel %vm6673_vm7, %v1293_v48, %v1294_v24  ;;  %v3658_v9 = vrot.slane %v3656_v39, 4  ;;  %v6277_v48 = vld [vmem:[%s6421_s25 + $0x78] sm:$0xff]  }
  0xc3   : > { %v3625_v10 = vor.u32 %v3624_v27, %v3621_v38  ;;  %v3635_v20 = vor.u32 %v3634_v55, %v7174_v37  ;;  %v1298_v30 = vrot.slane %v6328_v8, 5  ;;  %v3649_v38 = vor.u32 %v3648_v12, %v3645_v6  ;;  %v5377_v5 = vld [vmem:[%s6421_s25 + $0x3c] sm:$0xf] }
  0xc4   : > { %5885 = vmatmul.mubr.msk.bf16.gmra.mrb[8].mxu0 %vm669_vm3, %v6272_v61  ;;  %v3616_v61 = vrot.slane %v3614_v25, 5  ;;  %v1185_v25 = vld [vmem:[%s6421_s25 + $0x78] sm:$0xe]  ;;  %v7226_v50 = vrot.slane %v3638_v62, 5  ;;  %v3659_v39 = vor.u32 %v3658_v9, %v7201_v35  ;;  %v3662_v55 = vshll.u32 %v7210_v18, 16 }
  0xc5   : > { %5731 = vmatmul.mubr.msk.bf16.gmra.mrb[24].mxu1 %vm669_vm3, %v8182_v43  ;;  %5888 = vmatprep.mubr.msk.bf16.mxu0 %vm669_vm3, %v6274_v21  ;;  %v3607_v21 = vsel %vm6447_vm4, %v3602_v46, %v7153_v7  ;;  %v5053_v24 = vrot.slane %v1185_v25, 9  ;;  %v6329_v43 = vld [vmem:[%s6421_s25 + $0x88] sm:$0xf]  ;;  %v7234_v7 = vld [vmem:[%s6421_s25 + $0x40] sm:$0xf]  ;;  %v3626_v12 = vrot.slane %v3625_v10, 4  ;;  %v8186_v62 = vcombine.low %v6830_v14, %v6839_v42 }
  0xc6   : > { %5734 = vmatprep.mubr.msk.bf16.mxu1 %vm669_vm3, %v8183_v52  ;;  %v3617_v31 = vsel %vm6447_vm4, %v3612_v54, %v3616_v61  ;;  %v1305_v6 = vrot.slane %v6329_v43, 5  ;;  %8185 = vst [vmem:[#allocation7_spill] sm:$0xff] %v7234_v7  ;;  %v3636_v52 = vrot.slane %v3635_v20, 4  ;;  %v1300_v46 = vrot.slane %v1298_v30, 4  ;;  %v6330_v54 = vld [vmem:[%s6421_s25 + $0x80] sm:$0x1] }
  0xc7   : > { %v1301_v61 = vrot.slane %v6330_v54, 5  ;;  %v3650_v9 = vrot.slane %v3649_v38, 4  ;;  %v5054_v25 = vrot.slane %v1186_v16, 9  ;;  %v3667_v8 = vshrl.u32 %v5377_v5, 16  ;;  %v6278_v10 = vld [vmem:[%s6421_s25 + $0x84] sm:$0xff]  }
  0xc8   : > { %v3670_v43 = vshll.u32 %v5377_v5, 16  ;;  %v7248_v20 = vcombine.low %v3607_v21, %v3617_v31  ;;  %v7252_v14 = vsel %vm718_vm0, %v7052_v26, 0  ;;  %v3680_v38 = vshrl.u32 %v7234_v7, 16  ;;  %v6279_v21 = vld [vmem:[%s6421_s25 + $0x90] sm:$0xff]   ;;  %v6335_v18 = vld [vmem:[%s6421_s25 + $0xa0] sm:$0xf] }
  0xc9   : > { %v3660_v16 = vrot.slane %v3659_v39, 4  ;;  %v3664_v5 = vrot.slane %v3662_v55, 5  ;;  %v1307_v54 = vrot.slane %v1305_v6, 4  ;;  %v3631_v31 = vsel %vm6447_vm4, %v3626_v12, %v7174_v37 }
  0xca   : > { %v3641_v26 = vsel %vm6447_vm4, %v3636_v52, %v7226_v50  ;;  %v7267_v39 = vsel %vm6673_vm7, %v5053_v24, %v1298_v30  ;;  %v7271_v55 = vsel %vm6673_vm7, %v1300_v46, %v1301_v61  ;;  %v3655_v37 = vsel %vm6447_vm4, %v3650_v9, %v7201_v35  ;;  %v5383_v30 = vld [vmem:[%s6421_s25 + $0x54] sm:$0xf]  ;;  %v7288_v24 = vld [vmem:[%s6421_s25 + $0x58] sm:$0xf]  ;;  %v7293_v61 = vld [vmem:[%s6421_s25 + $0x90] sm:$0xe] }
  0xcb   : > { %v7284_v12 = vsel %vm6673_vm7, %v5054_v25, %v1305_v6  ;;  %v3669_v50 = vrot.slane %v3667_v8, 4  ;;  %v3672_v52 = vrot.slane %v3670_v43, 5  ;;  %v3682_v46 = vrot.slane %v3680_v38, 4 }
  0xcc   : > { %5889 = vmatmul.mubr.msk.bf16.gmra.mrb[12].mxu0 %vm669_vm3, %v6276_v33  ;;  %v8187_v33 = vcombine.low %v7037_v0, %v7056_v23  ;;  %v6331_v0 = vld [vmem:[%s6421_s25 + $0x8c] sm:$0x1]  ;;  %v3665_v36 = vsel %vm6447_vm4, %v3660_v16, %v3664_v5  ;;  %v3715_v25 = vshrl.u32 %v5383_v30, 16  ;;  %v3718_v8 = vshll.u32 %v5383_v30, 16 }
  0xcd   : > { %5735 = vmatmul.mubr.msk.bf16.gmra.mrb[28].mxu1 %vm669_vm3, %v8186_v62  ;;  %5892 = vmatprep.mubr.msk.bf16.mxu0 %vm669_vm3, %v6277_v48  ;;  %v3676_v48 = vshll.u32 %v7234_v7, 16  ;;  %v1308_v23 = vrot.slane %v6331_v0, 5  ;;  %v5380_v62 = vld [vmem:[%s6421_s25 + $0x48] sm:$0xf]  ;;  %v7277_v0 = vld [vmem:[%s6421_s25 + $0x4c] sm:$0xf]  ;;  %v8189_v38 = vcombine.low %v7041_v29, %v7045_v53  ;;  %v7311_v16 = vcombine.low %v3631_v31, %v3641_v26 }
  0xce   : > { %5740 = vmatprep.mubr.msk.bf16.mxu1 %vm669_vm3, %v8187_v33  ;;  %v7274_v33 = vld [vmem:[%s6421_s25 + $0x44] sm:$0x1]  ;;  %v3691_v27 = vshrl.u32 %v5380_v62, 16  ;;  %v3694_v15 = vshll.u32 %v5380_v62, 16  ;;  %v3700_v6 = vshll.u32 %v7277_v0, 16  ;;  %v3704_v9 = vshrl.u32 %v7277_v0, 16 }
  0xcf   : > { %8188 = vst [vmem:[#allocation8_spill] sm:$0xff] %v7274_v33  ;;  %v7290_v28 = vrot.slane %v3676_v48, 5  ;;  %v7299_v35 = vsel %vm6673_vm7, %v1307_v54, %v1308_v23  ;;  %v3724_v43 = vshll.u32 %v7288_v24, 16  ;;  %v3728_v48 = vshrl.u32 %v7288_v24, 16  ;;  %v5386_v31 = vld [vmem:[%s6421_s25 + $0x60] sm:$0xf] }
  0xd0   : > { %v3686_v5 = vshll.u32 %v7274_v33, 16  ;;  %v5055_v54 = vrot.slane %v7293_v61, 9  ;;  %v8190_v23 = vcombine.low %v7082_v34, %v7098_v4  ;;  %v7322_v29 = vcombine.low %v3655_v37, %v3665_v36  ;;  %v6280_v26 = vld [vmem:[%s6421_s25 + $0x9c] sm:$0xff]   ;;  %v6281_v30 = vld [vmem:[%s6421_s25 + $0xa8] sm:$0xff]  }
  0xd1   : > { %v3673_v53 = vor.u32 %v3672_v52, %v3669_v50  ;;  %v3693_v62 = vrot.slane %v3691_v27, 4  ;;  %v7333_v34 = vrot.slane %v3700_v6, 5  ;;  %v3706_v4 = vrot.slane %v3704_v9, 4  ;;  %v6332_v36 = vld [vmem:[%s8158_s1 + $0x8] sm:$0x3] }
  0xd2   : > { %v3717_v27 = vrot.slane %v3715_v25, 4  ;;  %v3720_v37 = vrot.slane %v3718_v8, 5  ;;  %v7342_v50 = vrot.slane %v3724_v43, 5  ;;  %v3730_v52 = vrot.slane %v3728_v48, 4  ;;  %v6333_v6 = vld [vmem:[%s6421_s25 + $0x94] sm:$0xf] }
  0xd3   : > { %v7348_v9 = vld [vmem:[%s6421_s25 + $0x64] sm:$0xf]  ;;  %v3739_v61 = vshrl.u32 %v5386_v31, 16  ;;  %v7350_v22 = vrot.slane %v3673_v53, 4  ;;  %v1319_v25 = vrot.slane %v6335_v18, 5  ;;  %v3707_v43 = vor.u32 %v3706_v4, %v7333_v34 }
  0xd4   : > { %5893 = vmatmul.mubr.msk.bf16.gmra.mrb[16].mxu0 %vm669_vm3, %v6278_v10  ;;  %8191 = vst [vmem:[#allocation9_spill] sm:$0xff] %v7348_v9  ;;  %v3742_v10 = vshll.u32 %v5386_v31, 16  ;;  %v3721_v31 = vor.u32 %v3720_v37, %v3717_v27  ;;  %v3731_v53 = vor.u32 %v3730_v52, %v7342_v50  ;;  %v8192_v18 = vcombine.low %v7089_v19, %v7102_v58  ;;  %v6282_v37 = vld [vmem:[%s6421_s25 + $0xb4] sm:$0xff]  }
  0xd5   : > { %5741 = vmatmul.mubr.msk.bf16.vlgmr.msra.gmra.mrb[0].mxu1 %vm669_vm3, %v8189_v38  ;;  %5896 = vmatprep.mubr.msk.bf16.mxu0 %vm669_vm3, %v6279_v21  ;;  %v3696_v21 = vrot.slane %v3694_v15, 5  ;;  %v7331_v38 = vld [vmem:[%s6421_s25 + $0x50] sm:$0x1]  ;;  %v7340_v15 = vld [vmem:[%s6421_s25 + $0x5c] sm:$0x1]  ;;  %v8193_v27 = vcombine.low %v7107_v2, %v7111_v1  ;;  %v1321_v52 = vrot.slane %v1319_v25, 4 }
  0xd6   : > { %5773 = vmatpush3.bf16.msra.mxu1 %v7078_v49  ;;  %5744 = vmatprep.mubr.msk.bf16.mxu1 %vm669_vm3, %v8190_v23  ;;  %v3683_v49 = vor.u32 %v3682_v46, %v7290_v28  ;;  %v7344_v46 = vrot.slane %v3686_v5, 5  ;;  %v1312_v23 = vrot.slane %v6333_v6, 5  ;;  %v3710_v48 = vshll.u32 %v7331_v38, 16  ;;  %v1188_v5 = vld [vmem:[%s6421_s25 + $0x9c] sm:$0xe] }
  0xd7   : > { %6239 = vmatprep.subr.msk.bf16.mxu1 %vm718_vm0, %v6332_v36  ;;  %v6334_v36 = vld [vmem:[%s6421_s25 + $0x98] sm:$0x1]  ;;  %v3697_v7 = vor.u32 %v3696_v21, %v3693_v62  ;;  %v3734_v6 = vshll.u32 %v7340_v15, 16  ;;  %v3752_v62 = vshrl.u32 %v7348_v9, 16  ;;  %v3744_v4 = vrot.slane %v3742_v10, 5 }
  0xd8   : > { %v1315_v33 = vrot.slane %v6334_v36, 5  ;;  %v3684_v8 = vrot.slane %v3683_v49, 4  ;;  %v3748_v36 = vshll.u32 %v7348_v9, 16  ;;  %v7369_v21 = vsel %vm6673_vm7, %v5055_v54, %v1312_v23  ;;  %v7380_v2 = vld [vmem:[%s6421_s25 + $0x68] sm:$0x1] }
  0xd9   : > { %v3741_v49 = vrot.slane %v3739_v61, 4  ;;  %v3698_v19 = vrot.slane %v3697_v7, 4  ;;  %v5056_v58 = vrot.slane %v1188_v5, 9  ;;  %v3708_v3 = vrot.slane %v3707_v43, 4  ;;  %8194 = vst [vmem:[#allocation10_spill] sm:$0xff] %v7380_v2  ;;  %v6283_v5 = vld [vmem:[%s6421_s25 + $0xc0] sm:$0xff]  }
  0xda   : > { %v3712_v54 = vrot.slane %v3710_v48, 5  ;;  %v3736_v63 = vrot.slane %v3734_v6, 5  ;;  %v1326_v61 = vrot.slane %v6815_v56, 5  ;;  %v3722_v10 = vrot.slane %v3721_v31, 4  ;;  %v1190_v31 = vld [vmem:[%s6421_s25 + $0xb4] sm:$0xe] }
  0xdb   : > { %v3732_v51 = vrot.slane %v3731_v53, 4  ;;  %v7382_v1 = vrot.slane %v3748_v36, 5  ;;  %v3754_v7 = vrot.slane %v3752_v62, 4  ;;  %v3679_v43 = vsel %vm6447_vm4, %v7350_v22, %v7290_v28  ;;  %v6337_v62 = vld [vmem:[%s6421_s25 + $0xb0] sm:$0x1] }
  0xdc   : > { %5897 = vmatmul.mubr.msk.bf16.gmra.mrb[20].mxu0 %vm669_vm3, %v6280_v26  ;;  %v1314_v26 = vrot.slane %v1312_v23, 4  ;;  %v1189_v23 = vld [vmem:[%s6421_s25 + $0xa8] sm:$0xe]  ;;  %v3689_v48 = vsel %vm6447_vm4, %v3684_v8, %v7344_v46  ;;  %v3745_v6 = vor.u32 %v3744_v4, %v3741_v49  ;;  %v3703_v53 = vsel %vm6447_vm4, %v3698_v19, %v7333_v34  ;;  %v5389_v46 = vld [vmem:[%s6421_s25 + $0x6c] sm:$0xf] }
  0xdd   : > { %5745 = vmatmul.mubr.msk.bf16.gmra.mrb[4].mxu1 %vm669_vm3, %v8192_v18  ;;  %5900 = vmatprep.mubr.msk.bf16.mxu0 %vm669_vm3, %v6281_v30  ;;  %v6336_v18 = vld [vmem:[%s6421_s25 + $0xa4] sm:$0x1]  ;;  %v7402_v36 = vsel %vm6673_vm7, %v5056_v58, %v1319_v25  ;;  %v5057_v28 = vrot.slane %v1189_v23, 9  ;;  %v1328_v8 = vrot.slane %v1326_v61, 4  ;;  %v3758_v49 = vshll.u32 %v7380_v2, 16 }
  0xde   : > { %5748 = vmatprep.mubr.msk.bf16.mxu1 %vm669_vm3, %v8193_v27  ;;  %v1322_v30 = vrot.slane %v6336_v18, 5  ;;  %v7394_v56 = vsel %vm6673_vm7, %v1314_v26, %v1315_v33  ;;  %v3713_v33 = vsel %vm6447_vm4, %v3708_v3, %v3712_v54  ;;  %v1329_v26 = vrot.slane %v6337_v62, 5  ;;  %v5392_v18 = vld [vmem:[%s6421_s25 + $0x78] sm:$0xf]  ;;  %v7457_v54 = vld [vmem:[%s6421_s25 + $0xbc] sm:$0x1] }
  0xdf   : > { %v3727_v34 = vsel %vm6447_vm4, %v3722_v10, %v7342_v50  ;;  %v3737_v25 = vsel %vm6447_vm4, %v3732_v51, %v3736_v63  ;;  %v3755_v4 = vor.u32 %v3754_v7, %v7382_v1  ;;  %v5058_v27 = vrot.slane %v1190_v31, 9  ;;  %v7431_v51 = vld [vmem:[%s6421_s25 + $0x70] sm:$0xf]  ;;  %v7461_v10 = vld [vmem:[%s6421_s25 + $0x7c] sm:$0xf] }
  0xe0   : > { %v7406_v22 = vsel %vm6673_vm7, %v1321_v52, %v1322_v30  ;;  %v8196_v3 = vcombine.low %v7124_v45, %v7128_v59  ;;  %v7427_v19 = vrot.slane %v3745_v6, 4  ;;  %v1333_v50 = vrot.slane %v6839_v42, 5  ;;  %8197 = vst [vmem:[#allocation12_spill] sm:$0xff] %v7431_v51  ;;  %8199 = vst [vmem:[#allocation13_spill] sm:$0xff] %v7461_v10  ;;  %v5395_v7 = vld [vmem:[%s6421_s25 + $0x84] sm:$0xf] }
  0xe1   : > { %8195 = vst [vmem:[#allocation11_spill] sm:$0xff] %v7406_v22  ;;  %v3763_v63 = vshrl.u32 %v5389_v46, 16  ;;  %v8198_v45 = vcombine.low %v7132_v47, %v7159_v41  ;;  %v7439_v58 = vcombine.low %v3703_v53, %v3713_v33  ;;  %v7445_v42 = vsel %vm6673_vm7, %v5057_v28, %v1326_v61  ;;  %v6284_v61 = vld [vmem:[%s6421_s25 + $0xcc] sm:$0xff]   ;;  %v7473_v31 = vld [vmem:[%s6421_s25 + $0x88] sm:$0xf] }
  0xe2   : > { %v7448_v30 = vcombine.low %v3727_v34, %v3737_v25  ;;  %v7452_v47 = vsel %vm6673_vm7, %v1328_v8, %v1329_v26  ;;  %v7454_v41 = vrot.slane %v3758_v49, 5  ;;  %v3772_v6 = vshll.u32 %v7431_v51, 16  ;;  %8200 = vst [vmem:[#allocation14_spill] sm:$0xff] %v7473_v31  ;;  %v5398_v62 = vld [vmem:[%s6421_s25 + $0x90] sm:$0xf] }
  0xe3   : > { %v7479_v28 = vrot.slane %v1333_v50, 4  ;;  %v7481_v33 = vrot.slane %v3763_v63, 4  ;;  %v3776_v8 = vshrl.u32 %v7431_v51, 16  ;;  %v3787_v26 = vshrl.u32 %v5392_v18, 16  ;;  %v7488_v25 = vld [vmem:[%s6421_s25 + $0x94] sm:$0xf] }
  0xe4   : > { %5901 = vmatmul.mubr.msk.bf16.gmra.mrb[24].mxu0 %vm669_vm3, %v6282_v37  ;;  %v7425_v37 = vcombine.low %v3679_v43, %v3689_v48  ;;  %v7469_v43 = vsel %vm6673_vm7, %v5058_v27, %v1333_v50  ;;  %v3766_v48 = vshll.u32 %v5389_v46, 16  ;;  %v3790_v49 = vshll.u32 %v5392_v18, 16  ;;  %8201 = vst [vmem:[#allocation15_spill] sm:$0xff] %v7488_v25  ;;  %v7526_v2 = vld [vmem:[%s6421_s25 + $0x8c] sm:$0x1] }
  0xe5   : > { %5749 = vmatmul.mubr.msk.bf16.gmra.mrb[8].mxu1 %vm669_vm3, %v8196_v3  ;;  %5904 = vmatprep.mubr.msk.bf16.mxu0 %vm669_vm3, %v6283_v5  ;;  %v7465_v5 = vrot.slane %v3755_v4, 4  ;;  %v3796_v46 = vshll.u32 %v7461_v10, 16  ;;  %v3800_v34 = vshrl.u32 %v7461_v10, 16  ;;  %v3811_v4 = vshrl.u32 %v5395_v7, 16 }
  0xe6   : > { %5752 = vmatprep.mubr.msk.bf16.mxu1 %vm669_vm3, %v8198_v45  ;;  %v3814_v27 = vshll.u32 %v5395_v7, 16  ;;  %v3820_v3 = vshll.u32 %v7473_v31, 16  ;;  %v3824_v50 = vshrl.u32 %v7473_v31, 16  ;;  %v7498_v45 = vld [vmem:[%s6421_s25 + $0x74] sm:$0x1]  ;;  %v3768_v18 = vrot.slane %v3766_v48, 5 }
  0xe7   : > { %v3835_v52 = vshrl.u32 %v5398_v62, 16  ;;  %v3838_v53 = vshll.u32 %v5398_v62, 16  ;;  %v8202_v7 = vcombine.low %v7143_v60, %v7168_v44  ;;  %v3778_v59 = vrot.slane %v3776_v8, 4  ;;  %v5401_v48 = vld [vmem:[%s6421_s25 + $0x9c] sm:$0xf] }
  0xe8   : > { %v3844_v63 = vshll.u32 %v7488_v25, 16  ;;  %v3848_v23 = vshrl.u32 %v7488_v25, 16  ;;  %v8203_v62 = vcombine.low %v7183_v17, %v7187_v57  ;;  %v7516_v44 = vld [vmem:[%s6421_s25 + $0x80] sm:$0x1]  ;;  %v3789_v60 = vrot.slane %v3787_v26, 4 }
  0xe9   : > { %8204 = vst [vmem:[#allocation16_spill] sm:$0xff] %v7516_v44  ;;  %v3813_v31 = vrot.slane %v3811_v4, 4  ;;  %v3816_v8 = vrot.slane %v3814_v27, 5  ;;  %v7520_v10 = vrot.slane %v3820_v3, 5  ;;  %v3826_v51 = vrot.slane %v3824_v50, 4 }
  0xea   : > { %v7523_v25 = vld [vmem:[%s6421_s25 + $0xa0] sm:$0xf]  ;;  %v3837_v17 = vrot.slane %v3835_v52, 4  ;;  %v3840_v57 = vrot.slane %v3838_v53, 5  ;;  %v3862_v9 = vshll.u32 %v5401_v48, 16  ;;  %v3769_v26 = vor.u32 %v3768_v18, %v7481_v33 }
  0xeb   : > { %v3806_v27 = vshll.u32 %v7516_v44, 16  ;;  %v7535_v3 = vld [vmem:[%s6421_s25 + $0x98] sm:$0x1]  ;;  %v3868_v50 = vshll.u32 %v7523_v25, 16  ;;  %v3872_v52 = vshrl.u32 %v7523_v25, 16  ;;  %v3817_v22 = vor.u32 %v3816_v8, %v3813_v31 }
  0xec   : > { %5905 = vmatmul.mubr.msk.bf16.gmra.mrb[28].mxu0 %vm669_vm3, %v6284_v61  ;;  %v7506_v61 = vrot.slane %v3772_v6, 5  ;;  %v3802_v6 = vrot.slane %v3800_v34, 4  ;;  %v3850_v34 = vrot.slane %v3848_v23, 4  ;;  %v3830_v33 = vshll.u32 %v7526_v2, 16 }
  0xed   : > { %5753 = vmatmul.mubr.msk.bf16.gmra.mrb[12].mxu1 %vm669_vm3, %v8202_v7  ;;  %5910 = vmatprep.mubr.msk.bf16.mxu0 %vm669_vm3, %v7248_v20  ;;  %v3792_v7 = vrot.slane %v3790_v49, 5  ;;  %v7518_v20 = vrot.slane %v3796_v46, 5  ;;  %v3782_v49 = vshll.u32 %v7498_v45, 16  ;;  %v7530_v46 = vrot.slane %v3844_v63, 5 }
  0xee   : > { %5756 = vmatprep.mubr.msk.bf16.mxu1 %vm669_vm3, %v8203_v62  ;;  %v3859_v62 = vshrl.u32 %v5401_v48, 16  ;;  %v3779_v4 = vor.u32 %v3778_v59, %v7506_v61  ;;  %v3827_v23 = vor.u32 %v3826_v51, %v7520_v10  ;;  %v3841_v59 = vor.u32 %v3840_v57, %v3837_v17  ;;  %v7568_v57 = vld [vmem:[%s6421_s25 + $0xa4] sm:$0x1] }
  0xef   : > { %v3793_v53 = vor.u32 %v3792_v7, %v3789_v60  ;;  %v3803_v48 = vor.u32 %v3802_v6, %v7518_v20  ;;  %v3864_v18 = vrot.slane %v3862_v9, 5  ;;  %v8205_v44 = vcombine.low %v7195_v11, %v7199_v40 }
  0xf0   : > { %v3861_v63 = vrot.slane %v3859_v62, 4  ;;  %v8206_v31 = vrot.slane %v7457_v54, 5  ;;  %v3784_v51 = vrot.slane %v3782_v49, 5  ;;  %v3851_v60 = vor.u32 %v3850_v34, %v7530_v46  ;;  %v7571_v34 = vld [vmem:[%s6421_s25 + $0xac] sm:$0xf] }
  0xf1   : > { %v3854_v9 = vshll.u32 %v7535_v3, 16  ;;  %v8207_v11 = vcombine.low %v7267_v39, %v7271_v55  ;;  %v3770_v40 = vrot.slane %v3769_v26, 4  ;;  %v7564_v54 = vrot.slane %v3868_v50, 5 }
  0xf2   : > { %v3794_v7 = vrot.slane %v3793_v53, 4  ;;  %v3804_v6 = vrot.slane %v3803_v48, 4  ;;  %v3808_v8 = vrot.slane %v3806_v27, 5  ;;  %v3832_v17 = vrot.slane %v3830_v33, 5  ;;  %v7581_v48 = vld [vmem:[%s6421_s25 + $0xb0] sm:$0x1] }
  0xf3   : > { %v3818_v39 = vrot.slane %v3817_v22, 4  ;;  %v3828_v55 = vrot.slane %v3827_v23, 4  ;;  %v3842_v62 = vrot.slane %v3841_v59, 4  ;;  %v3865_v49 = vor.u32 %v3864_v18, %v3861_v63 }
  0xf4   : > { %5911 = vmatmul.mubr.msk.bf16.vlgmr.msra.gmra.mrb[0].mxu0 %vm669_vm3, %v7311_v16  ;;  %v7554_v16 = vsel %vm6673_vm7, %v7479_v28, %v8206_v31  ;;  %v3874_v28 = vrot.slane %v3872_v52, 4  ;;  %v3856_v26 = vrot.slane %v3854_v9, 5  ;;  %v3775_v52 = vsel %vm6447_vm4, %v3770_v40, %v7506_v61 }
  0xf5   : > { %5757 = vmatmul.mubr.msk.bf16.gmra.mrb[16].mxu1 %vm669_vm3, %v8205_v44  ;;  %5943 = vmatpush3.bf16.msra.mxu0 %v7252_v14  ;;  %v3780_v14 = vrot.slane %v3779_v4, 4  ;;  %v5404_v44 = vld [vmem:[%s6421_s25 + $0xa8] sm:$0xf]  ;;  %v3878_v22 = vshll.u32 %v7568_v57, 16  ;;  %v3799_v33 = vsel %vm6447_vm4, %v3794_v7, %v7518_v20  ;;  %v3809_v23 = vsel %vm6447_vm4, %v3804_v6, %v3808_v8 }
  0xf6   : > { %5760 = vmatprep.mubr.msk.bf16.mxu1 %vm669_vm3, %v8207_v11  ;;  %5914 = vmatprep.mubr.msk.bf16.mxu0 %vm669_vm3, %v7322_v29  ;;  %v3852_v29 = vrot.slane %v3851_v60, 4  ;;  %v3883_v4 = vshrl.u32 %v5404_v44, 16  ;;  %v3886_v50 = vshll.u32 %v5404_v44, 16  ;;  %v3875_v53 = vor.u32 %v3874_v28, %v7564_v54  ;;  %v5453_v11 = vld [vmem:[%s6421_s25 + $0x48] sm:$0xe] }
  0xf7   : > { %v3785_v27 = vsel %vm6447_vm4, %v3780_v14, %v3784_v51  ;;  %v3892_v59 = vshll.u32 %v7571_v34, 16  ;;  %v3896_v61 = vshrl.u32 %v7571_v34, 16  ;;  %v3823_v63 = vsel %vm6447_vm4, %v3818_v39, %v7520_v10  ;;  %v7646_v39 = vld [vmem:[%s6421_s25 + $0xb8] sm:$0xf] }
  0xf8   : > { %v3833_v18 = vsel %vm6447_vm4, %v3828_v55, %v3832_v17  ;;  %v3847_v20 = vsel %vm6447_vm4, %v3842_v62, %v7530_v46  ;;  %v3866_v31 = vrot.slane %v3865_v49, 4  ;;  %v8208_v51 = vcombine.low %v7284_v12, %v7299_v35 }
  0xf9   : > { %v3885_v10 = vrot.slane %v3883_v4, 4  ;;  %v3888_v60 = vrot.slane %v3886_v50, 5  ;;  %v3902_v9 = vshll.u32 %v7581_v48, 16  ;;  %v8209_v46 = vcombine.low %v7369_v21, %v7394_v56  ;;  %v5407_v21 = vld [vmem:[%s6421_s25 + $0xb4] sm:$0xf] }
  0xfa   : > { %v5074_v12 = vcombine.low %v7445_v42, %v7452_v47  ;;  %v8210_v35 = vsel %vm6447_vm4, %v7465_v5, %v7454_v41  ;;  %v3876_v14 = vrot.slane %v3875_v53, 4  ;;  %v3880_v28 = vrot.slane %v3878_v22, 5  ;;  %v5455_v4 = vld [vmem:[%s6421_s25 + $0x60] sm:$0xe]  ;;  %v5456_v53 = vld [vmem:[%s6421_s25 + $0x6c] sm:$0xe] }
  0xfb   : > { %v5075_v56 = vcombine.low %v7469_v43, %v7554_v16  ;;  %v7629_v44 = vcombine.low %v3775_v52, %v3785_v27  ;;  %v7631_v42 = vrot.slane %v3892_v59, 5  ;;  %v3898_v47 = vrot.slane %v3896_v61, 4  ;;  %v8219_v16 = vld [vmem:[#allocation4_spill] sm:$0xff] }
  0xfc   : > { %5915 = vmatmul.mubr.msk.bf16.gmra.mrb[4].mxu0 %vm669_vm3, %v7425_v37  ;;  %v3857_v37 = vsel %vm6447_vm4, %v3852_v29, %v3856_v26  ;;  %v7633_v41 = vcombine.low %v3799_v33, %v3809_v23  ;;  %v7635_v5 = vcombine.low %v3823_v63, %v3833_v18  ;;  %v3871_v6 = vsel %vm6447_vm4, %v3866_v31, %v7564_v54  ;;  %v8212_v23 = vld [vmem:[#allocation11_spill] sm:$0xff]  ;;  %v5410_v63 = vld [vmem:[%s6421_s25 + $0xc0] sm:$0xf]  ;;  %v8214_v18 = vld [vmem:[#allocation9_spill] sm:$0xff] }
  0xfd   : > { %5761 = vmatmul.mubr.msk.bf16.gmra.mrb[20].mxu1 %vm669_vm3, %v8208_v51  ;;  %5918 = vmatprep.mubr.msk.bf16.mxu0 %vm669_vm3, %v7439_v58  ;;  %v8211_v58 = vsel %vm6447_vm4, %v7427_v19, %v7382_v1  ;;  %v7637_v7 = vcombine.low %v3847_v20, %v3857_v37  ;;  %v5469_v1 = vrot.slane %v5453_v11, 9  ;;  %v5454_v19 = vld [vmem:[%s6421_s25 + $0x54] sm:$0xe]  ;;  %v3889_v8 = vor.u32 %v3888_v60, %v3885_v10  ;;  %v8215_v31 = vld [vmem:[#allocation10_spill] sm:$0xff] }
  0xfe   : > { %5764 = vmatprep.mubr.msk.bf16.mxu1 %vm669_vm3, %v8209_v46  ;;  %v5423_v40 = vcombine.low %v8211_v58, %v8210_v35  ;;  %v7643_v17 = vrot.slane %v3902_v9, 5  ;;  %v3907_v55 = vshrl.u32 %v5407_v21, 16  ;;  %v3881_v62 = vsel %vm6447_vm4, %v3876_v14, %v3880_v28  ;;  %v8216_v9 = vld [vmem:[#allocation12_spill] sm:$0xff]  ;;  %v7695_v35 = vld [vmem:[%s6421_s25 + $0xbc] sm:$0x1] }
  0xff   : > { %v3910_v49 = vshll.u32 %v5407_v21, 16  ;;  %v4366_v29 = vrot.slane %v7277_v0, 5  ;;  %v4369_v26 = vrot.slane %v7331_v38, 5  ;;  %v3899_v50 = vor.u32 %v3898_v47, %v7631_v42  ;;  %v7698_v58 = vld [vmem:[%s6421_s25 + $0xc4] sm:$0xf] }
 0x100   : > { %v5470_v52 = vrot.slane %v5454_v19, 9  ;;  %v4373_v54 = vrot.slane %v7288_v24, 5  ;;  %v4376_v27 = vrot.slane %v7340_v15, 5  ;;  %v3916_v22 = vshll.u32 %v7646_v39, 16  ;;  %v5457_v19 = vld [vmem:[%s6421_s25 + $0x78] sm:$0xe] }
 0x101   : > { %v3920_v33 = vshrl.u32 %v7646_v39, 16  ;;  %v7663_v0 = vsel %vm6673_vm7, %v5469_v1, %v4366_v29  ;;  %v4368_v38 = vrot.slane %v4366_v29, 4  ;;  %v8213_v59 = vcombine.low %v7402_v36, %v8212_v23  ;;  %v8217_v23 = vld [vmem:[#allocation13_spill] sm:$0xff] }
 0x102   : > { %v7670_v24 = vcombine.low %v3871_v6, %v3881_v62  ;;  %v7674_v15 = vsel %vm6673_vm7, %v5470_v52, %v4373_v54  ;;  %v5471_v61 = vrot.slane %v5455_v4, 9  ;;  %v4380_v20 = vrot.slane %v8214_v18, 5  ;;  %v6285_v6 = vld [vmem:[%s6421_s25 + $0xc] sm:$0xff]  }
 0x103   : > { %v7680_v36 = vsel %vm6673_vm7, %v4368_v38, %v4369_v26  ;;  %v4383_v51 = vrot.slane %v8215_v31, 5  ;;  %v5472_v37 = vrot.slane %v5456_v53, 9  ;;  %v4387_v11 = vrot.slane %v8216_v9, 5 }
 0x104   : > { %5919 = vmatmul.mubr.msk.bf16.gmra.mrb[8].mxu0 %vm669_vm3, %v7448_v30  ;;  %v4375_v30 = vrot.slane %v4373_v54, 4  ;;  %v5486_v10 = vcombine.low %v7663_v0, %v7680_v36  ;;  %v4390_v46 = vrot.slane %v7498_v45, 5  ;;  %v7704_v14 = vsel %vm6673_vm7, %v5471_v61, %v4380_v20 }
 0x105   : > { %5765 = vmatmul.mubr.msk.bf16.gmra.mrb[24].mxu1 %vm669_vm3, %v8213_v59  ;;  %5922 = vmatprep.mubr.msk.bf16.mxu0 %vm669_vm3, %v5423_v40  ;;  %v4382_v28 = vrot.slane %v4380_v20, 4  ;;  %v7706_v21 = vrot.slane %v3907_v55, 4  ;;  %v3931_v47 = vshrl.u32 %v5410_v63, 16  ;;  %v7710_v45 = vsel %vm6673_vm7, %v5472_v37, %v4387_v11  ;;  %v5184_v55 = vld [vmem:[%s6421_s25 + $0x78] sm:$0xf]  ;;  %v8218_v59 = vld [vmem:[#allocation16_spill] sm:$0xff] }
 0x106   : > { %5768 = vmatprep.mubr.msk.bf16.mxu1 %vm669_vm3, %v5074_v12  ;;  %v7688_v60 = vsel %vm6673_vm7, %v4375_v30, %v4376_v27  ;;  %v7692_v12 = vrot.slane %v3889_v8, 4  ;;  %v4389_v1 = vrot.slane %v4387_v11, 4  ;;  %v7714_v8 = vrot.slane %v3899_v50, 4 }
 0x107   : > { %v5487_v40 = vcombine.low %v7674_v15, %v7688_v60  ;;  %v7716_v62 = vrot.slane %v3910_v49, 5  ;;  %v3934_v29 = vshll.u32 %v5410_v63, 16  ;;  %v7720_v26 = vsel %vm6673_vm7, %v4382_v28, %v4383_v51  ;;  %v8221_v28 = vld [vmem:[#allocation14_spill] sm:$0xff] }
 0x108   : > { %v7723_v4 = vrot.slane %v3916_v22, 5  ;;  %v7725_v52 = vrot.slane %v3920_v33, 4  ;;  %v5488_v54 = vcombine.low %v7704_v14, %v7720_v26  ;;  %v7731_v27 = vsel %vm6673_vm7, %v4389_v1, %v4390_v46  ;;  %v5458_v33 = vld [vmem:[%s6421_s25 + $0x84] sm:$0xe]  ;;  %v6286_v1 = vld [vmem:[%s6421_s25 + $0x18] sm:$0xff]  }
 0x109   : > { %v3926_v49 = vshll.u32 %v7695_v35, 16  ;;  %v3940_v50 = vshll.u32 %v7698_v58, 16  ;;  %v5489_v53 = vcombine.low %v7710_v45, %v7731_v27  ;;  %v5473_v22 = vrot.slane %v5457_v19, 9  ;;  %v6348_v60 = vld [vmem:[%s6421_s25 + $0xa0] sm:$0xf] }
 0x10a   : > { %v3933_v38 = vrot.slane %v3931_v47, 4  ;;  %v4397_v30 = vrot.slane %v8218_v59, 5  ;;  %v2256_v61 = vshrl.u32 %v5184_v55, 16  ;;  %v3936_v63 = vrot.slane %v3934_v29, 5  ;;  %v5413_v29 = vld [vmem:[%s6421_s25 + $0xcc] sm:$0xf] }
 0x10b   : > { %v3944_v18 = vshrl.u32 %v7698_v58, 16  ;;  %v2259_v43 = vshll.u32 %v5184_v55, 16  ;;  %v5474_v37 = vrot.slane %v5458_v33, 9  ;;  %v3895_v9 = vsel %vm6447_vm4, %v7692_v12, %v7631_v42  ;;  %v7774_v55 = vld [vmem:[%s6421_s25 + $0xd0] sm:$0xf] }
 0x10c   : > { %5923 = vmatmul.mubr.msk.bf16.gmra.mrb[12].mxu0 %vm669_vm3, %v7629_v44  ;;  %v4394_v44 = vrot.slane %v8217_v23, 5  ;;  %v2258_v51 = vrot.slane %v2256_v61, 4  ;;  %v3913_v11 = vor.u32 %v7716_v62, %v7706_v21  ;;  %v4401_v47 = vrot.slane %v8221_v28, 5  ;;  %v6287_v21 = vld [vmem:[%s6421_s25 + $0x24] sm:$0xff]   ;;  %v6352_v27 = vld [vmem:[%s6421_s25 + $0xac] sm:$0xf] }
 0x10d   : > { %5769 = vmatmul.mubr.msk.bf16.gmra.mrb[28].mxu1 %vm669_vm3, %v5075_v56  ;;  %5926 = vmatprep.mubr.msk.bf16.mxu0 %vm669_vm3, %v7633_v41  ;;  %v8220_v56 = vld [vmem:[#allocation5_spill] sm:$0xff]  ;;  %v2261_v46 = vrot.slane %v2259_v43, 5  ;;  %v3905_v19 = vsel %vm6447_vm4, %v7714_v8, %v7643_v17  ;;  %v4404_v12 = vrot.slane %v7526_v2, 5  ;;  %v7782_v62 = vrot.slane %v3940_v50, 5  ;;  %v5459_v8 = vld [vmem:[%s6421_s25 + $0x90] sm:$0xe] }
 0x10e   : > { %5774 = vmatprep.mubr.msk.bf16.mxu1 %vm669_vm3, %v6285_v6  ;;  %v2278_v41 = vsel %vm6447_vm4, %v8220_v56, %v8219_v16  ;;  %v7756_v20 = vsel %vm6673_vm7, %v5473_v22, %v4394_v44  ;;  %v4396_v31 = vrot.slane %v4394_v44, 4  ;;  %v3923_v6 = vor.u32 %v7725_v52, %v7723_v4  ;;  %v7788_v52 = vld [vmem:[%s6421_s25 + $0xc8] sm:$0x1]  ;;  %v8223_v16 = vld [vmem:[#allocation2_spill] sm:$0xff] }
 0x10f   : > { %v3946_v22 = vrot.slane %v3944_v18, 4  ;;  %v2262_v17 = vor.u32 %v2261_v46, %v2258_v51  ;;  %v3928_v23 = vrot.slane %v3926_v49, 5  ;;  %v3937_v44 = vor.u32 %v3936_v63, %v3933_v38  ;;  %v8224_v51 = vld [vmem:[#allocation3_spill] sm:$0xff] }
 0x110   : > { %v7778_v42 = vsel %vm6673_vm7, %v4396_v31, %v4397_v30  ;;  %v7792_v59 = vsel %vm6673_vm7, %v5474_v37, %v4401_v47  ;;  %v4403_v30 = vrot.slane %v4401_v47, 4  ;;  %v3955_v2 = vshrl.u32 %v5413_v29, 16 }
 0x111   : > { %v5490_v33 = vcombine.low %v7756_v20, %v7778_v42  ;;  %v3958_v50 = vshll.u32 %v5413_v29, 16  ;;  %v3964_v61 = vshll.u32 %v7774_v55, 16  ;;  %v2263_v18 = vrot.slane %v2262_v17, 4  ;;  %v6288_v29 = vld [vmem:[%s6421_s25 + $0x30] sm:$0xff]  }
 0x112   : > { %v3968_v49 = vshrl.u32 %v7774_v55, 16  ;;  %v7803_v38 = vsel %vm6673_vm7, %v4403_v30, %v4404_v12  ;;  %v5475_v63 = vrot.slane %v5459_v8, 9  ;;  %v3947_v56 = vor.u32 %v3946_v22, %v7782_v62 }
 0x113   : > { %v3950_v31 = vshll.u32 %v7788_v52, 16  ;;  %v5491_v37 = vcombine.low %v7792_v59, %v7803_v38  ;;  %v5429_v46 = vcombine.low %v3895_v9, %v3905_v19  ;;  %v3914_v28 = vrot.slane %v3913_v11, 4  ;;  %v5460_v11 = vld [vmem:[%s6421_s25 + $0x9c] sm:$0xe] }
 0x114   : > { %5927 = vmatmul.mubr.msk.bf16.gmra.mrb[16].mxu0 %vm669_vm3, %v7635_v5  ;;  %v8222_v5 = vld [vmem:[#allocation15_spill] sm:$0xff]  ;;  %v3924_v47 = vrot.slane %v3923_v6, 4  ;;  %v3938_v12 = vrot.slane %v3937_v44, 4  ;;  %v4411_v8 = vrot.slane %v7535_v3, 5  ;;  %v3957_v30 = vrot.slane %v3955_v2, 4  ;;  %v6289_v19 = vld [vmem:[%s6421_s25 + $0x3c] sm:$0xff]  }
 0x115   : > { %5775 = vmatmul.mubr.msk.bf16.vlgmr.msra.gmra.mrb[0].mxu1 %vm669_vm3, %v6286_v1  ;;  %5930 = vmatprep.mubr.msk.bf16.mxu0 %vm669_vm3, %v7637_v7  ;;  %v4408_v43 = vrot.slane %v8222_v5, 5  ;;  %v2268_v7 = vsel %vm6447_vm4, %v2263_v18, %v8224_v51  ;;  %v3960_v18 = vrot.slane %v3958_v50, 5  ;;  %v7826_v5 = vrot.slane %v3964_v61, 5 }
 0x116   : > { %5977 = vmatpush3.bf16.msra.mxu1 %v8223_v16  ;;  %5778 = vmatprep.mubr.msk.bf16.mxu1 %vm669_vm3, %v6287_v21  ;;  %v7815_v1 = vcombine.low %v2268_v7, %v2278_v41  ;;  %v7819_v21 = vld [vmem:[%s6421_s25 + $0xd4] sm:$0x1]  ;;  %v3970_v9 = vrot.slane %v3968_v49, 4  ;;  %v3948_v41 = vrot.slane %v3947_v56, 4  ;;  %v3952_v6 = vrot.slane %v3950_v31, 5 }
 0x117   : > { %v7823_v22 = vsel %vm6673_vm7, %v5475_v63, %v4408_v43  ;;  %v4410_v17 = vrot.slane %v4408_v43, 4  ;;  %v3919_v63 = vsel %vm6447_vm4, %v3914_v28, %v7723_v4  ;;  %v3929_v2 = vsel %vm6447_vm4, %v3924_v47, %v3928_v23  ;;  %v6339_v16 = vld [vmem:[%s6421_s25 + $0x1c] sm:$0xf]  ;;  %v5461_v28 = vld [vmem:[%s6421_s25 + $0xa8] sm:$0xe] }
 0x118   : > { %v3974_v50 = vshll.u32 %v7819_v21, 16  ;;  %v5476_v61 = vrot.slane %v5460_v11, 9  ;;  %v4415_v49 = vrot.slane %v7523_v25, 5  ;;  %v3943_v4 = vsel %vm6447_vm4, %v3938_v12, %v7782_v62  ;;  %v5449_v62 = vld [vmem:[%s6421_s25 + $0x18] sm:$0xe]  ;;  %v6290_v47 = vld [vmem:[%s6421_s25 + $0x48] sm:$0xff]  }
 0x119   : > { %v7832_v44 = vsel %vm6673_vm7, %v4410_v17, %v4411_v8  ;;  %v3971_v43 = vor.u32 %v3970_v9, %v7826_v5  ;;  %v4418_v23 = vrot.slane %v7568_v57, 5  ;;  %v3953_v25 = vsel %vm6447_vm4, %v3948_v41, %v3952_v6  ;;  %v6340_v11 = vld [vmem:[%s6421_s25 + $0x20] sm:$0x1] }
 0x11a   : > { %v5492_v3 = vcombine.low %v7823_v22, %v7832_v44  ;;  %v4338_v56 = vrot.slane %v6339_v16, 5  ;;  %v7858_v31 = vsel %vm6673_vm7, %v5476_v61, %v4415_v49  ;;  %v4417_v51 = vrot.slane %v4415_v49, 4  ;;  %v5462_v49 = vld [vmem:[%s6421_s25 + $0xb4] sm:$0xe] }
 0x11b   : > { %v5430_v7 = vcombine.low %v3919_v63, %v3929_v2  ;;  %v3972_v17 = vrot.slane %v3971_v43, 4  ;;  %v5477_v41 = vrot.slane %v5461_v28, 9  ;;  %v4422_v6 = vrot.slane %v7571_v34, 5  ;;  %v5450_v2 = vld [vmem:[%s6421_s25 + $0x24] sm:$0xe] }
 0x11c   : > { %5931 = vmatmul.mubr.msk.bf16.gmra.mrb[20].mxu0 %vm669_vm3, %v7670_v24  ;;  %v3961_v24 = vor.u32 %v3960_v18, %v3957_v30  ;;  %v7863_v57 = vsel %vm6673_vm7, %v4417_v51, %v4418_v23  ;;  %v6291_v30 = vld [vmem:[%s6421_s25 + $0x54] sm:$0xff]   ;;  %v5465_v18 = vrot.slane %v5449_v62, 9  ;;  %v4340_v9 = vrot.slane %v4338_v56, 4  ;;  %v6343_v28 = vld [vmem:[%s6421_s25 + $0x2c] sm:$0x1] }
 0x11d   : > { %5779 = vmatmul.mubr.msk.bf16.gmra.mrb[4].mxu1 %vm669_vm3, %v6288_v29  ;;  %5934 = vmatprep.mubr.msk.bf16.mxu0 %vm669_vm3, %v5429_v46  ;;  %v3976_v46 = vrot.slane %v3974_v50, 5  ;;  %v5431_v29 = vcombine.low %v3943_v4, %v3953_v25  ;;  %v5493_v8 = vcombine.low %v7858_v31, %v7863_v57  ;;  %v4425_v63 = vrot.slane %v7581_v48, 5  ;;  %v6341_v50 = vld [vmem:[%s6421_s25 + $0x28] sm:$0xf]  ;;  %v5451_v25 = vld [vmem:[%s6421_s25 + $0x30] sm:$0xe] }
 0x11e   : > { %5782 = vmatprep.mubr.msk.bf16.mxu1 %vm669_vm3, %v6289_v19  ;;  %v3962_v12 = vrot.slane %v3961_v24, 4  ;;  %v4341_v19 = vrot.slane %v6340_v11, 5  ;;  %v4345_v61 = vrot.slane %v6341_v50, 5  ;;  %v7886_v48 = vsel %vm6673_vm7, %v5477_v41, %v4422_v6  ;;  %v6293_v11 = vld [vmem:[%s6421_s25 + $0x6c] sm:$0xff]   ;;  %v8225_v41 = vld [vmem:[#allocation6_spill] sm:$0xff] }
 0x11f   : > { %v3977_v34 = vsel %vm6447_vm4, %v3972_v17, %v3976_v46  ;;  %v4424_v24 = vrot.slane %v4422_v6, 4  ;;  %v4339_v43 = vsel %vm6673_vm7, %v5465_v18, %v4338_v56  ;;  %v5466_v51 = vrot.slane %v5450_v2, 9  ;;  %v5463_v50 = vld [vmem:[%s6421_s25 + $0xc0] sm:$0xe]  ;;  %v6357_v31 = vld [vmem:[%s6421_s25 + $0xc8] sm:$0x1] }
 0x120   : > { %v3967_v4 = vsel %vm6447_vm4, %v3962_v12, %v7826_v5  ;;  %v4342_v23 = vsel %vm6673_vm7, %v4340_v9, %v4341_v19  ;;  %v6342_v5 = vld [vmem:[%s6421_s25 + $0x34] sm:$0xf]  ;;  %v6292_v12 = vld [vmem:[%s6421_s25 + $0x60] sm:$0xff]   ;;  %v5467_v18 = vrot.slane %v5451_v25, 9  ;;  %v4432_v9 = vrot.slane %v7695_v35, 5 }
 0x121   : > { %v4352_v16 = vrot.slane %v6342_v5, 5  ;;  %v7897_v62 = vsel %vm6673_vm7, %v4424_v24, %v4425_v63  ;;  %v5432_v46 = vcombine.low %v3967_v4, %v3977_v34  ;;  %v5482_v17 = vcombine.low %v4339_v43, %v4342_v23  ;;  %v5452_v24 = vld [vmem:[%s6421_s25 + $0x3c] sm:$0xe] }
 0x122   : > { %v5494_v56 = vcombine.low %v7886_v48, %v7897_v62  ;;  %v4355_v6 = vrot.slane %v8225_v41, 5  ;;  %v4346_v35 = vsel %vm6673_vm7, %v5466_v51, %v4345_v61  ;;  %v5479_v5 = vrot.slane %v5463_v50, 9 }
 0x123   : > { %v4354_v19 = vrot.slane %v4352_v16, 4  ;;  %v4353_v23 = vsel %vm6673_vm7, %v5467_v18, %v4352_v16  ;;  %v4439_v51 = vrot.slane %v7788_v52, 5  ;;  %v2419_v57 = vshll.u32 %v6357_v31, 16 }
 0x124   : > { %5935 = vmatmul.mubr.msk.bf16.gmra.mrb[24].mxu0 %vm669_vm3, %v5430_v7  ;;  %v5478_v7 = vrot.slane %v5462_v49, 9 }
 0x125   : > { %5783 = vmatmul.mubr.msk.bf16.gmra.mrb[8].mxu1 %vm669_vm3, %v6290_v47  ;;  %5938 = vmatprep.mubr.msk.bf16.mxu0 %vm669_vm3, %v5431_v29  ;;  %v4348_v47 = vrot.slane %v6343_v28, 5  ;;  %v4429_v29 = vrot.slane %v7646_v39, 5  ;;  %v8226_v39 = vld [vmem:[#allocation7_spill] sm:$0xff]  ;;  %v4356_v25 = vsel %vm6673_vm7, %v4354_v19, %v4355_v6  ;;  %v5468_v28 = vrot.slane %v5452_v24, 9 }
 0x126   : > { %5786 = vmatprep.mubr.msk.bf16.mxu1 %vm669_vm3, %v6291_v30  ;;  %v4347_v30 = vrot.slane %v4345_v61, 4  ;;  %v4359_v49 = vrot.slane %v8226_v39, 5  ;;  %v4436_v61 = vrot.slane %v7698_v58, 5  ;;  %v6344_v39 = vld [vmem:[%s6421_s25 + $0x70] sm:$0xf]  ;;  %v4443_v24 = vrot.slane %v7774_v55, 5 }
 0x127   : > { %v7909_v63 = vsel %vm6673_vm7, %v5478_v7, %v4429_v29  ;;  %v4431_v2 = vrot.slane %v4429_v29, 4  ;;  %v5181_v7 = vld [vmem:[%s6421_s25 + $0x6c] sm:$0xf]  ;;  %v8227_v29 = vld [vmem:[#allocation8_spill] sm:$0xff] }
 0x128   : > { %v4349_v34 = vsel %vm6673_vm7, %v4347_v30, %v4348_v47  ;;  %v4361_v47 = vrot.slane %v4359_v49, 4  ;;  %v6294_v30 = vld [vmem:[%s6421_s25 + $0x78] sm:$0xff]   ;;  %v7940_v16 = vsel %vm6673_vm7, %v5479_v5, %v4436_v61  ;;  %v4438_v18 = vrot.slane %v4436_v61, 4 }
 0x129   : > { %v7916_v4 = vsel %vm6673_vm7, %v4431_v2, %v4432_v9  ;;  %v5484_v9 = vcombine.low %v4353_v23, %v4356_v25  ;;  %v2232_v19 = vshrl.u32 %v5181_v7, 16  ;;  %v2235_v41 = vshll.u32 %v5181_v7, 16 }
 0x12a   : > { %v5495_v43 = vcombine.low %v7909_v63, %v7916_v4  ;;  %v7945_v58 = vsel %vm6673_vm7, %v4438_v18, %v4439_v51  ;;  %v4360_v6 = vsel %vm6673_vm7, %v5468_v28, %v4359_v49  ;;  %v4446_v49 = vrot.slane %v7819_v21, 5  ;;  %v6296_v51 = vld [vmem:[%s6421_s25 + $0x90] sm:$0xff]   ;;  %v6297_v21 = vld [vmem:[%s6421_s25 + $0x9c] sm:$0xff]  }
 0x12b   : > { %v5496_v50 = vcombine.low %v7940_v16, %v7945_v58  ;;  %v2234_v23 = vrot.slane %v2232_v19, 4  ;;  %v2237_v25 = vrot.slane %v2235_v41, 5  ;;  %v4445_v7 = vrot.slane %v4443_v24, 4 }
 0x12c   : > { %5939 = vmatmul.mubr.msk.bf16.gmra.mrb[28].mxu0 %vm669_vm3, %v5432_v46  ;;  %v5483_v46 = vcombine.low %v4346_v35, %v4349_v34  ;;  %v2241_v35 = vshll.u32 %v6344_v39, 16  ;;  %v2245_v34 = vshrl.u32 %v6344_v39, 16 }
 0x12d   : > { %5787 = vmatmul.mubr.msk.bf16.gmra.mrb[12].mxu1 %vm669_vm3, %v6292_v12  ;;  %5944 = vmatprep.mubr.msk.bf16.mxu0 %vm669_vm3, %v5482_v17  ;;  %v4362_v12 = vrot.slane %v8227_v29, 5  ;;  %v5464_v17 = vld [vmem:[%s6421_s25 + $0xcc] sm:$0xe]  ;;  %v7967_v55 = vsel %vm6673_vm7, %v4445_v7, %v4446_v49 }
 0x12e   : > { %5790 = vmatprep.mubr.msk.bf16.mxu1 %vm669_vm3, %v6293_v11  ;;  %v6295_v11 = vld [vmem:[%s6421_s25 + $0x84] sm:$0xff]   ;;  %v5480_v52 = vrot.slane %v5464_v17, 9  ;;  %v2247_v28 = vrot.slane %v2245_v34, 4  ;;  %v6345_v17 = vld [vmem:[%s6421_s25 + $0x74] sm:$0x1] }
 0x12f   : > { %v4363_v2 = vsel %vm6673_vm7, %v4361_v47, %v4362_v12  ;;  %v5187_v47 = vld [vmem:[%s6421_s25 + $0x84] sm:$0xf]  ;;  %v2238_v12 = vor.u32 %v2237_v25, %v2234_v23  ;;  %v6299_v34 = vld [vmem:[%s6421_s25 + $0xb4] sm:$0xff]  }
 0x130   : > { %v7962_v5 = vsel %vm6673_vm7, %v5480_v52, %v4443_v24  ;;  %v5485_v61 = vcombine.low %v4360_v6, %v4363_v2  ;;  %v2283_v18 = vshll.u32 %v5187_v47, 16  ;;  %v5190_v6 = vld [vmem:[%s6421_s25 + $0x90] sm:$0xf]  ;;  %v6298_v2 = vld [vmem:[%s6421_s25 + $0xa8] sm:$0xff]  }
 0x131   : > { %v5497_v29 = vcombine.low %v7962_v5, %v7967_v55  ;;  %v2239_v52 = vrot.slane %v2238_v12, 4  ;;  %v2304_v23 = vshrl.u32 %v5190_v6, 16  ;;  %v2307_v25 = vshll.u32 %v5190_v6, 16 }
 0x132   : > { %v2337_v12 = vshll.u32 %v6348_v60, 16 }
 0x133   : > { %v2309_v14 = vrot.slane %v2307_v25, 5  ;;  %v6351_v25 = vld [vmem:[%s6421_s25 + $0xa4] sm:$0x1] }
 0x134   : > { %5945 = vmatmul.mubr.msk.bf16.vlgmr.msra.gmra.mrb[0].mxu0 %vm669_vm3, %v5483_v46  ;;  %v2243_v46 = vrot.slane %v2241_v35, 5  ;;  %v5193_v35 = vld [vmem:[%s6421_s25 + $0x9c] sm:$0xf]  ;;  %v8009_v6 = vrot.slane %v2337_v12, 5 }
 0x135   : > { %5791 = vmatmul.mubr.msk.bf16.gmra.mrb[16].mxu1 %vm669_vm3, %v6294_v30  ;;  %5948 = vmatprep.mubr.msk.bf16.mxu0 %vm669_vm3, %v5484_v9  ;;  %v2251_v30 = vshll.u32 %v6345_v17, 16  ;;  %v2280_v9 = vshrl.u32 %v5187_v47, 16  ;;  %v2331_v47 = vshll.u32 %v5193_v35, 16  ;;  %v6349_v17 = vld [vmem:[%s6421_s25 + $0x8c] sm:$0x1] }
 0x136   : > { %5794 = vmatprep.mubr.msk.bf16.mxu1 %vm669_vm3, %v6295_v11  ;;  %v2248_v13 = vor.u32 %v2247_v28, %v2243_v46  ;;  %v6346_v11 = vld [vmem:[%s6421_s25 + $0x88] sm:$0xf]  ;;  %v2244_v7 = vsel %vm6447_vm4, %v2239_v52, %v2243_v46 }
 0x137   : > { %v2289_v19 = vshll.u32 %v6346_v11, 16  ;;  %v2293_v41 = vshrl.u32 %v6346_v11, 16  ;;  %v2253_v0 = vrot.slane %v2251_v30, 5  ;;  %v2282_v36 = vrot.slane %v2280_v9, 4 }
 0x138   : > { %v2249_v39 = vrot.slane %v2248_v13, 4  ;;  %v2299_v30 = vshll.u32 %v6349_v17, 16  ;;  %v2306_v9 = vrot.slane %v2304_v23, 4  ;;  %v2333_v11 = vrot.slane %v2331_v47, 5 }
 0x139   : > { %v7986_v24 = vrot.slane %v2289_v19, 5  ;;  %v2295_v49 = vrot.slane %v2293_v41, 4  ;;  %v6300_v19 = vld [vmem:[%s6421_s25 + $0xc0] sm:$0xff]  }
 0x13a   : > { %v2254_v46 = vsel %vm6447_vm4, %v2249_v39, %v2253_v0  ;;  %v5196_v39 = vld [vmem:[%s6421_s25 + $0xa8] sm:$0xf] }
 0x13b   : > { %v2296_v13 = vor.u32 %v2295_v49, %v7986_v24  ;;  %v5214_v41 = vcombine.low %v2244_v7, %v2254_v46  ;;  %v2347_v7 = vshll.u32 %v6351_v25, 16  ;;  %v2355_v45 = vshll.u32 %v5196_v39, 16 }
 0x13c   : > { %5949 = vmatmul.mubr.msk.bf16.gmra.mrb[4].mxu0 %vm669_vm3, %v5485_v61  ;;  %v6347_v61 = vld [vmem:[%s6421_s25 + $0x94] sm:$0xf] }
 0x13d   : > { %5795 = vmatmul.mubr.msk.bf16.gmra.mrb[20].mxu1 %vm669_vm3, %v6296_v51  ;;  %5952 = vmatprep.mubr.msk.bf16.mxu0 %vm669_vm3, %v5486_v10  ;;  %v2285_v10 = vrot.slane %v2283_v18, 5  ;;  %v2313_v51 = vshll.u32 %v6347_v61, 16  ;;  %v2317_v28 = vshrl.u32 %v6347_v61, 16  ;;  %v2297_v0 = vrot.slane %v2296_v13, 4 }
 0x13e   : > { %5798 = vmatprep.mubr.msk.bf16.mxu1 %vm669_vm3, %v6297_v21  ;;  %v2328_v21 = vshrl.u32 %v5193_v35, 16  ;;  %v6350_v35 = vld [vmem:[%s6421_s25 + $0x98] sm:$0x1]  ;;  %v2352_v61 = vshrl.u32 %v5196_v39, 16  ;;  %v5202_v39 = vld [vmem:[%s6421_s25 + $0xc0] sm:$0xf] }
 0x13f   : > { %v2286_v15 = vor.u32 %v2285_v10, %v2282_v36  ;;  %v8006_v26 = vrot.slane %v2313_v51, 5  ;;  %v2301_v36 = vrot.slane %v2299_v30, 5  ;;  %v2310_v10 = vor.u32 %v2309_v14, %v2306_v9  ;;  %v5199_v51 = vld [vmem:[%s6421_s25 + $0xb4] sm:$0xf] }
 0x140   : > { %v2330_v18 = vrot.slane %v2328_v21, 4  ;;  %v2365_v21 = vshrl.u32 %v6352_v27, 16  ;;  %v2376_v20 = vshrl.u32 %v5199_v51, 16  ;;  %v2379_v42 = vshll.u32 %v5199_v51, 16 }
 0x141   : > { %v2287_v52 = vrot.slane %v2286_v15, 4  ;;  %v2302_v46 = vsel %vm6447_vm4, %v2297_v0, %v2301_v36  ;;  %v2311_v15 = vrot.slane %v2310_v10, 4  ;;  %v2349_v30 = vrot.slane %v2347_v7, 5 }
 0x142   : > { %v2334_v23 = vor.u32 %v2333_v11, %v2330_v18  ;;  %v2354_v9 = vrot.slane %v2352_v61, 4  ;;  %v2367_v11 = vrot.slane %v2365_v21, 4  ;;  %v6356_v61 = vld [vmem:[%s6421_s25 + $0xbc] sm:$0x1] }
 0x143   : > { %v2292_v47 = vsel %vm6447_vm4, %v2287_v52, %v7986_v24  ;;  %v2316_v0 = vsel %vm6447_vm4, %v2311_v15, %v8006_v26  ;;  %v2395_v22 = vshll.u32 %v6356_v61, 16 }
 0x144   : > { %5953 = vmatmul.mubr.msk.bf16.gmra.mrb[8].mxu0 %vm669_vm3, %v5487_v40  ;;  %v2341_v40 = vshrl.u32 %v6348_v60, 16  ;;  %v2335_v17 = vrot.slane %v2334_v23, 4  ;;  %v5216_v24 = vcombine.low %v2292_v47, %v2302_v46 }
 0x145   : > { %5799 = vmatmul.mubr.msk.bf16.gmra.mrb[24].mxu1 %vm669_vm3, %v6298_v2  ;;  %5956 = vmatprep.mubr.msk.bf16.mxu0 %vm669_vm3, %v5488_v54  ;;  %v2319_v54 = vrot.slane %v2317_v28, 4 }
 0x146   : > { %5802 = vmatprep.mubr.msk.bf16.mxu1 %vm669_vm3, %v6299_v34  ;;  %v2343_v2 = vrot.slane %v2341_v40, 4  ;;  %v2323_v34 = vshll.u32 %v6350_v35, 16  ;;  %v2340_v10 = vsel %vm6447_vm4, %v2335_v17, %v8009_v6  ;;  %v2421_v17 = vrot.slane %v2419_v57, 5 }
 0x147   : > { %v2320_v49 = vor.u32 %v2319_v54, %v8006_v26  ;;  %v2357_v54 = vrot.slane %v2355_v45, 5  ;;  %v6354_v26 = vld [vmem:[%s6421_s25 + $0xb0] sm:$0x1] }
 0x148   : > { %v2344_v28 = vor.u32 %v2343_v2, %v8009_v6  ;;  %v2325_v60 = vrot.slane %v2323_v34, 5  ;;  %v2371_v35 = vshll.u32 %v6354_v26, 16  ;;  %v2400_v34 = vshrl.u32 %v5202_v39, 16 }
 0x149   : > { %v2321_v13 = vrot.slane %v2320_v49, 4  ;;  %v2358_v38 = vor.u32 %v2357_v54, %v2354_v9  ;;  %v2403_v6 = vshll.u32 %v5202_v39, 16  ;;  %v6355_v49 = vld [vmem:[%s6421_s25 + $0xc4] sm:$0xf] }
 0x14a   : > { %v2345_v14 = vrot.slane %v2344_v28, 4  ;;  %v2409_v23 = vshll.u32 %v6355_v49, 16  ;;  %v2413_v25 = vshrl.u32 %v6355_v49, 16  ;;  %v2373_v45 = vrot.slane %v2371_v35, 5 }
 0x14b   : > { %v2326_v36 = vsel %vm6447_vm4, %v2321_v13, %v2325_v60  ;;  %v2359_v51 = vrot.slane %v2358_v38, 4  ;;  %v2397_v60 = vrot.slane %v2395_v22, 5 }
 0x14c   : > { %5957 = vmatmul.mubr.msk.bf16.gmra.mrb[12].mxu0 %vm669_vm3, %v5489_v53  ;;  %v2361_v53 = vshll.u32 %v6352_v27, 16  ;;  %v2350_v59 = vsel %vm6447_vm4, %v2345_v14, %v2349_v30  ;;  %v5217_v44 = vcombine.low %v2316_v0, %v2326_v36  ;;  %v2402_v27 = vrot.slane %v2400_v34, 4 }
 0x14d   : > { %5803 = vmatmul.mubr.msk.bf16.gmra.mrb[28].mxu1 %vm669_vm3, %v6300_v19  ;;  %5960 = vmatprep.mubr.msk.bf16.mxu0 %vm669_vm3, %v5490_v33  ;;  %v6353_v33 = vld [vmem:[%s6421_s25 + $0xb8] sm:$0xf]  ;;  %v2378_v19 = vrot.slane %v2376_v20, 4  ;;  %v2411_v21 = vrot.slane %v2409_v23, 5  ;;  %v2415_v47 = vrot.slane %v2413_v25, 4 }
 0x14e   : > { %5824 = vmatprep.mubr.msk.bf16.mxu1 %vm669_vm3, %v5214_v41  ;;  %v2385_v12 = vshll.u32 %v6353_v33, 16  ;;  %v2389_v40 = vshrl.u32 %v6353_v33, 16  ;;  %v2363_v18 = vrot.slane %v2361_v53, 5  ;;  %v2381_v41 = vrot.slane %v2379_v42, 5 }
 0x14f   : > { %v2405_v53 = vrot.slane %v2403_v6, 5 }
 0x150   : > { %v2387_v52 = vrot.slane %v2385_v12, 5  ;;  %v2391_v2 = vrot.slane %v2389_v40, 4  ;;  %v2364_v20 = vsel %vm6447_vm4, %v2359_v51, %v2363_v18  ;;  %v2416_v12 = vor.u32 %v2415_v47, %v2411_v21 }
 0x151   : > { %v2406_v33 = vor.u32 %v2405_v53, %v2402_v27 }
 0x152   : > { %v2392_v7 = vor.u32 %v2391_v2, %v2387_v52  ;;  %v2417_v13 = vrot.slane %v2416_v12, 4 }
 0x153   : > { %v2407_v40 = vrot.slane %v2406_v33, 4 }
 0x154   : > { %5961 = vmatmul.mubr.msk.bf16.gmra.mrb[16].mxu0 %vm669_vm3, %v5491_v37  ;;  %v2368_v37 = vor.u32 %v2367_v11, %v2363_v18  ;;  %v2393_v15 = vrot.slane %v2392_v7, 4  ;;  %v2422_v9 = vsel %vm6447_vm4, %v2417_v13, %v2421_v17 }
 0x155   : > { %5825 = vmatmul.mubr.msk.bf16.vlgmr.msra.gmra.mrb[16].mxu1 %vm669_vm3, %v7815_v1  ;;  %5964 = vmatprep.mubr.msk.bf16.mxu0 %vm669_vm3, %v5492_v3  ;;  %v2382_v1 = vor.u32 %v2381_v41, %v2378_v19  ;;  %v5218_v3 = vcombine.low %v2340_v10, %v2350_v59  ;;  %v2412_v30 = vsel %vm6447_vm4, %v2407_v40, %v2411_v21 }
 0x156   : > { %5828 = vmatprep.mubr.msk.bf16.mxu1 %vm669_vm3, %v5216_v24  ;;  %v2369_v28 = vrot.slane %v2368_v37, 4  ;;  %v2398_v48 = vsel %vm6447_vm4, %v2393_v15, %v2397_v60  ;;  %v5221_v14 = vcombine.low %v2412_v30, %v2422_v9 }
 0x157   : > { %v2383_v46 = vrot.slane %v2382_v1, 4 }
 0x158   : > { %v2374_v42 = vsel %vm6447_vm4, %v2369_v28, %v2373_v45 }
 0x159   : > { %v5219_v62 = vcombine.low %v2364_v20, %v2374_v42 }
 0x15c   : > { %5965 = vmatmul.mubr.msk.bf16.gmra.mrb[20].mxu0 %vm669_vm3, %v5493_v8  ;;  %v2388_v8 = vsel %vm6447_vm4, %v2383_v46, %v2387_v52 }
 0x15d   : > { %5829 = vmatmul.mubr.msk.bf16.gmra.mrb[20].mxu1 %vm669_vm3, %v5217_v44  ;;  %5968 = vmatprep.mubr.msk.bf16.mxu0 %vm669_vm3, %v5494_v56  ;;  %v5220_v56 = vcombine.low %v2388_v8, %v2398_v48 }
 0x15e   : > { %5832 = vmatprep.mubr.msk.bf16.mxu1 %vm669_vm3, %v5218_v3 }
 0x164   : > { %5969 = vmatmul.mubr.msk.bf16.gmra.mrb[24].mxu0 %vm669_vm3, %v5495_v43 }
 0x165   : > { %5833 = vmatmul.mubr.msk.bf16.gmra.mrb[24].mxu1 %vm669_vm3, %v5219_v62  ;;  %5972 = vmatprep.mubr.msk.bf16.mxu0 %vm669_vm3, %v5496_v50 }
 0x166   : > { %5836 = vmatprep.mubr.msk.bf16.mxu1 %vm669_vm3, %v5220_v56 }
 0x16c   : > { %5973 = vmatmul.mubr.msk.bf16.gmra.mrb[28].mxu0 %vm669_vm3, %v5497_v29 }
 0x16d   : > { %5837 = vmatmul.mubr.msk.bf16.gmra.mrb[28].mxu1 %vm669_vm3, %v5221_v14 }
 0x1e8   : > { %v5776_v63 = vpop.f32.mrb[0].mxu1 }
 0x1e9   : > { %v1832_v4 = vpop.f32.mrb[1].mxu1 }
 0x1ea   : > { %v5777_v43 = vpop.f32.mrb[2].mxu1 }
 0x1eb   : > { %v1835_v16 = vpop.f32.mrb[3].mxu1 }
 0x1f0   : > { %v5780_v58 = vpop.f32.mrb[4].mxu1 }
 0x1f1   : > { %v1848_v50 = vpop.f32.mrb[5].mxu1 }
 0x1f2   : > { %v5781_v54 = vpop.f32.mrb[6].mxu1 }
 0x1f3   : > { %v1851_v18 = vpop.f32.mrb[7].mxu1 }
 0x1f8   : > { %v5784_v11 = vpop.f32.mrb[8].mxu1 }
 0x1f9   : > { %v1864_v32 = vpop.f32.mrb[9].mxu1 }
 0x1fa   : > { %v5785_v24 = vpop.f32.mrb[10].mxu1 }
 0x1fb   : > { %v8097_v19 = vpop.f32.mrb[11].mxu1 }
 0x200   : > { %v8099_v41 = vpop.f32.mrb[12].mxu1 }
 0x201   : > { %v8101_v5 = vpop.f32.mrb[13].mxu1 }
 0x202   : > { %v8103_v55 = vpop.f32.mrb[14].mxu1 }
 0x203   : > { %v8105_v29 = vpop.f32.mrb[15].mxu1 }
 0x207   : > { %v5946_v52 = vpop.f32.mrb[0].mxu0 }
 0x208   : > { %v5978_v2 = vadd.f32 %v5946_v52, %v5776_v63  ;;  %v4583_v39 = vpop.f32.mrb[1].mxu0 }
 0x209   : > { %v5979_v0 = vadd.f32 %v4583_v39, %v1832_v4  ;;  %v5947_v36 = vpop.f32.mrb[2].mxu0 }
 0x20a   : > { %4744 = vst [vmem:[%s8111_s18 + $0x10] sm:$0xff] %v5978_v2  ;;  %v5980_v10 = vadd.f32 %v5947_v36, %v5777_v43  ;;  %v4586_v59 = vpop.f32.mrb[3].mxu0  ;;  %v4813_v34 = vmul.f32 %v5978_v2, %v5978_v2 }
 0x20b   : > { %4742 = vst [vmem:[%s8111_s18] sm:$0xff] %v5979_v0  ;;  %v5981_v38 = vadd.f32 %v4586_v59, %v1835_v16  ;;  %v4811_v37 = vmul.f32 %v5979_v0, %v5979_v0 }
 0x20c   : > { %4745 = vst [vmem:[%s8111_s18 + $0x18] sm:$0xff] %v5980_v10  ;;  %v4814_v7 = vmul.f32 %v5980_v10, %v5980_v10 }
 0x20d   : > { %4743 = vst [vmem:[%s8111_s18 + $0x8] sm:$0xff] %v5981_v38  ;;  %v4774_v26 = vadd.f32 %v5981_v38, %v5979_v0  ;;  %v4812_v35 = vmul.f32 %v5981_v38, %v5981_v38 }
 0x20f   : > { %v4775_v6 = vadd.f32 %v5978_v2, %v4774_v26  ;;  %v4843_v49 = vadd.f32 %v4812_v35, %v4811_v37  ;;  %v5950_v23 = vpop.f32.mrb[4].mxu0 }
 0x210   : > { %v5982_v25 = vadd.f32 %v5950_v23, %v5780_v58  ;;  %v4599_v1 = vpop.f32.mrb[5].mxu0 }
 0x211   : > { %v4844_v61 = vadd.f32 %v4843_v49, %v4813_v34  ;;  %v5983_v22 = vadd.f32 %v4599_v1, %v1848_v50  ;;  %v4776_v44 = vadd.f32 %v5980_v10, %v4775_v6  ;;  %v5951_v3 = vpop.f32.mrb[6].mxu0 }
 0x212   : > { %4748 = vst [vmem:[%s8111_s18 + $0x30] sm:$0xff] %v5982_v25  ;;  %v5984_v51 = vadd.f32 %v5951_v3, %v5781_v54  ;;  %v4602_v28 = vpop.f32.mrb[7].mxu0  ;;  %v4817_v60 = vmul.f32 %v5982_v25, %v5982_v25 }
 0x213   : > { %4746 = vst [vmem:[%s8111_s18 + $0x20] sm:$0xff] %v5983_v22  ;;  %v4777_v45 = vadd.f32 %v5983_v22, %v4776_v44  ;;  %v4815_v27 = vmul.f32 %v5983_v22, %v5983_v22  ;;  %v4845_v53 = vadd.f32 %v4844_v61, %v4814_v7  ;;  %v5985_v21 = vadd.f32 %v4602_v28, %v1851_v18 }
 0x214   : > { %4749 = vst [vmem:[%s8111_s18 + $0x38] sm:$0xff] %v5984_v51  ;;  %v4818_v57 = vmul.f32 %v5984_v51, %v5984_v51 }
 0x215   : > { %v4846_v47 = vadd.f32 %v4845_v53, %v4815_v27  ;;  %4747 = vst [vmem:[%s8111_s18 + $0x28] sm:$0xff] %v5985_v21  ;;  %v4778_v46 = vadd.f32 %v5985_v21, %v4777_v45  ;;  %v4816_v15 = vmul.f32 %v5985_v21, %v5985_v21 }
 0x217   : > { %v4779_v20 = vadd.f32 %v5982_v25, %v4778_v46  ;;  %v4847_v42 = vadd.f32 %v4846_v47, %v4816_v15  ;;  %v5954_v33 = vpop.f32.mrb[8].mxu0 }
 0x218   : > { %v5986_v12 = vadd.f32 %v5954_v33, %v5784_v11  ;;  %v4615_v31 = vpop.f32.mrb[9].mxu0 }
 0x219   : > { %v4848_v8 = vadd.f32 %v4847_v42, %v4817_v60  ;;  %v5987_v48 = vadd.f32 %v4615_v31, %v1864_v32  ;;  %v4780_v62 = vadd.f32 %v5984_v51, %v4779_v20  ;;  %v5955_v56 = vpop.f32.mrb[10].mxu0 }
 0x21a   : > { %4752 = vst [vmem:[%s8111_s18 + $0x50] sm:$0xff] %v5986_v12  ;;  %v5988_v40 = vadd.f32 %v5955_v56, %v5785_v24  ;;  %v4618_v13 = vpop.f32.mrb[11].mxu0  ;;  %v4821_v16 = vmul.f32 %v5986_v12, %v5986_v12 }
 0x21b   : > { %4750 = vst [vmem:[%s8111_s18 + $0x40] sm:$0xff] %v5987_v48  ;;  %v4781_v17 = vadd.f32 %v5987_v48, %v4780_v62  ;;  %v4819_v30 = vmul.f32 %v5987_v48, %v5987_v48  ;;  %v4849_v9 = vadd.f32 %v4848_v8, %v4818_v57  ;;  %v5989_v14 = vadd.f32 %v4618_v13, %v8097_v19 }
 0x21c   : > { %4753 = vst [vmem:[%s8111_s18 + $0x58] sm:$0xff] %v5988_v40  ;;  %v4822_v32 = vmul.f32 %v5988_v40, %v5988_v40 }
 0x21d   : > { %v4850_v63 = vadd.f32 %v4849_v9, %v4819_v30  ;;  %4751 = vst [vmem:[%s8111_s18 + $0x48] sm:$0xff] %v5989_v14  ;;  %v4782_v4 = vadd.f32 %v5989_v14, %v4781_v17  ;;  %v4820_v43 = vmul.f32 %v5989_v14, %v5989_v14 }
 0x21f   : > { %v4783_v58 = vadd.f32 %v5986_v12, %v4782_v4  ;;  %v4851_v50 = vadd.f32 %v4850_v63, %v4820_v43  ;;  %v5958_v54 = vpop.f32.mrb[12].mxu0 }
 0x220   : > { %v5990_v18 = vadd.f32 %v5958_v54, %v8099_v41  ;;  %v4631_v11 = vpop.f32.mrb[13].mxu0 }
 0x221   : > { %v4852_v24 = vadd.f32 %v4851_v50, %v4821_v16  ;;  %v5991_v19 = vadd.f32 %v4631_v11, %v8101_v5  ;;  %v4784_v52 = vadd.f32 %v5988_v40, %v4783_v58  ;;  %v5959_v2 = vpop.f32.mrb[14].mxu0 }
 0x222   : > { %4756 = vst [vmem:[%s8111_s18 + $0x70] sm:$0xff] %v5990_v18  ;;  %v5992_v39 = vadd.f32 %v5959_v2, %v8103_v55  ;;  %v4634_v0 = vpop.f32.mrb[15].mxu0  ;;  %v4825_v35 = vmul.f32 %v5990_v18, %v5990_v18 }
 0x223   : > { %4754 = vst [vmem:[%s8111_s18 + $0x60] sm:$0xff] %v5991_v19  ;;  %v4785_v36 = vadd.f32 %v5991_v19, %v4784_v52  ;;  %v4823_v10 = vmul.f32 %v5991_v19, %v5991_v19  ;;  %v4853_v59 = vadd.f32 %v4852_v24, %v4822_v32  ;;  %v5993_v38 = vadd.f32 %v4634_v0, %v8105_v29 }
 0x224   : > { %4757 = vst [vmem:[%s8111_s18 + $0x78] sm:$0xff] %v5992_v39  ;;  %v4826_v23 = vmul.f32 %v5992_v39, %v5992_v39 }
 0x225   : > { %v4854_v41 = vadd.f32 %v4853_v59, %v4823_v10  ;;  %4755 = vst [vmem:[%s8111_s18 + $0x68] sm:$0xff] %v5993_v38  ;;  %v4786_v37 = vadd.f32 %v5993_v38, %v4785_v36  ;;  %v4824_v26 = vmul.f32 %v5993_v38, %v5993_v38 }
 0x227   : > { %v4787_v5 = vadd.f32 %v5990_v18, %v4786_v37  ;;  %v4855_v34 = vadd.f32 %v4854_v41, %v4824_v26  ;;  %v5962_v6 = vpop.f32.mrb[16].mxu0 }
 0x228   : > { %v5826_v49 = vpop.f32.mrb[16].mxu1  ;;  %v4647_v55 = vpop.f32.mrb[17].mxu0 }
 0x229   : > { %v4856_v25 = vadd.f32 %v4855_v34, %v4825_v35  ;;  %v5994_v1 = vadd.f32 %v5962_v6, %v5826_v49  ;;  %v2622_v7 = vpop.f32.mrb[17].mxu1  ;;  %v4788_v29 = vadd.f32 %v5992_v39, %v4787_v5  ;;  %v5963_v61 = vpop.f32.mrb[18].mxu0 }
 0x22a   : > { %v5995_v22 = vadd.f32 %v4647_v55, %v2622_v7  ;;  %v5827_v44 = vpop.f32.mrb[18].mxu1  ;;  %v4650_v3 = vpop.f32.mrb[19].mxu0 }
 0x22b   : > { %4760 = vst [vmem:[%s8111_s18 + $0x90] sm:$0xff] %v5994_v1  ;;  %v4857_v51 = vadd.f32 %v4856_v25, %v4826_v23  ;;  %v5996_v28 = vadd.f32 %v5963_v61, %v5827_v44  ;;  %v2625_v45 = vpop.f32.mrb[19].mxu1  ;;  %v4829_v20 = vmul.f32 %v5994_v1, %v5994_v1 }
 0x22c   : > { %4758 = vst [vmem:[%s8111_s18 + $0x80] sm:$0xff] %v5995_v22  ;;  %v4789_v27 = vadd.f32 %v5995_v22, %v4788_v29  ;;  %v4827_v53 = vmul.f32 %v5995_v22, %v5995_v22  ;;  %v5997_v21 = vadd.f32 %v4650_v3, %v2625_v45 }
 0x22d   : > { %4761 = vst [vmem:[%s8111_s18 + $0x98] sm:$0xff] %v5996_v28  ;;  %v4830_v62 = vmul.f32 %v5996_v28, %v5996_v28 }
 0x22e   : > { %v4858_v47 = vadd.f32 %v4857_v51, %v4827_v53  ;;  %4759 = vst [vmem:[%s8111_s18 + $0x88] sm:$0xff] %v5997_v21  ;;  %v4790_v46 = vadd.f32 %v5997_v21, %v4789_v27  ;;  %v4828_v15 = vmul.f32 %v5997_v21, %v5997_v21 }
 0x22f   : > { %v5966_v60 = vpop.f32.mrb[20].mxu0 }
 0x230   : > { %v4791_v42 = vadd.f32 %v5994_v1, %v4790_v46  ;;  %v4859_v33 = vadd.f32 %v4858_v47, %v4828_v15  ;;  %v5830_v12 = vpop.f32.mrb[20].mxu1  ;;  %v4663_v31 = vpop.f32.mrb[21].mxu0 }
 0x231   : > { %v5998_v57 = vadd.f32 %v5966_v60, %v5830_v12  ;;  %v2638_v8 = vpop.f32.mrb[21].mxu1  ;;  %v5967_v48 = vpop.f32.mrb[22].mxu0 }
 0x232   : > { %v4860_v56 = vadd.f32 %v4859_v33, %v4829_v20  ;;  %v5999_v40 = vadd.f32 %v4663_v31, %v2638_v8  ;;  %v4792_v13 = vadd.f32 %v5996_v28, %v4791_v42  ;;  %v5831_v17 = vpop.f32.mrb[22].mxu1  ;;  %v4666_v30 = vpop.f32.mrb[23].mxu0 }
 0x233   : > { %4764 = vst [vmem:[%s8111_s18 + $0xb0] sm:$0xff] %v5998_v57  ;;  %v6000_v9 = vadd.f32 %v5967_v48, %v5831_v17  ;;  %v2641_v14 = vpop.f32.mrb[23].mxu1  ;;  %v4833_v11 = vmul.f32 %v5998_v57, %v5998_v57 }
 0x234   : > { %4762 = vst [vmem:[%s8111_s18 + $0xa0] sm:$0xff] %v5999_v40  ;;  %v4793_v63 = vadd.f32 %v5999_v40, %v4792_v13  ;;  %v4831_v4 = vmul.f32 %v5999_v40, %v5999_v40  ;;  %v4861_v43 = vadd.f32 %v4860_v56, %v4830_v62  ;;  %v6001_v16 = vadd.f32 %v4666_v30, %v2641_v14 }
 0x235   : > { %4765 = vst [vmem:[%s8111_s18 + $0xb8] sm:$0xff] %v6000_v9  ;;  %v4834_v36 = vmul.f32 %v6000_v9, %v6000_v9 }
 0x236   : > { %v4862_v58 = vadd.f32 %v4861_v43, %v4831_v4  ;;  %4763 = vst [vmem:[%s8111_s18 + $0xa8] sm:$0xff] %v6001_v16  ;;  %v4794_v50 = vadd.f32 %v6001_v16, %v4793_v63  ;;  %v4832_v54 = vmul.f32 %v6001_v16, %v6001_v16 }
 0x237   : > { %v5970_v18 = vpop.f32.mrb[24].mxu0 }
 0x238   : > { %v4795_v32 = vadd.f32 %v5998_v57, %v4794_v50  ;;  %v4863_v24 = vadd.f32 %v4862_v58, %v4832_v54  ;;  %v5834_v19 = vpop.f32.mrb[24].mxu1  ;;  %v4679_v52 = vpop.f32.mrb[25].mxu0 }
 0x239   : > { %v6002_v2 = vadd.f32 %v5970_v18, %v5834_v19  ;;  %v2654_v39 = vpop.f32.mrb[25].mxu1  ;;  %v5971_v0 = vpop.f32.mrb[26].mxu0 }
 0x23a   : > { %v4864_v10 = vadd.f32 %v4863_v24, %v4833_v11  ;;  %v6003_v59 = vadd.f32 %v4679_v52, %v2654_v39  ;;  %v4796_v38 = vadd.f32 %v6000_v9, %v4795_v32  ;;  %v5835_v41 = vpop.f32.mrb[26].mxu1  ;;  %v4682_v37 = vpop.f32.mrb[27].mxu0 }
 0x23b   : > { %4768 = vst [vmem:[%s8111_s18 + $0xd0] sm:$0xff] %v6002_v2  ;;  %v6004_v26 = vadd.f32 %v5971_v0, %v5835_v41  ;;  %v2657_v35 = vpop.f32.mrb[27].mxu1  ;;  %v4837_v7 = vmul.f32 %v6002_v2, %v6002_v2 }
 0x23c   : > { %4766 = vst [vmem:[%s8111_s18 + $0xc0] sm:$0xff] %v6003_v59  ;;  %v4797_v5 = vadd.f32 %v6003_v59, %v4796_v38  ;;  %v4835_v34 = vmul.f32 %v6003_v59, %v6003_v59  ;;  %v4865_v6 = vadd.f32 %v4864_v10, %v4834_v36  ;;  %v6005_v49 = vadd.f32 %v4682_v37, %v2657_v35 }
 0x23d   : > { %4769 = vst [vmem:[%s8111_s18 + $0xd8] sm:$0xff] %v6004_v26  ;;  %v4838_v45 = vmul.f32 %v6004_v26, %v6004_v26 }
 0x23e   : > { %v4866_v55 = vadd.f32 %v4865_v6, %v4835_v34  ;;  %4767 = vst [vmem:[%s8111_s18 + $0xc8] sm:$0xff] %v6005_v49  ;;  %v4798_v23 = vadd.f32 %v6005_v49, %v4797_v5  ;;  %v4836_v25 = vmul.f32 %v6005_v49, %v6005_v49 }
 0x23f   : > { %v5974_v1 = vpop.f32.mrb[28].mxu0 }
 0x240   : > { %v4799_v29 = vadd.f32 %v6002_v2, %v4798_v23  ;;  %v4867_v61 = vadd.f32 %v4866_v55, %v4836_v25  ;;  %v5838_v22 = vpop.f32.mrb[28].mxu1  ;;  %v4695_v44 = vpop.f32.mrb[29].mxu0 }
 0x241   : > { %v6006_v3 = vadd.f32 %v5974_v1, %v5838_v22  ;;  %v2670_v51 = vpop.f32.mrb[29].mxu1  ;;  %v5975_v28 = vpop.f32.mrb[30].mxu0 }
 0x242   : > { %v4868_v27 = vadd.f32 %v4867_v61, %v4837_v7  ;;  %v6007_v53 = vadd.f32 %v4695_v44, %v2670_v51  ;;  %v4800_v21 = vadd.f32 %v6004_v26, %v4799_v29  ;;  %v5839_v47 = vpop.f32.mrb[30].mxu1  ;;  %v4698_v46 = vpop.f32.mrb[31].mxu0 }
 0x243   : > { %4772 = vst [vmem:[%s8111_s18 + $0xf0] sm:$0xff] %v6006_v3  ;;  %v6008_v15 = vadd.f32 %v5975_v28, %v5839_v47  ;;  %v2673_v60 = vpop.f32.mrb[31].mxu1  ;;  %v4841_v48 = vmul.f32 %v6006_v3, %v6006_v3 }
 0x244   : > { %4770 = vst [vmem:[%s8111_s18 + $0xe0] sm:$0xff] %v6007_v53  ;;  %v4801_v20 = vadd.f32 %v6007_v53, %v4800_v21  ;;  %v4839_v42 = vmul.f32 %v6007_v53, %v6007_v53  ;;  %v4869_v33 = vadd.f32 %v4868_v27, %v4838_v45  ;;  %v6009_v12 = vadd.f32 %v4698_v46, %v2673_v60 }
 0x245   : > { %4773 = vst [vmem:[%s8111_s18 + $0xf8] sm:$0xff] %v6008_v15  ;;  %v4842_v40 = vmul.f32 %v6008_v15, %v6008_v15 }
 0x246   : > { %v4870_v31 = vadd.f32 %v4869_v33, %v4839_v42  ;;  %4771 = vst [vmem:[%s8111_s18 + $0xe8] sm:$0xff] %v6009_v12  ;;  %v4802_v57 = vadd.f32 %v6009_v12, %v4801_v20  ;;  %v4840_v8 = vmul.f32 %v6009_v12, %v6009_v12 }
 0x248   : > { %v4803_v62 = vadd.f32 %v6006_v3, %v4802_v57  ;;  %v4871_v56 = vadd.f32 %v4870_v31, %v4840_v8 }
 0x24a   : > { %v4804_v13 = vadd.f32 %v6008_v15, %v4803_v62  ;;  %v4872_v17 = vadd.f32 %v4871_v56, %v4841_v48 }
 0x24c   : > { %v4805_v30 = vrot.slane %v4804_v13, 4  ;;  %v4873_v9 = vadd.f32 %v4872_v17, %v4842_v40 }
 0x24e   : > { %v4806_v14 = vadd.f32 %v4805_v30, %v4804_v13  ;;  %v4874_v63 = vrot.slane %v4873_v9, 4 }
 0x250   : > { %v4807_v4 = vrot.slane %v4806_v14, 2  ;;  %v4875_v43 = vadd.f32 %v4874_v63, %v4873_v9 }
 0x252   : > { %v4808_v16 = vadd.f32 %v4807_v4, %v4806_v14  ;;  %v4876_v58 = vrot.slane %v4875_v43, 2 }
 0x254   : > { %v4809_v50 = vrot.slane %v4808_v16, 1  ;;  %v4877_v54 = vadd.f32 %v4876_v58, %v4875_v43 }
 0x256   : > { %v4878_v18 = vrot.slane %v4877_v54, 1  ;;  %v4810_v11 = vadd.f32 %v4809_v50, %v4808_v16 }
 0x258   : > { %v4879_v32 = vadd.f32 %v4878_v18, %v4877_v54 }
 0x25a   : > { %v4881_v24 = vsel %vm4880_vm8, %v4810_v11, %v4879_v32 }
 0x25b   : > { %4882 = vst [vmem:[%s181_s22] sm:$0x3] %v4881_v24 }
 0x25c PF: > { %s14_s12 = sadd.s32 1, %s6364_s12  }
 0x25d   : > { %p11_p4 = scmp.ge.s32.totalorder %s14_s12, 4  }
 0x25f   :  { %13 = sbr.rel (!%p11_p4) target bundleno = 1 (0x1), region = 80 }

</bundles_post_ra>
